<compile_context>
chip_gen: v7x
topology: tpu7x:2x2x1
jax: 0.10.0
libtpu: 0.0.40
codegen_flags: <defaults>
</compile_context>

<pallas_src>
import functools

import numpy as np
import jax
import jax.numpy as jnp
from jax.experimental import pallas as pl
from jax.experimental.pallas import tpu as pltpu


def _round_up(x: int, m: int) -> int:
    return (x + m - 1) // m * m


def _cdiv(a: int, b: int) -> int:
    return -(-a // b)


# --------------------------------------------------------------------------- #
# Kernel
# --------------------------------------------------------------------------- #
def _char_emb_kernel(ids_ref, a_hi_ref, a_lo_ref, b_ref, o_ref, oh_ref, acc_ref,
                     *, n_char, v_pad, emb, lc):
    """One (word-tile i, table-row-chunk l) grid step.

    ids_ref : (C, TN)           int32  char ids, words on the lane axis
    a_hi_ref: (lc*E, C*V_pad)   bf16   hi half of the fused gather/view/conv table
    a_lo_ref: (lc*E, C*V_pad)   bf16   lo half (bf16 residual -> near-f32 accuracy)
    b_ref   : (E, 1)            f32    conv bias
    o_ref   : (E, TN)           f32    pooled word embeddings (lane-dense store)
    oh_ref  : (C*V_pad, TN)     bf16   scratch: cached one-hot of the char ids
    acc_ref : (E, TN)           f32    scratch: running max over conv positions
    """
    l_step = pl.program_id(1)
    tn = ids_ref.shape[1]

    # Build the one-hot once per word tile (l == 0) and cache it in VMEM.
    # bf16 one-hot is exact (0/1) and feeds the fast MXU bf16 path; a single
    # (V_pad, TN) iota is reused across all C comparisons.
    @pl.when(l_step == 0)
    def _build_onehot():
        ids = ids_ref[...]                                               # (C, TN)
        iota_v = jax.lax.broadcasted_iota(jnp.int32, (v_pad, tn), 0)     # (V_pad, TN)
        for c in range(n_char):
            hit = (iota_v == ids[c, :][None, :])
            # bool -> f32 -> bf16: both converts are universally supported.
            oh_ref[c * v_pad:(c + 1) * v_pad, :] = (
                hit.astype(jnp.float32).astype(jnp.bfloat16))

    oh = oh_ref[...]                                                     # (C*V_pad, TN)

    # gather + buggy view + depthwise conv == one bf16 MXU contraction
    # (hi/lo split keeps near-f32 weight accuracy; accumulation stays f32).
    conv = (jnp.dot(a_hi_ref[...], oh, preferred_element_type=jnp.float32)
            + jnp.dot(a_lo_ref[...], oh, preferred_element_type=jnp.float32))

    # Max over this chunk's conv positions (pure VPU, kept in f32 on all gens).
    chunk_max = conv[0:emb, :]
    for l in range(1, lc):
        chunk_max = jnp.maximum(chunk_max, conv[l * emb:(l + 1) * emb, :])

    @pl.when(l_step == 0)
    def _init():
        acc_ref[...] = chunk_max

    @pl.when(l_step > 0)
    def _update():
        acc_ref[...] = jnp.maximum(acc_ref[...], chunk_max)

    # Per-channel bias commutes with max -> add once at the end.
    @pl.when(l_step == pl.num_programs(1) - 1)
    def _finalize():
        o_ref[...] = acc_ref[...] + b_ref[...]


# --------------------------------------------------------------------------- #
# Weight-only precomputation (hoist out of the per-call path; cache per weights)
# --------------------------------------------------------------------------- #
def precompute_char_emb_tables(emb_table, conv_w, char_length):
    """Fold Embedding gather + buggy .view + depthwise Conv1d into one table.

        A[(l,e), (c,v)] = sum_k w[e,k] * emb[v, (e*C+l+k) % E] * [(e*C+l+k)//E == c]

    Returned as a bf16 hi/lo pair (fast bf16 MXU path with near-f32 accuracy).
    Depends only on the weights: compute ONCE per weight set and reuse.
    """
    v, e = emb_table.shape
    k = conv_w.shape[1]
    c = char_length
    if c < k:
        raise ValueError(f"char_length ({c}) must be >= kernel_size ({k})")
    l_out = c - k + 1

    # Buggy view: x[n, e, pos] = flat[n, e*C+pos], flat[n, j] = emb[ids[n, j//E], j%E]
    j = (jnp.arange(e)[:, None, None] * c
         + jnp.arange(l_out)[None, :, None]
         + jnp.arange(k)[None, None, :])                          # (E, L_out, K)
    src_char = j // e                                             # which char id
    src_dim = j % e                                               # which emb dim
    oh_char = jax.nn.one_hot(src_char, c, dtype=jnp.float32)      # (E, L_out, K, C)
    oh_dim = jax.nn.one_hot(src_dim, e, dtype=jnp.float32)        # (E, L_out, K, E)
    g = jnp.einsum('ek,elkc,elkd->cdle',
                   conv_w.astype(jnp.float32), oh_char, oh_dim)   # (C, E, L_out, E)
    a = jnp.einsum('vd,cdle->cvle',
                   emb_table.astype(jnp.float32), g)              # (C, V, L_out, E)

    v_pad = _round_up(v, 64)                                      # sublane aligned (f32 & bf16)
    a = jnp.pad(a, ((0, 0), (0, v_pad - v), (0, 0), (0, 0)))
    # rows ordered (l, e); columns ordered (c, v)
    a_flat = jnp.transpose(a, (2, 3, 0, 1)).reshape(l_out * e, c * v_pad)

    a_hi = a_flat.astype(jnp.bfloat16)
    a_lo = (a_flat - a_hi.astype(jnp.float32)).astype(jnp.bfloat16)
    return a_hi, a_lo, v_pad, l_out


# --------------------------------------------------------------------------- #
# VMEM budgeting / table-chunk selection
# --------------------------------------------------------------------------- #
def _est_vmem_bytes(lc, e, c, v_pad, tile):
    return (c * v_pad * tile * 2                 # cached one-hot scratch (bf16)
            + e * tile * 4                       # running-max scratch (f32)
            + 2 * c * tile * 4                   # ids block, double-buffered (int32)
            + 2 * e * tile * 4                   # out block, double-buffered (f32)
            + 2 * 2 * lc * e * c * v_pad * 2     # hi+lo table blocks, double-buffered
            + 2 * lc * e * tile * 4              # two f32 matmul results before add/max
            + e * 4)                             # bias


def _choose_l_chunk(l_out, e, c, v_pad, tile, budget_bytes):
    """Largest table row-chunk (in conv positions) whose working set fits."""
    if e % 8 != 0:
        return l_out                             # keep chunk rows sublane-aligned
    for n_chunks in range(1, l_out + 1):
        lc = _cdiv(l_out, n_chunks)
        if _est_vmem_bytes(lc, e, c, v_pad, tile) <= budget_bytes:
            return lc
    return 1


# --------------------------------------------------------------------------- #
# Forward
# --------------------------------------------------------------------------- #
def char_emb_layer_forward(char_encs, emb_table, conv_w, conv_b, *,
                           tables=None, tile_n=1024, l_chunk=None,
                           vmem_budget_bytes=40 * 1024 * 1024):
    """CHAR_EMB_LAYER.forward.

    char_encs: (B, S, C) int   -- char ids
    emb_table: (V, E) f32      -- Embedding weight (row 0 is the padding row)
    conv_w:    (E, K) f32      -- depthwise Conv1d weight (PyTorch (E,1,K) squeezed)
    conv_b:    (E,) f32
    tables:    optional result of precompute_char_emb_tables (hoist per weights)
    returns    (B, S, E) f32
    """
    b, s, c = char_encs.shape
    v, e = emb_table.shape
    if tables is None:
        tables = precompute_char_emb_tables(emb_table, conv_w, c)
    a_hi, a_lo, v_pad, l_out = tables
    n = b * s

    # ---- word tiling: words live on the LANE axis ---------------------------
    tile = max(128, min(_round_up(max(tile_n, 1), 128), _round_up(n, 128)))
    n_tiles = _cdiv(n, tile)
    if n_tiles > 1 and n_tiles % 2 == 1:
        n_tiles += 1            # even grid -> both v7x TensorCores stay busy
    n_pad = n_tiles * tile
    ids = char_encs.reshape(n, c).astype(jnp.int32)
    ids_t = jnp.pad(ids, ((0, n_pad - n), (0, 0))).T              # (C, N_pad); pad id 0 inert

    # ---- table streaming: resident if it fits VMEM, else chunk over L -------
    if l_chunk is not None:
        lc = max(1, min(int(l_chunk), l_out))
    else:
        lc = _choose_l_chunk(l_out, e, c, v_pad, tile, vmem_budget_bytes)
    if e % 8 != 0:
        lc = l_out
    n_lchunks = _cdiv(l_out, lc)
    l_pad = n_lchunks * lc
    if l_pad > l_out:
        # duplicate the last conv position's rows: the max is unaffected
        dup_hi = jnp.tile(a_hi[(l_out - 1) * e:l_out * e], (l_pad - l_out, 1))
        dup_lo = jnp.tile(a_lo[(l_out - 1) * e:l_out * e], (l_pad - l_out, 1))
        a_hi = jnp.concatenate([a_hi, dup_hi], axis=0)
        a_lo = jnp.concatenate([a_lo, dup_lo], axis=0)

    bias2d = conv_b.astype(jnp.float32).reshape(e, 1)

    est = _est_vmem_bytes(lc, e, c, v_pad, tile)
    vmem_limit = int(min(64 * 1024 * 1024, max(32 * 1024 * 1024, 2 * est)))

    kernel = functools.partial(_char_emb_kernel,
                               n_char=c, v_pad=v_pad, emb=e, lc=lc)

    out_t = pl.pallas_call(
        kernel,
        out_shape=jax.ShapeDtypeStruct((e, n_pad), jnp.float32),
        grid_spec=pltpu.PrefetchScalarGridSpec(
            num_scalar_prefetch=0,
            grid=(n_tiles, n_lchunks),
            in_specs=[
                pl.BlockSpec((c, tile), lambda i, l: (0, i)),              # ids
                pl.BlockSpec((lc * e, c * v_pad), lambda i, l: (l, 0)),    # table hi
                pl.BlockSpec((lc * e, c * v_pad), lambda i, l: (l, 0)),    # table lo
                pl.BlockSpec((e, 1), lambda i, l: (0, 0)),                 # bias
            ],
            out_specs=pl.BlockSpec((e, tile), lambda i, l: (0, i)),
            scratch_shapes=[
                pltpu.VMEM((c * v_pad, tile), jnp.bfloat16),   # cached one-hot
                pltpu.VMEM((e, tile), jnp.float32),            # running max
            ],
        ),
        compiler_params=pltpu.CompilerParams(
            dimension_semantics=("parallel", "arbitrary"),
            vmem_limit_bytes=vmem_limit,
        ),
    )(ids_t, a_hi, a_lo, bias2d)                                  # (E, N_pad)

    # Kernel keeps the lane-dense (E, tile) store; the cheap final transpose is
    # left to XLA (fuse into the consumer / emit bf16 there if it accepts it).
    return out_t[:, :n].T.reshape(b, s, e)


# --------------------------------------------------------------------------- #
# Pure-JAX reference mirroring the PyTorch forward (incl. buggy view)
# --------------------------------------------------------------------------- #
def _reference(char_encs, emb_table, conv_w, conv_b):
    b, s, c = char_encs.shape
    e = emb_table.shape[1]
    k = conv_w.shape[1]
    x = emb_table[char_encs].reshape(b * s, e, c)                 # raw reshape
    l_out = c - k + 1
    conv = jnp.stack(
        [sum(x[:, :, l + kk] * conv_w[:, kk][None, :] for kk in range(k))
         for l in range(l_out)],
        axis=-1,
    ) + conv_b[None, :, None]
    return conv.max(axis=-1).reshape(b, s, e)


if __name__ == "__main__":
    VOCAB, EMB, KSIZE, CHARS = 50, 32, 3, 16

    key = jax.random.PRNGKey(0)
    k_emb, k_w, k_b, k_ids1, k_ids2 = jax.random.split(key, 5)

    emb_table = jax.random.normal(k_emb, (VOCAB, EMB), jnp.float32) * 0.1
    emb_table = emb_table.at[0].set(0.0)               # padding_idx=0 -> zero row
    conv_w = jax.random.normal(k_w, (EMB, KSIZE), jnp.float32) * 0.2
    conv_b = jax.random.normal(k_b, (EMB,), jnp.float32) * 0.05

    # Weight-only fused table: computed once, reused across all forward calls.
    tables = precompute_char_emb_tables(emb_table, conv_w, CHARS)

    # 1) Small batch, resident table (default path).
    enc1 = jax.random.randint(k_ids1, (2, 8, CHARS), 0, VOCAB, jnp.int32)
    out1 = jax.block_until_ready(
        char_emb_layer_forward(enc1, emb_table, conv_w, conv_b, tables=tables))
    ref1 = _reference(enc1, emb_table, conv_w, conv_b)
    assert out1.shape == (2, 8, EMB)
    assert np.allclose(np.asarray(out1), np.asarray(ref1), atol=1e-3, rtol=1e-3)

    # 2) Same inputs through the table-streaming fallback (forced small chunk).
    out2 = jax.block_until_ready(
        char_emb_layer_forward(enc1, emb_table, conv_w, conv_b, tables=tables,
                               tile_n=128, l_chunk=3))
    assert np.allclose(np.asarray(out2), np.asarray(ref1), atol=1e-3, rtol=1e-3)

    # 3) Multi-tile word axis (exercises even-grid padding for v7x megacore).
    enc2 = jax.random.randint(k_ids2, (3, 100, CHARS), 0, VOCAB, jnp.int32)
    out3 = jax.block_until_ready(
        char_emb_layer_forward(enc2, emb_table, conv_w, conv_b, tables=tables,
                               tile_n=128))
    ref3 = _reference(enc2, emb_table, conv_w, conv_b)
    assert out3.shape == (3, 100, EMB)
    assert np.allclose(np.asarray(out3), np.asarray(ref3), atol=1e-3, rtol=1e-3)

    print("KERNEL_OK")
</pallas_src>

<mosaic_0001>
module attributes {stable_mosaic.version = 11 : i64} {
  func.func @_char_emb_kernel(%arg0: i32, %arg1: i32, %arg2: memref<16x128xi32, #tpu.memory_space<vmem>>, %arg3: memref<448x1024xbf16, #tpu.memory_space<vmem>>, %arg4: memref<448x1024xbf16, #tpu.memory_space<vmem>>, %arg5: memref<32x1xf32, #tpu.memory_space<vmem>>, %arg6: memref<32x128xf32, #tpu.memory_space<vmem>>, %arg7: memref<1024x128xbf16, #tpu.memory_space<vmem>>, %arg8: memref<32x128xf32, #tpu.memory_space<vmem>>) attributes {dimension_semantics = [#tpu.dimension_semantics<parallel>, #tpu.dimension_semantics<arbitrary>], iteration_bounds = array<i64: 1, 1>, scalar_prefetch = 0 : i64, scratch_operands = 2 : i64, tpu.core_type = #tpu.core_type<tc>, window_params = [{transform_indices = @transform_0, window_bounds = array<i64: 16, 128>}, {transform_indices = @transform_1, window_bounds = array<i64: 448, 1024>}, {transform_indices = @transform_2, window_bounds = array<i64: 448, 1024>}, {pipeline_mode = #tpu.pipeline_mode<synchronous>, transform_indices = @transform_3, window_bounds = array<i64: 32, 1>}, {transform_indices = @transform_4, window_bounds = array<i64: 32, 128>}]} {
    %c0_i32 = arith.constant 0 : i32
    %0 = arith.cmpi eq, %arg1, %c0_i32 : i32
    %1 = arith.extui %0 : i1 to i32
    %c0_i32_0 = arith.constant 0 : i32
    %2 = arith.cmpi ne, %1, %c0_i32_0 : i32
    scf.if %2 {
      %c0_13 = arith.constant 0 : index
      %c0_14 = arith.constant 0 : index
      %45 = vector.load %arg2[%c0_13, %c0_14] : memref<16x128xi32, #tpu.memory_space<vmem>>, vector<16x128xi32>
      %46 = tpu.iota {dimensions = array<i32: 0>} : vector<64x128xi32>
      %47 = vector.extract_strided_slice %45 {offsets = [0, 0], sizes = [1, 128], strides = [1, 1]} : vector<16x128xi32> to vector<1x128xi32>
      %48 = vector.shape_cast %47 : vector<1x128xi32> to vector<128xi32>
      %49 = vector.shape_cast %48 : vector<128xi32> to vector<1x128xi32>
      %50 = vector.broadcast %49 : vector<1x128xi32> to vector<64x128xi32>
      %51 = arith.cmpi eq, %46, %50 : vector<64x128xi32>
      %52 = arith.extui %51 : vector<64x128xi1> to vector<64x128xi32>
      %53 = arith.sitofp %52 : vector<64x128xi32> to vector<64x128xf32>
      %54 = arith.truncf %53 : vector<64x128xf32> to vector<64x128xbf16>
      %c0_15 = arith.constant 0 : index
      %c0_16 = arith.constant 0 : index
      %55 = vector.load %arg7[%c0_15, %c0_16] : memref<1024x128xbf16, #tpu.memory_space<vmem>>, vector<64x128xbf16>
      tpu.vector_store %arg7[%c0_15, %c0_16], %54 {strides = array<i32>} : memref<1024x128xbf16, #tpu.memory_space<vmem>>, vector<64x128xbf16>,
      %56 = vector.extract_strided_slice %45 {offsets = [1, 0], sizes = [1, 128], strides = [1, 1]} : vector<16x128xi32> to vector<1x128xi32>
      %57 = vector.shape_cast %56 : vector<1x128xi32> to vector<128xi32>
      %58 = vector.shape_cast %57 : vector<128xi32> to vector<1x128xi32>
      %59 = vector.broadcast %58 : vector<1x128xi32> to vector<64x128xi32>
      %60 = arith.cmpi eq, %46, %59 : vector<64x128xi32>
      %61 = arith.extui %60 : vector<64x128xi1> to vector<64x128xi32>
      %62 = arith.sitofp %61 : vector<64x128xi32> to vector<64x128xf32>
      %63 = arith.truncf %62 : vector<64x128xf32> to vector<64x128xbf16>
      %c64 = arith.constant 64 : index
      %c0_17 = arith.constant 0 : index
      %64 = vector.load %arg7[%c64, %c0_17] : memref<1024x128xbf16, #tpu.memory_space<vmem>>, vector<64x128xbf16>
      tpu.vector_store %arg7[%c64, %c0_17], %63 {strides = array<i32>} : memref<1024x128xbf16, #tpu.memory_space<vmem>>, vector<64x128xbf16>,
      %65 = vector.extract_strided_slice %45 {offsets = [2, 0], sizes = [1, 128], strides = [1, 1]} : vector<16x128xi32> to vector<1x128xi32>
      %66 = vector.shape_cast %65 : vector<1x128xi32> to vector<128xi32>
      %67 = vector.shape_cast %66 : vector<128xi32> to vector<1x128xi32>
      %68 = vector.broadcast %67 : vector<1x128xi32> to vector<64x128xi32>
      %69 = arith.cmpi eq, %46, %68 : vector<64x128xi32>
      %70 = arith.extui %69 : vector<64x128xi1> to vector<64x128xi32>
      %71 = arith.sitofp %70 : vector<64x128xi32> to vector<64x128xf32>
      %72 = arith.truncf %71 : vector<64x128xf32> to vector<64x128xbf16>
      %c128 = arith.constant 128 : index
      %c0_18 = arith.constant 0 : index
      %73 = vector.load %arg7[%c128, %c0_18] : memref<1024x128xbf16, #tpu.memory_space<vmem>>, vector<64x128xbf16>
      tpu.vector_store %arg7[%c128, %c0_18], %72 {strides = array<i32>} : memref<1024x128xbf16, #tpu.memory_space<vmem>>, vector<64x128xbf16>,
      %74 = vector.extract_strided_slice %45 {offsets = [3, 0], sizes = [1, 128], strides = [1, 1]} : vector<16x128xi32> to vector<1x128xi32>
      %75 = vector.shape_cast %74 : vector<1x128xi32> to vector<128xi32>
      %76 = vector.shape_cast %75 : vector<128xi32> to vector<1x128xi32>
      %77 = vector.broadcast %76 : vector<1x128xi32> to vector<64x128xi32>
      %78 = arith.cmpi eq, %46, %77 : vector<64x128xi32>
      %79 = arith.extui %78 : vector<64x128xi1> to vector<64x128xi32>
      %80 = arith.sitofp %79 : vector<64x128xi32> to vector<64x128xf32>
      %81 = arith.truncf %80 : vector<64x128xf32> to vector<64x128xbf16>
      %c192 = arith.constant 192 : index
      %c0_19 = arith.constant 0 : index
      %82 = vector.load %arg7[%c192, %c0_19] : memref<1024x128xbf16, #tpu.memory_space<vmem>>, vector<64x128xbf16>
      tpu.vector_store %arg7[%c192, %c0_19], %81 {strides = array<i32>} : memref<1024x128xbf16, #tpu.memory_space<vmem>>, vector<64x128xbf16>,
      %83 = vector.extract_strided_slice %45 {offsets = [4, 0], sizes = [1, 128], strides = [1, 1]} : vector<16x128xi32> to vector<1x128xi32>
      %84 = vector.shape_cast %83 : vector<1x128xi32> to vector<128xi32>
      %85 = vector.shape_cast %84 : vector<128xi32> to vector<1x128xi32>
      %86 = vector.broadcast %85 : vector<1x128xi32> to vector<64x128xi32>
      %87 = arith.cmpi eq, %46, %86 : vector<64x128xi32>
      %88 = arith.extui %87 : vector<64x128xi1> to vector<64x128xi32>
      %89 = arith.sitofp %88 : vector<64x128xi32> to vector<64x128xf32>
      %90 = arith.truncf %89 : vector<64x128xf32> to vector<64x128xbf16>
      %c256 = arith.constant 256 : index
      %c0_20 = arith.constant 0 : index
      %91 = vector.load %arg7[%c256, %c0_20] : memref<1024x128xbf16, #tpu.memory_space<vmem>>, vector<64x128xbf16>
      tpu.vector_store %arg7[%c256, %c0_20], %90 {strides = array<i32>} : memref<1024x128xbf16, #tpu.memory_space<vmem>>, vector<64x128xbf16>,
      %92 = vector.extract_strided_slice %45 {offsets = [5, 0], sizes = [1, 128], strides = [1, 1]} : vector<16x128xi32> to vector<1x128xi32>
      %93 = vector.shape_cast %92 : vector<1x128xi32> to vector<128xi32>
      %94 = vector.shape_cast %93 : vector<128xi32> to vector<1x128xi32>
      %95 = vector.broadcast %94 : vector<1x128xi32> to vector<64x128xi32>
      %96 = arith.cmpi eq, %46, %95 : vector<64x128xi32>
      %97 = arith.extui %96 : vector<64x128xi1> to vector<64x128xi32>
      %98 = arith.sitofp %97 : vector<64x128xi32> to vector<64x128xf32>
      %99 = arith.truncf %98 : vector<64x128xf32> to vector<64x128xbf16>
      %c320 = arith.constant 320 : index
      %c0_21 = arith.constant 0 : index
      %100 = vector.load %arg7[%c320, %c0_21] : memref<1024x128xbf16, #tpu.memory_space<vmem>>, vector<64x128xbf16>
      tpu.vector_store %arg7[%c320, %c0_21], %99 {strides = array<i32>} : memref<1024x128xbf16, #tpu.memory_space<vmem>>, vector<64x128xbf16>,
      %101 = vector.extract_strided_slice %45 {offsets = [6, 0], sizes = [1, 128], strides = [1, 1]} : vector<16x128xi32> to vector<1x128xi32>
      %102 = vector.shape_cast %101 : vector<1x128xi32> to vector<128xi32>
      %103 = vector.shape_cast %102 : vector<128xi32> to vector<1x128xi32>
      %104 = vector.broadcast %103 : vector<1x128xi32> to vector<64x128xi32>
      %105 = arith.cmpi eq, %46, %104 : vector<64x128xi32>
      %106 = arith.extui %105 : vector<64x128xi1> to vector<64x128xi32>
      %107 = arith.sitofp %106 : vector<64x128xi32> to vector<64x128xf32>
      %108 = arith.truncf %107 : vector<64x128xf32> to vector<64x128xbf16>
      %c384 = arith.constant 384 : index
      %c0_22 = arith.constant 0 : index
      %109 = vector.load %arg7[%c384, %c0_22] : memref<1024x128xbf16, #tpu.memory_space<vmem>>, vector<64x128xbf16>
      tpu.vector_store %arg7[%c384, %c0_22], %108 {strides = array<i32>} : memref<1024x128xbf16, #tpu.memory_space<vmem>>, vector<64x128xbf16>,
      %110 = vector.extract_strided_slice %45 {offsets = [7, 0], sizes = [1, 128], strides = [1, 1]} : vector<16x128xi32> to vector<1x128xi32>
      %111 = vector.shape_cast %110 : vector<1x128xi32> to vector<128xi32>
      %112 = vector.shape_cast %111 : vector<128xi32> to vector<1x128xi32>
      %113 = vector.broadcast %112 : vector<1x128xi32> to vector<64x128xi32>
      %114 = arith.cmpi eq, %46, %113 : vector<64x128xi32>
      %115 = arith.extui %114 : vector<64x128xi1> to vector<64x128xi32>
      %116 = arith.sitofp %115 : vector<64x128xi32> to vector<64x128xf32>
      %117 = arith.truncf %116 : vector<64x128xf32> to vector<64x128xbf16>
      %c448 = arith.constant 448 : index
      %c0_23 = arith.constant 0 : index
      %118 = vector.load %arg7[%c448, %c0_23] : memref<1024x128xbf16, #tpu.memory_space<vmem>>, vector<64x128xbf16>
      tpu.vector_store %arg7[%c448, %c0_23], %117 {strides = array<i32>} : memref<1024x128xbf16, #tpu.memory_space<vmem>>, vector<64x128xbf16>,
      %119 = vector.extract_strided_slice %45 {offsets = [8, 0], sizes = [1, 128], strides = [1, 1]} : vector<16x128xi32> to vector<1x128xi32>
      %120 = vector.shape_cast %119 : vector<1x128xi32> to vector<128xi32>
      %121 = vector.shape_cast %120 : vector<128xi32> to vector<1x128xi32>
      %122 = vector.broadcast %121 : vector<1x128xi32> to vector<64x128xi32>
      %123 = arith.cmpi eq, %46, %122 : vector<64x128xi32>
      %124 = arith.extui %123 : vector<64x128xi1> to vector<64x128xi32>
      %125 = arith.sitofp %124 : vector<64x128xi32> to vector<64x128xf32>
      %126 = arith.truncf %125 : vector<64x128xf32> to vector<64x128xbf16>
      %c512 = arith.constant 512 : index
      %c0_24 = arith.constant 0 : index
      %127 = vector.load %arg7[%c512, %c0_24] : memref<1024x128xbf16, #tpu.memory_space<vmem>>, vector<64x128xbf16>
      tpu.vector_store %arg7[%c512, %c0_24], %126 {strides = array<i32>} : memref<1024x128xbf16, #tpu.memory_space<vmem>>, vector<64x128xbf16>,
      %128 = vector.extract_strided_slice %45 {offsets = [9, 0], sizes = [1, 128], strides = [1, 1]} : vector<16x128xi32> to vector<1x128xi32>
      %129 = vector.shape_cast %128 : vector<1x128xi32> to vector<128xi32>
      %130 = vector.shape_cast %129 : vector<128xi32> to vector<1x128xi32>
      %131 = vector.broadcast %130 : vector<1x128xi32> to vector<64x128xi32>
      %132 = arith.cmpi eq, %46, %131 : vector<64x128xi32>
      %133 = arith.extui %132 : vector<64x128xi1> to vector<64x128xi32>
      %134 = arith.sitofp %133 : vector<64x128xi32> to vector<64x128xf32>
      %135 = arith.truncf %134 : vector<64x128xf32> to vector<64x128xbf16>
      %c576 = arith.constant 576 : index
      %c0_25 = arith.constant 0 : index
      %136 = vector.load %arg7[%c576, %c0_25] : memref<1024x128xbf16, #tpu.memory_space<vmem>>, vector<64x128xbf16>
      tpu.vector_store %arg7[%c576, %c0_25], %135 {strides = array<i32>} : memref<1024x128xbf16, #tpu.memory_space<vmem>>, vector<64x128xbf16>,
      %137 = vector.extract_strided_slice %45 {offsets = [10, 0], sizes = [1, 128], strides = [1, 1]} : vector<16x128xi32> to vector<1x128xi32>
      %138 = vector.shape_cast %137 : vector<1x128xi32> to vector<128xi32>
      %139 = vector.shape_cast %138 : vector<128xi32> to vector<1x128xi32>
      %140 = vector.broadcast %139 : vector<1x128xi32> to vector<64x128xi32>
      %141 = arith.cmpi eq, %46, %140 : vector<64x128xi32>
      %142 = arith.extui %141 : vector<64x128xi1> to vector<64x128xi32>
      %143 = arith.sitofp %142 : vector<64x128xi32> to vector<64x128xf32>
      %144 = arith.truncf %143 : vector<64x128xf32> to vector<64x128xbf16>
      %c640 = arith.constant 640 : index
      %c0_26 = arith.constant 0 : index
      %145 = vector.load %arg7[%c640, %c0_26] : memref<1024x128xbf16, #tpu.memory_space<vmem>>, vector<64x128xbf16>
      tpu.vector_store %arg7[%c640, %c0_26], %144 {strides = array<i32>} : memref<1024x128xbf16, #tpu.memory_space<vmem>>, vector<64x128xbf16>,
      %146 = vector.extract_strided_slice %45 {offsets = [11, 0], sizes = [1, 128], strides = [1, 1]} : vector<16x128xi32> to vector<1x128xi32>
      %147 = vector.shape_cast %146 : vector<1x128xi32> to vector<128xi32>
      %148 = vector.shape_cast %147 : vector<128xi32> to vector<1x128xi32>
      %149 = vector.broadcast %148 : vector<1x128xi32> to vector<64x128xi32>
      %150 = arith.cmpi eq, %46, %149 : vector<64x128xi32>
      %151 = arith.extui %150 : vector<64x128xi1> to vector<64x128xi32>
      %152 = arith.sitofp %151 : vector<64x128xi32> to vector<64x128xf32>
      %153 = arith.truncf %152 : vector<64x128xf32> to vector<64x128xbf16>
      %c704 = arith.constant 704 : index
      %c0_27 = arith.constant 0 : index
      %154 = vector.load %arg7[%c704, %c0_27] : memref<1024x128xbf16, #tpu.memory_space<vmem>>, vector<64x128xbf16>
      tpu.vector_store %arg7[%c704, %c0_27], %153 {strides = array<i32>} : memref<1024x128xbf16, #tpu.memory_space<vmem>>, vector<64x128xbf16>,
      %155 = vector.extract_strided_slice %45 {offsets = [12, 0], sizes = [1, 128], strides = [1, 1]} : vector<16x128xi32> to vector<1x128xi32>
      %156 = vector.shape_cast %155 : vector<1x128xi32> to vector<128xi32>
      %157 = vector.shape_cast %156 : vector<128xi32> to vector<1x128xi32>
      %158 = vector.broadcast %157 : vector<1x128xi32> to vector<64x128xi32>
      %159 = arith.cmpi eq, %46, %158 : vector<64x128xi32>
      %160 = arith.extui %159 : vector<64x128xi1> to vector<64x128xi32>
      %161 = arith.sitofp %160 : vector<64x128xi32> to vector<64x128xf32>
      %162 = arith.truncf %161 : vector<64x128xf32> to vector<64x128xbf16>
      %c768 = arith.constant 768 : index
      %c0_28 = arith.constant 0 : index
      %163 = vector.load %arg7[%c768, %c0_28] : memref<1024x128xbf16, #tpu.memory_space<vmem>>, vector<64x128xbf16>
      tpu.vector_store %arg7[%c768, %c0_28], %162 {strides = array<i32>} : memref<1024x128xbf16, #tpu.memory_space<vmem>>, vector<64x128xbf16>,
      %164 = vector.extract_strided_slice %45 {offsets = [13, 0], sizes = [1, 128], strides = [1, 1]} : vector<16x128xi32> to vector<1x128xi32>
      %165 = vector.shape_cast %164 : vector<1x128xi32> to vector<128xi32>
      %166 = vector.shape_cast %165 : vector<128xi32> to vector<1x128xi32>
      %167 = vector.broadcast %166 : vector<1x128xi32> to vector<64x128xi32>
      %168 = arith.cmpi eq, %46, %167 : vector<64x128xi32>
      %169 = arith.extui %168 : vector<64x128xi1> to vector<64x128xi32>
      %170 = arith.sitofp %169 : vector<64x128xi32> to vector<64x128xf32>
      %171 = arith.truncf %170 : vector<64x128xf32> to vector<64x128xbf16>
      %c832 = arith.constant 832 : index
      %c0_29 = arith.constant 0 : index
      %172 = vector.load %arg7[%c832, %c0_29] : memref<1024x128xbf16, #tpu.memory_space<vmem>>, vector<64x128xbf16>
      tpu.vector_store %arg7[%c832, %c0_29], %171 {strides = array<i32>} : memref<1024x128xbf16, #tpu.memory_space<vmem>>, vector<64x128xbf16>,
      %173 = vector.extract_strided_slice %45 {offsets = [14, 0], sizes = [1, 128], strides = [1, 1]} : vector<16x128xi32> to vector<1x128xi32>
      %174 = vector.shape_cast %173 : vector<1x128xi32> to vector<128xi32>
      %175 = vector.shape_cast %174 : vector<128xi32> to vector<1x128xi32>
      %176 = vector.broadcast %175 : vector<1x128xi32> to vector<64x128xi32>
      %177 = arith.cmpi eq, %46, %176 : vector<64x128xi32>
      %178 = arith.extui %177 : vector<64x128xi1> to vector<64x128xi32>
      %179 = arith.sitofp %178 : vector<64x128xi32> to vector<64x128xf32>
      %180 = arith.truncf %179 : vector<64x128xf32> to vector<64x128xbf16>
      %c896 = arith.constant 896 : index
      %c0_30 = arith.constant 0 : index
      %181 = vector.load %arg7[%c896, %c0_30] : memref<1024x128xbf16, #tpu.memory_space<vmem>>, vector<64x128xbf16>
      tpu.vector_store %arg7[%c896, %c0_30], %180 {strides = array<i32>} : memref<1024x128xbf16, #tpu.memory_space<vmem>>, vector<64x128xbf16>,
      %182 = vector.extract_strided_slice %45 {offsets = [15, 0], sizes = [1, 128], strides = [1, 1]} : vector<16x128xi32> to vector<1x128xi32>
      %183 = vector.shape_cast %182 : vector<1x128xi32> to vector<128xi32>
      %184 = vector.shape_cast %183 : vector<128xi32> to vector<1x128xi32>
      %185 = vector.broadcast %184 : vector<1x128xi32> to vector<64x128xi32>
      %186 = arith.cmpi eq, %46, %185 : vector<64x128xi32>
      %187 = arith.extui %186 : vector<64x128xi1> to vector<64x128xi32>
      %188 = arith.sitofp %187 : vector<64x128xi32> to vector<64x128xf32>
      %189 = arith.truncf %188 : vector<64x128xf32> to vector<64x128xbf16>
      %c960 = arith.constant 960 : index
      %c0_31 = arith.constant 0 : index
      %190 = vector.load %arg7[%c960, %c0_31] : memref<1024x128xbf16, #tpu.memory_space<vmem>>, vector<64x128xbf16>
      tpu.vector_store %arg7[%c960, %c0_31], %189 {strides = array<i32>} : memref<1024x128xbf16, #tpu.memory_space<vmem>>, vector<64x128xbf16>,
    } else {
    }
    %c0 = arith.constant 0 : index
    %c0_1 = arith.constant 0 : index
    %3 = vector.load %arg7[%c0, %c0_1] : memref<1024x128xbf16, #tpu.memory_space<vmem>>, vector<1024x128xbf16>
    %c0_2 = arith.constant 0 : index
    %c0_3 = arith.constant 0 : index
    %4 = vector.load %arg3[%c0_2, %c0_3] : memref<448x1024xbf16, #tpu.memory_space<vmem>>, vector<448x1024xbf16>
    %cst = arith.constant dense<0.000000e+00> : vector<448x128xf32>
    %5 = tpu.matmul %4, %3, %cst {dimension_numbers = #tpu.dot_dimension_numbers<[1], [0], [0], [1], [0, 0, 1, 1], [], []>} : vector<448x1024xbf16>, vector<1024x128xbf16>, vector<448x128xf32> -> vector<448x128xf32>
    %c0_4 = arith.constant 0 : index
    %c0_5 = arith.constant 0 : index
    %6 = vector.load %arg4[%c0_4, %c0_5] : memref<448x1024xbf16, #tpu.memory_space<vmem>>, vector<448x1024xbf16>
    %cst_6 = arith.constant dense<0.000000e+00> : vector<448x128xf32>
    %7 = tpu.matmul %6, %3, %cst_6 {dimension_numbers = #tpu.dot_dimension_numbers<[1], [0], [0], [1], [0, 0, 1, 1], [], []>} : vector<448x1024xbf16>, vector<1024x128xbf16>, vector<448x128xf32> -> vector<448x128xf32>
    %8 = arith.addf %5, %7 : vector<448x128xf32>
    %9 = vector.extract_strided_slice %8 {offsets = [0, 0], sizes = [32, 128], strides = [1, 1]} : vector<448x128xf32> to vector<32x128xf32>
    %10 = vector.extract_strided_slice %8 {offsets = [32, 0], sizes = [32, 128], strides = [1, 1]} : vector<448x128xf32> to vector<32x128xf32>
    %11 = arith.maximumf %9, %10 : vector<32x128xf32>
    %12 = vector.extract_strided_slice %8 {offsets = [64, 0], sizes = [32, 128], strides = [1, 1]} : vector<448x128xf32> to vector<32x128xf32>
    %13 = arith.maximumf %11, %12 : vector<32x128xf32>
    %14 = vector.extract_strided_slice %8 {offsets = [96, 0], sizes = [32, 128], strides = [1, 1]} : vector<448x128xf32> to vector<32x128xf32>
    %15 = arith.maximumf %13, %14 : vector<32x128xf32>
    %16 = vector.extract_strided_slice %8 {offsets = [128, 0], sizes = [32, 128], strides = [1, 1]} : vector<448x128xf32> to vector<32x128xf32>
    %17 = arith.maximumf %15, %16 : vector<32x128xf32>
    %18 = vector.extract_strided_slice %8 {offsets = [160, 0], sizes = [32, 128], strides = [1, 1]} : vector<448x128xf32> to vector<32x128xf32>
    %19 = arith.maximumf %17, %18 : vector<32x128xf32>
    %20 = vector.extract_strided_slice %8 {offsets = [192, 0], sizes = [32, 128], strides = [1, 1]} : vector<448x128xf32> to vector<32x128xf32>
    %21 = arith.maximumf %19, %20 : vector<32x128xf32>
    %22 = vector.extract_strided_slice %8 {offsets = [224, 0], sizes = [32, 128], strides = [1, 1]} : vector<448x128xf32> to vector<32x128xf32>
    %23 = arith.maximumf %21, %22 : vector<32x128xf32>
    %24 = vector.extract_strided_slice %8 {offsets = [256, 0], sizes = [32, 128], strides = [1, 1]} : vector<448x128xf32> to vector<32x128xf32>
    %25 = arith.maximumf %23, %24 : vector<32x128xf32>
    %26 = vector.extract_strided_slice %8 {offsets = [288, 0], sizes = [32, 128], strides = [1, 1]} : vector<448x128xf32> to vector<32x128xf32>
    %27 = arith.maximumf %25, %26 : vector<32x128xf32>
    %28 = vector.extract_strided_slice %8 {offsets = [320, 0], sizes = [32, 128], strides = [1, 1]} : vector<448x128xf32> to vector<32x128xf32>
    %29 = arith.maximumf %27, %28 : vector<32x128xf32>
    %30 = vector.extract_strided_slice %8 {offsets = [352, 0], sizes = [32, 128], strides = [1, 1]} : vector<448x128xf32> to vector<32x128xf32>
    %31 = arith.maximumf %29, %30 : vector<32x128xf32>
    %32 = vector.extract_strided_slice %8 {offsets = [384, 0], sizes = [32, 128], strides = [1, 1]} : vector<448x128xf32> to vector<32x128xf32>
    %33 = arith.maximumf %31, %32 : vector<32x128xf32>
    %34 = vector.extract_strided_slice %8 {offsets = [416, 0], sizes = [32, 128], strides = [1, 1]} : vector<448x128xf32> to vector<32x128xf32>
    %35 = arith.maximumf %33, %34 : vector<32x128xf32>
    %c0_i32_7 = arith.constant 0 : i32
    %36 = arith.cmpi eq, %arg1, %c0_i32_7 : i32
    %37 = arith.extui %36 : i1 to i32
    %c0_i32_8 = arith.constant 0 : i32
    %38 = arith.cmpi ne, %37, %c0_i32_8 : i32
    scf.if %38 {
      %c0_13 = arith.constant 0 : index
      %c0_14 = arith.constant 0 : index
      %45 = vector.load %arg8[%c0_13, %c0_14] : memref<32x128xf32, #tpu.memory_space<vmem>>, vector<32x128xf32>
      tpu.vector_store %arg8[%c0_13, %c0_14], %35 {strides = array<i32>} : memref<32x128xf32, #tpu.memory_space<vmem>>, vector<32x128xf32>,
    } else {
    }
    %c0_i32_9 = arith.constant 0 : i32
    %39 = arith.cmpi sgt, %arg1, %c0_i32_9 : i32
    %40 = arith.extui %39 : i1 to i32
    %c0_i32_10 = arith.constant 0 : i32
    %41 = arith.cmpi ne, %40, %c0_i32_10 : i32
    scf.if %41 {
      %c0_13 = arith.constant 0 : index
      %c0_14 = arith.constant 0 : index
      %45 = vector.load %arg8[%c0_13, %c0_14] : memref<32x128xf32, #tpu.memory_space<vmem>>, vector<32x128xf32>
      %46 = arith.maximumf %45, %35 : vector<32x128xf32>
      %c0_15 = arith.constant 0 : index
      %c0_16 = arith.constant 0 : index
      %47 = vector.load %arg8[%c0_15, %c0_16] : memref<32x128xf32, #tpu.memory_space<vmem>>, vector<32x128xf32>
      tpu.vector_store %arg8[%c0_15, %c0_16], %46 {strides = array<i32>} : memref<32x128xf32, #tpu.memory_space<vmem>>, vector<32x128xf32>,
    } else {
    }
    %c0_i32_11 = arith.constant 0 : i32
    %42 = arith.cmpi eq, %arg1, %c0_i32_11 : i32
    %43 = arith.extui %42 : i1 to i32
    %c0_i32_12 = arith.constant 0 : i32
    %44 = arith.cmpi ne, %43, %c0_i32_12 : i32
    scf.if %44 {
      %c0_13 = arith.constant 0 : index
      %c0_14 = arith.constant 0 : index
      %45 = vector.load %arg8[%c0_13, %c0_14] : memref<32x128xf32, #tpu.memory_space<vmem>>, vector<32x128xf32>
      %c0_15 = arith.constant 0 : index
      %c0_16 = arith.constant 0 : index
      %46 = vector.load %arg5[%c0_15, %c0_16] : memref<32x1xf32, #tpu.memory_space<vmem>>, vector<32x1xf32>
      %47 = vector.broadcast %46 : vector<32x1xf32> to vector<32x128xf32>
      %48 = arith.addf %45, %47 : vector<32x128xf32>
      %c0_17 = arith.constant 0 : index
      %c0_18 = arith.constant 0 : index
      %49 = vector.load %arg6[%c0_17, %c0_18] : memref<32x128xf32, #tpu.memory_space<vmem>>, vector<32x128xf32>
      tpu.vector_store %arg6[%c0_17, %c0_18], %48 {strides = array<i32>} : memref<32x128xf32, #tpu.memory_space<vmem>>, vector<32x128xf32>,
    } else {
    }
    return
  }
  func.func @transform_0(%arg0: i32, %arg1: i32) -> (i32, i32) {
    %c0_i32 = arith.constant 0 : i32
    %c0_i32_0 = arith.constant 0 : i32
    return %c0_i32, %arg0 : i32, i32
  }
  func.func @transform_1(%arg0: i32, %arg1: i32) -> (i32, i32) {
    %c0_i32 = arith.constant 0 : i32
    %c0_i32_0 = arith.constant 0 : i32
    return %arg1, %c0_i32 : i32, i32
  }
  func.func @transform_2(%arg0: i32, %arg1: i32) -> (i32, i32) {
    %c0_i32 = arith.constant 0 : i32
    %c0_i32_0 = arith.constant 0 : i32
    return %arg1, %c0_i32 : i32, i32
  }
  func.func @transform_3(%arg0: i32, %arg1: i32) -> (i32, i32) {
    %c0_i32 = arith.constant 0 : i32
    %c0_i32_0 = arith.constant 0 : i32
    %c0_i32_1 = arith.constant 0 : i32
    return %c0_i32, %c0_i32_0 : i32, i32
  }
  func.func @transform_4(%arg0: i32, %arg1: i32) -> (i32, i32) {
    %c0_i32 = arith.constant 0 : i32
    %c0_i32_0 = arith.constant 0 : i32
    return %c0_i32, %arg0 : i32, i32
  }
}

</mosaic_0001>

<bundles_post_ra>
// kernel: tpu_custom_call.1
= control target key start
LH: loop header
LB: loop body
LE: loop exit
PB: predicated region body
PF: predicated region fallthrough
CT: control target
= control target key end

     0   :  { %9 = vsyncpa [#allocation5], 0  ;;  %s7889_s0 = inlined_call_operand.vmem [shape: s32[16,128], index: 0, kind: input, shape index: {}]   ;;  %s7890_s1 = inlined_call_operand.hbm [shape: bf16[448,1024], index: 1, kind: input, shape index: {}]   ;;  %s7891_s2 = inlined_call_operand.hbm [shape: bf16[448,1024], index: 2, kind: input, shape index: {}]   ;;  %s7892_s3 = inlined_call_operand.vmem [shape: f32[32,1], index: 3, kind: input, shape index: {}]   ;;  %s7893_s4 = inlined_call_operand.hbm [shape: f32[32,128], index: 4, kind: output, shape index: {}]  }
   0x1   :  { %10 = vsyncpa [#allocation8], 0 }
   0x2   :  { %11 = vsyncpa [#allocation6], 0  ;;  %s7222_s15 = smov [#allocation4]   ;;  %s7150_s19 = scalar_lea.hbm %s7890_s1, 28672 }
   0x3   :  { %s19_s16 = sshll.u32 %s7222_s15, 4  ;;  %p7151_p0 = scmp.ne.s32.totalorder %s7890_s1, %s7150_s19  ;;  %s20_s16 = int_to_ptr.vmem [resolvable:$true] %s19_s16 }
   0x4   :  { %p7154_p1 = scmp.lt.u32.totalorder %s7150_s19, %s7890_s1 }
   0x6   :  { %p7156_p2 = pnand %p7154_p1, %p7151_p0 }
   0x8   :  { %7159 = shalt.err (!%p7156_p2)
}
   0x9   :  { %s7160_s24 = scalar_lea.vmem %s20_s16, 28672  ;;  %p7165_p4 = scmp.lt.s32.totalorder %s20_s16, %s20_s16 }
   0xa   :  { %p7161_p3 = scmp.ne.s32.totalorder %s20_s16, %s7160_s24  ;;  %p7166_p5 = scmp.lt.s32.totalorder %s7160_s24, %s7160_s24 }
   0xc   :  { %p7167_p6 = por %p7166_p5, %p7165_p4 }
   0xe   :  { %p7168_p7 = pnand %p7167_p6, %p7161_p3 }
  0x10   :  { %7171 = shalt.err (!%p7168_p7)
}
  0x11   :  { %s7223_s25 = smov 512   ;;  %s7224_s26 = smov 32  }
  0x12   :  { %25 = dma.hbm_to_vmem [thread:$0]  %s7890_s1, 28672, %s20_s16, [#allocation5], %s7223_s25, %s7223_s25, %s7224_s26  }
  0x13   :  { %s7225_s29 = smov [#allocation7]   ;;  %s7172_s7 = scalar_lea.hbm %s7891_s2, 28672 }
  0x14   :  { %s31_s30 = sshll.u32 %s7225_s29, 4  ;;  %p7173_p8 = scmp.ne.s32.totalorder %s7891_s2, %s7172_s7  ;;  %s32_s30 = int_to_ptr.vmem [resolvable:$true] %s31_s30 }
  0x15   :  { %p7176_p9 = scmp.lt.u32.totalorder %s7172_s7, %s7891_s2 }
  0x17   :  { %p7178_p10 = pnand %p7176_p9, %p7173_p8 }
  0x19   :  { %7181 = shalt.err (!%p7178_p10)
}
  0x1a   :  { %s7182_s12 = scalar_lea.vmem %s32_s30, 28672  ;;  %p7187_p12 = scmp.lt.s32.totalorder %s32_s30, %s32_s30 }
  0x1b   :  { %p7183_p11 = scmp.ne.s32.totalorder %s32_s30, %s7182_s12  ;;  %p7188_p13 = scmp.lt.s32.totalorder %s7182_s12, %s7182_s12 }
  0x1d   :  { %p7189_p0 = por %p7188_p13, %p7187_p12 }
  0x1f   :  { %p7190_p1 = pnand %p7189_p0, %p7183_p11 }
  0x21   :  { %7193 = shalt.err (!%p7190_p1)
}
  0x22   :  { %37 = dma.hbm_to_vmem [thread:$0]  %s7891_s2, 28672, %s32_s30, [#allocation8], %s7223_s25, %s7223_s25, %s7224_s26  }
  0x23   :  { %7216 = dma.done.wait [#allocation5], 28672  }
  0x24   :  { %7217 = vsyncadd [#allocation5], 4294938624 }
  0x25   :  { %7218 = dma.done.wait [#allocation8], 28672  }
  0x26   :  { %7219 = vsyncadd [#allocation8], 4294938624  ;;  %v53_v0 = vlaneseq  ;;  %v7226_v1 = vmov 0   ;;  %v7299_v7 = vld [vmem:[%s7889_s0] sm:$0xff]  ;;  %v7227_v18 = vmov 1.0|1.0  }
  0x27   :  { %2270 = vmatprep.subr.bf16.mxu1 %v7226_v1  ;;  %4418 = vmatprep.subr.bf16.mxu0 %v7226_v1  ;;  %v7301_v8 = vld [vmem:[#allocation7] sm:$0xff] }
  0x28   :  { %v7282_v2 = vshrl.u32 %v53_v0, 7  ;;  %7147 = vset.pattern.permute.xlu0 %v7226_v1  ;;  %7148 = vset.pattern.permute.xlu1 %v7226_v1  ;;  %v7303_v9 = vld [vmem:[#allocation7 + $0x20] sm:$0xff] }
  0x29   :  { %v7311_v12 = vld [vmem:[#allocation4] sm:$0xff]  ;;  %v5706_v15 = vcombine.low %v7301_v8, %v7303_v9  ;;  %v5707_v16 = vcombine.high %v7301_v8, %v7303_v9 }
  0x2a   :  { %v64_v3 = vsub.s32 0, %v7282_v2  ;;  %v7288_v4 = vadd.s32 8, %v7282_v2  ;;  %v7291_v5 = vadd.s32 16, %v7282_v2  ;;  %v7294_v6 = vadd.s32 24, %v7282_v2  ;;  %v7313_v13 = vld [vmem:[#allocation4 + $0x20] sm:$0xff] }
  0x2b   :  { %v7309_v11 = vadd.s32 32, %v7282_v2  ;;  %v7316_v14 = vadd.s32 40, %v7282_v2  ;;  %v5931_v17 = vcombine.high %v7311_v12, %v7313_v13  ;;  %2302 = vmatprep.mubr.bf16.mxu1 %v5707_v16  ;;  %v7333_v19 = vadd.s32 48, %v7282_v2  ;;  %v934_v29 = vld [vmem:[#allocation7 + $0x40] sm:$0xff] }
  0x2c   :  { %v65_v10 = vrot.slane %v7299_v7, %v64_v3  ;;  %v7338_v20 = vadd.s32 56, %v7282_v2  ;;  %v100_v21 = vsub.s32 1, %v7282_v2  ;;  %v136_v23 = vsub.s32 2, %v7282_v2  ;;  %v938_v30 = vld [vmem:[#allocation7 + $0x60] sm:$0xff] }
  0x2d   :  { %4450 = vmatprep.mubr.bf16.mxu0 %v5931_v17  ;;  %v172_v25 = vsub.s32 3, %v7282_v2  ;;  %v208_v27 = vsub.s32 4, %v7282_v2  ;;  %v710_v31 = vld [vmem:[#allocation4 + $0x40] sm:$0xff]  ;;  %v5930_v33 = vcombine.low %v7311_v12, %v7313_v13  ;;  %v5715_v34 = vcombine.high %v934_v29, %v938_v30 }
  0x2e   :  { %vm66_vm0 = vcmp.eq.s32.totalorder %v7282_v2, %v65_v10  ;;  %vm67_vm1 = vcmp.eq.s32.totalorder %v7288_v4, %v65_v10  ;;  %vm68_vm2 = vcmp.eq.s32.totalorder %v7291_v5, %v65_v10  ;;  %vm69_vm3 = vcmp.eq.s32.totalorder %v7294_v6, %v65_v10  ;;  %v714_v32 = vld [vmem:[#allocation4 + $0x60] sm:$0xff] }
  0x2f   :  { %vm6154_vm4 = vmpackc.low %vm67_vm1, %vm66_vm0  ;;  %vm70_vm6 = vcmp.eq.s32.totalorder %v7309_v11, %v65_v10  ;;  %vm71_vm7 = vcmp.eq.s32.totalorder %v7316_v14, %v65_v10  ;;  %vm72_vm9 = vcmp.eq.s32.totalorder %v7333_v19, %v65_v10  ;;  %vm73_vm10 = vcmp.eq.s32.totalorder %v7338_v20, %v65_v10  ;;  %v942_v36 = vld [vmem:[#allocation7 + $0x80] sm:$0xff] }
  0x30   :  { %6155 = vmatpush1.bf16.msk.msra.mxu1 %vm6154_vm4, %v7227_v18  ;;  %6283 = vmatpush1.bf16.msk.msra.mxu0 %vm6154_vm4, %v7227_v18  ;;  %vm6156_vm5 = vmpackc.low %vm69_vm3, %vm68_vm2  ;;  %v101_v22 = vrot.slane %v7299_v7, %v100_v21  ;;  %v137_v24 = vrot.slane %v7299_v7, %v136_v23  ;;  %v173_v26 = vrot.slane %v7299_v7, %v172_v25  ;;  %v946_v37 = vld [vmem:[#allocation7 + $0xa0] sm:$0xff]  ;;  %v244_v40 = vsub.s32 5, %v7282_v2 }
  0x31   :  { %2272 = vmatprep.subr.bf16.mxu1 %v7226_v1  ;;  %4420 = vmatprep.subr.bf16.mxu0 %v7226_v1  ;;  %vm6158_vm8 = vmpackc.low %vm71_vm7, %vm70_vm6  ;;  %v209_v28 = vrot.slane %v7299_v7, %v208_v27  ;;  %v5939_v35 = vcombine.high %v710_v31, %v714_v32  ;;  %v718_v38 = vld [vmem:[#allocation4 + $0x80] sm:$0xff]  ;;  %v5714_v41 = vcombine.low %v934_v29, %v938_v30  ;;  %v280_v60 = vsub.s32 6, %v7282_v2 }
  0x32   :  { %vm6160_vm11 = vmpackc.low %vm73_vm10, %vm72_vm9  ;;  %vm102_vm12 = vcmp.eq.s32.totalorder %v7282_v2, %v101_v22  ;;  %vm103_vm13 = vcmp.eq.s32.totalorder %v7288_v4, %v101_v22  ;;  %vm104_vm15 = vcmp.eq.s32.totalorder %v7291_v5, %v101_v22  ;;  %vm105_vm0 = vcmp.eq.s32.totalorder %v7294_v6, %v101_v22  ;;  %v722_v39 = vld [vmem:[#allocation4 + $0xa0] sm:$0xff] }
  0x33   :  { %vm6162_vm14 = vmpackc.low %vm103_vm13, %vm102_vm12  ;;  %vm106_vm2 = vcmp.eq.s32.totalorder %v7309_v11, %v101_v22  ;;  %vm107_vm3 = vcmp.eq.s32.totalorder %v7316_v14, %v101_v22  ;;  %vm109_vm6 = vcmp.eq.s32.totalorder %v7338_v20, %v101_v22  ;;  %vm139_vm9 = vcmp.eq.s32.totalorder %v7288_v4, %v137_v24  ;;  %v950_v46 = vld [vmem:[#allocation7 + $0xc0] sm:$0xff] }
  0x34   :  { %6157 = vmatpush1.bf16.msk.msra.mxu1 %vm6156_vm5, %v7227_v18  ;;  %6285 = vmatpush1.bf16.msk.msra.mxu0 %vm6156_vm5, %v7227_v18  ;;  %vm6164_vm1 = vmpackc.low %vm105_vm0, %vm104_vm15  ;;  %vm108_vm5 = vcmp.eq.s32.totalorder %v7333_v19, %v101_v22  ;;  %vm141_vm12 = vcmp.eq.s32.totalorder %v7294_v6, %v137_v24  ;;  %vm143_vm15 = vcmp.eq.s32.totalorder %v7316_v14, %v137_v24  ;;  %v954_v47 = vld [vmem:[#allocation7 + $0xe0] sm:$0xff] }
  0x35   :  { %2274 = vmatprep.subr.bf16.mxu1 %v7226_v1  ;;  %4422 = vmatprep.subr.bf16.mxu0 %v7226_v1  ;;  %vm6166_vm4 = vmpackc.low %vm107_vm3, %vm106_vm2  ;;  %vm145_vm2 = vcmp.eq.s32.totalorder %v7338_v20, %v137_v24  ;;  %v5938_v42 = vcombine.low %v710_v31, %v714_v32  ;;  %v5723_v43 = vcombine.high %v942_v36, %v946_v37  ;;  %v726_v48 = vld [vmem:[#allocation4 + $0xc0] sm:$0xff]  ;;  %v316_v32 = vsub.s32 7, %v7282_v2 }
  0x36   :  { %vm6168_vm7 = vmpackc.low %vm109_vm6, %vm108_vm5  ;;  %vm175_vm5 = vcmp.eq.s32.totalorder %v7288_v4, %v173_v26  ;;  %v5947_v44 = vcombine.high %v718_v38, %v722_v39  ;;  %v7467_v45 = vrot.slane %v7299_v7, %v244_v40  ;;  %v730_v49 = vld [vmem:[#allocation4 + $0xe0] sm:$0xff]  ;;  %v5722_v50 = vcombine.low %v942_v36, %v946_v37 }
  0x37   :  { %v5946_v51 = vcombine.low %v718_v38, %v722_v39  ;;  %v5731_v52 = vcombine.high %v950_v46, %v954_v47  ;;  %v5955_v53 = vcombine.high %v726_v48, %v730_v49  ;;  %v958_v54 = vld [vmem:[#allocation7 + $0x100] sm:$0xff]  ;;  %v5730_v58 = vcombine.low %v950_v46, %v954_v47 }
  0x38   :  { %6159 = vmatpush1.bf16.msk.msra.mxu1 %vm6158_vm8, %v7227_v18  ;;  %6287 = vmatpush1.bf16.msk.msra.mxu0 %vm6158_vm8, %v7227_v18  ;;  %vm138_vm8 = vcmp.eq.s32.totalorder %v7282_v2, %v137_v24  ;;  %v962_v55 = vld [vmem:[#allocation7 + $0x120] sm:$0xff]  ;;  %v5954_v59 = vcombine.low %v726_v48, %v730_v49  ;;  %v7505_v63 = vrot.slane %v7299_v7, %v280_v60 }
  0x39   :  { %2276 = vmatprep.subr.bf16.mxu1 %v7226_v1  ;;  %4424 = vmatprep.subr.bf16.mxu0 %v7226_v1  ;;  %vm6170_vm10 = vmpackc.low %vm139_vm9, %vm138_vm8  ;;  %vm177_vm8 = vcmp.eq.s32.totalorder %v7294_v6, %v173_v26  ;;  %v734_v56 = vld [vmem:[#allocation4 + $0x100] sm:$0xff]  ;;  %v5739_v61 = vcombine.high %v958_v54, %v962_v55  ;;  %v5738_v12 = vcombine.low %v958_v54, %v962_v55 }
  0x3a   :  { %v738_v57 = vld [vmem:[#allocation4 + $0x120] sm:$0xff]  ;;  %v7545_v37 = vrot.slane %v7299_v7, %v316_v32 }
  0x3b   :  { %v5963_v62 = vcombine.high %v734_v56, %v738_v57  ;;  %v966_v0 = vld [vmem:[#allocation7 + $0x140] sm:$0xff]  ;;  %v5962_v13 = vcombine.low %v734_v56, %v738_v57 }
  0x3c   :  { %6161 = vmatpush1.bf16.msk.msra.mxu1 %vm6160_vm11, %v7227_v18  ;;  %6289 = vmatpush1.bf16.msk.msra.mxu0 %vm6160_vm11, %v7227_v18  ;;  %vm140_vm11 = vcmp.eq.s32.totalorder %v7291_v5, %v137_v24  ;;  %v970_v8 = vld [vmem:[#allocation7 + $0x160] sm:$0xff] }
  0x3d   :  { %2278 = vmatprep.subr.bf16.mxu1 %v7226_v1  ;;  %4426 = vmatprep.subr.bf16.mxu0 %v7226_v1  ;;  %vm6172_vm13 = vmpackc.low %vm141_vm12, %vm140_vm11  ;;  %vm179_vm11 = vcmp.eq.s32.totalorder %v7316_v14, %v173_v26  ;;  %v742_v9 = vld [vmem:[#allocation4 + $0x140] sm:$0xff] }
  0x3e   :  { %v746_v10 = vld [vmem:[#allocation4 + $0x160] sm:$0xff] }
  0x3f   :  { %v5971_v16 = vcombine.high %v742_v9, %v746_v10  ;;  %v974_v17 = vld [vmem:[#allocation7 + $0x180] sm:$0xff]  ;;  %v5970_v29 = vcombine.low %v742_v9, %v746_v10 }
  0x40   :  { %6163 = vmatpush1.bf16.msk.msra.mxu1 %vm6162_vm14, %v7227_v18  ;;  %6291 = vmatpush1.bf16.msk.msra.mxu0 %vm6162_vm14, %v7227_v18  ;;  %vm142_vm14 = vcmp.eq.s32.totalorder %v7309_v11, %v137_v24  ;;  %v978_v22 = vld [vmem:[#allocation7 + $0x1a0] sm:$0xff] }
  0x41   :  { %2280 = vmatprep.subr.bf16.mxu1 %v7226_v1  ;;  %4428 = vmatprep.subr.bf16.mxu0 %v7226_v1  ;;  %vm6174_vm0 = vmpackc.low %vm143_vm15, %vm142_vm14  ;;  %vm181_vm14 = vcmp.eq.s32.totalorder %v7338_v20, %v173_v26  ;;  %v5755_v30 = vcombine.high %v974_v17, %v978_v22  ;;  %v762_v36 = vld [vmem:[#allocation4 + $0x1e0] sm:$0xff]  ;;  %v5754_v38 = vcombine.low %v974_v17, %v978_v22 }
  0x42   :  { %v990_v7 = vld [vmem:[#allocation7 + $0x200] sm:$0xff] }
  0x43   :  { %v1014_v10 = vld [vmem:[#allocation7 + $0x2c0] sm:$0xff] }
  0x44   :  { %6165 = vmatpush1.bf16.msk.msra.mxu1 %vm6164_vm1, %v7227_v18  ;;  %6293 = vmatpush1.bf16.msk.msra.mxu0 %vm6164_vm1, %v7227_v18  ;;  %vm144_vm1 = vcmp.eq.s32.totalorder %v7333_v19, %v137_v24  ;;  %v750_v24 = vld [vmem:[#allocation4 + $0x180] sm:$0xff] }
  0x45   :  { %2282 = vmatprep.subr.bf16.mxu1 %v7226_v1  ;;  %4430 = vmatprep.subr.bf16.mxu0 %v7226_v1  ;;  %vm6176_vm3 = vmpackc.low %vm145_vm2, %vm144_vm1  ;;  %vm211_vm1 = vcmp.eq.s32.totalorder %v7288_v4, %v209_v28 }
  0x48   :  { %6167 = vmatpush1.bf16.msk.msra.mxu1 %vm6166_vm4, %v7227_v18  ;;  %6295 = vmatpush1.bf16.msk.msra.mxu0 %vm6166_vm4, %v7227_v18  ;;  %vm174_vm4 = vcmp.eq.s32.totalorder %v7282_v2, %v173_v26 }
  0x49   :  { %2284 = vmatprep.subr.bf16.mxu1 %v7226_v1  ;;  %4432 = vmatprep.subr.bf16.mxu0 %v7226_v1  ;;  %vm6178_vm6 = vmpackc.low %vm175_vm5, %vm174_vm4  ;;  %vm213_vm4 = vcmp.eq.s32.totalorder %v7294_v6, %v209_v28 }
  0x4c   :  { %6169 = vmatpush1.bf16.msk.msra.mxu1 %vm6168_vm7, %v7227_v18  ;;  %6297 = vmatpush1.bf16.msk.msra.mxu0 %vm6168_vm7, %v7227_v18  ;;  %vm176_vm7 = vcmp.eq.s32.totalorder %v7291_v5, %v173_v26 }
  0x4d   :  { %2286 = vmatprep.subr.bf16.mxu1 %v7226_v1  ;;  %4434 = vmatprep.subr.bf16.mxu0 %v7226_v1  ;;  %vm6180_vm9 = vmpackc.low %vm177_vm8, %vm176_vm7  ;;  %vm215_vm7 = vcmp.eq.s32.totalorder %v7316_v14, %v209_v28 }
  0x50   :  { %6171 = vmatpush1.bf16.msk.msra.mxu1 %vm6170_vm10, %v7227_v18  ;;  %6299 = vmatpush1.bf16.msk.msra.mxu0 %vm6170_vm10, %v7227_v18  ;;  %vm178_vm10 = vcmp.eq.s32.totalorder %v7309_v11, %v173_v26 }
  0x51   :  { %2288 = vmatprep.subr.bf16.mxu1 %v7226_v1  ;;  %4436 = vmatprep.subr.bf16.mxu0 %v7226_v1  ;;  %vm6182_vm12 = vmpackc.low %vm179_vm11, %vm178_vm10  ;;  %vm217_vm10 = vcmp.eq.s32.totalorder %v7338_v20, %v209_v28 }
  0x54   :  { %6173 = vmatpush1.bf16.msk.msra.mxu1 %vm6172_vm13, %v7227_v18  ;;  %6301 = vmatpush1.bf16.msk.msra.mxu0 %vm6172_vm13, %v7227_v18  ;;  %vm180_vm13 = vcmp.eq.s32.totalorder %v7333_v19, %v173_v26  ;;  %v754_v26 = vld [vmem:[#allocation4 + $0x1a0] sm:$0xff] }
  0x55   :  { %2290 = vmatprep.subr.bf16.mxu1 %v7226_v1  ;;  %4438 = vmatprep.subr.bf16.mxu0 %v7226_v1  ;;  %vm6184_vm15 = vmpackc.low %vm181_vm14, %vm180_vm13  ;;  %vm247_vm13 = vcmp.eq.s32.totalorder %v7288_v4, %v7467_v45  ;;  %v5979_v31 = vcombine.high %v750_v24, %v754_v26  ;;  %v5978_v39 = vcombine.low %v750_v24, %v754_v26  ;;  %v1022_v26 = vld [vmem:[#allocation7 + $0x300] sm:$0xff] }
  0x58   :  { %6175 = vmatpush1.bf16.msk.msra.mxu1 %vm6174_vm0, %v7227_v18  ;;  %6303 = vmatpush1.bf16.msk.msra.mxu0 %vm6174_vm0, %v7227_v18  ;;  %vm210_vm0 = vcmp.eq.s32.totalorder %v7282_v2, %v209_v28 }
  0x59   :  { %2292 = vmatprep.subr.bf16.mxu1 %v7226_v1  ;;  %4440 = vmatprep.subr.bf16.mxu0 %v7226_v1  ;;  %vm6186_vm2 = vmpackc.low %vm211_vm1, %vm210_vm0  ;;  %vm249_vm0 = vcmp.eq.s32.totalorder %v7294_v6, %v7467_v45 }
  0x5c   :  { %6177 = vmatpush1.bf16.msk.msra.mxu1 %vm6176_vm3, %v7227_v18  ;;  %6305 = vmatpush1.bf16.msk.msra.mxu0 %vm6176_vm3, %v7227_v18  ;;  %vm212_vm3 = vcmp.eq.s32.totalorder %v7291_v5, %v209_v28 }
  0x5d   :  { %2294 = vmatprep.subr.bf16.mxu1 %v7226_v1  ;;  %4442 = vmatprep.subr.bf16.mxu0 %v7226_v1  ;;  %vm6188_vm5 = vmpackc.low %vm213_vm4, %vm212_vm3  ;;  %vm251_vm3 = vcmp.eq.s32.totalorder %v7316_v14, %v7467_v45 }
  0x60   :  { %6179 = vmatpush1.bf16.msk.msra.mxu1 %vm6178_vm6, %v7227_v18  ;;  %6307 = vmatpush1.bf16.msk.msra.mxu0 %vm6178_vm6, %v7227_v18  ;;  %vm214_vm6 = vcmp.eq.s32.totalorder %v7309_v11, %v209_v28 }
  0x61   :  { %2296 = vmatprep.subr.bf16.mxu1 %v7226_v1  ;;  %4444 = vmatprep.subr.bf16.mxu0 %v7226_v1  ;;  %vm6190_vm8 = vmpackc.low %vm215_vm7, %vm214_vm6  ;;  %vm253_vm6 = vcmp.eq.s32.totalorder %v7338_v20, %v7467_v45 }
  0x64   :  { %6181 = vmatpush1.bf16.msk.msra.mxu1 %vm6180_vm9, %v7227_v18  ;;  %6309 = vmatpush1.bf16.msk.msra.mxu0 %vm6180_vm9, %v7227_v18  ;;  %vm216_vm9 = vcmp.eq.s32.totalorder %v7333_v19, %v209_v28  ;;  %v5746_v28 = vcombine.low %v966_v0, %v970_v8 }
  0x65   :  { %2298 = vmatprep.subr.bf16.mxu1 %v7226_v1  ;;  %4446 = vmatprep.subr.bf16.mxu0 %v7226_v1  ;;  %vm6192_vm11 = vmpackc.low %vm217_vm10, %vm216_vm9  ;;  %vm283_vm9 = vcmp.eq.s32.totalorder %v7288_v4, %v7505_v63 }
  0x68   :  { %6183 = vmatpush1.bf16.msk.msra.mxu1 %vm6182_vm12, %v7227_v18  ;;  %6311 = vmatpush1.bf16.msk.msra.mxu0 %vm6182_vm12, %v7227_v18  ;;  %vm246_vm12 = vcmp.eq.s32.totalorder %v7282_v2, %v7467_v45 }
  0x69   :  { %2300 = vmatprep.subr.bf16.mxu1 %v7226_v1  ;;  %4448 = vmatprep.subr.bf16.mxu0 %v7226_v1  ;;  %vm6194_vm14 = vmpackc.low %vm247_vm13, %vm246_vm12  ;;  %vm285_vm12 = vcmp.eq.s32.totalorder %v7294_v6, %v7505_v63 }
  0x6c   :  { %6185 = vmatpush1.bf16.msk.msra.mxu1 %vm6184_vm15, %v7227_v18  ;;  %6313 = vmatpush1.bf16.msk.msra.mxu0 %vm6184_vm15, %v7227_v18  ;;  %vm248_vm15 = vcmp.eq.s32.totalorder %v7291_v5, %v7467_v45 }
  0x6d   :  { %2527 = vmatprep.subr.bf16.mxu1 %v7226_v1  ;;  %4675 = vmatprep.subr.bf16.mxu0 %v7226_v1  ;;  %vm6196_vm1 = vmpackc.low %vm249_vm0, %vm248_vm15  ;;  %vm287_vm15 = vcmp.eq.s32.totalorder %v7316_v14, %v7505_v63 }
  0x6f   :  { %2303 = vmatmul.mubr.bf16.vlgmr.msra.gmra.mrb[0].mxu1 %v5706_v15  ;;  %4451 = vmatmul.mubr.bf16.vlgmr.msra.gmra.mrb[0].mxu0 %v5930_v33  ;;  %v5747_v15 = vcombine.high %v966_v0, %v970_v8  ;;  %v982_v33 = vld [vmem:[#allocation7 + $0x1c0] sm:$0xff] }
  0x70   :  { %6187 = vmatpush1.bf16.msk.msra.mxu1 %vm6186_vm2, %v7227_v18  ;;  %6315 = vmatpush1.bf16.msk.msra.mxu0 %vm6186_vm2, %v7227_v18  ;;  %vm250_vm2 = vcmp.eq.s32.totalorder %v7309_v11, %v7467_v45 }
  0x71   :  { %2310 = vmatprep.mubr.bf16.mxu1 %v5715_v34  ;;  %4458 = vmatprep.mubr.bf16.mxu0 %v5939_v35  ;;  %vm6198_vm4 = vmpackc.low %vm251_vm3, %vm250_vm2  ;;  %vm289_vm2 = vcmp.eq.s32.totalorder %v7338_v20, %v7505_v63  ;;  %v986_v34 = vld [vmem:[#allocation7 + $0x1e0] sm:$0xff] }
  0x72   :  { %2529 = vmatprep.subr.bf16.mxu1 %v7226_v1  ;;  %4677 = vmatprep.subr.bf16.mxu0 %v7226_v1  ;;  %v758_v35 = vld [vmem:[#allocation4 + $0x1c0] sm:$0xff]  ;;  %v5762_v46 = vcombine.low %v982_v33, %v986_v34 }
  0x73   :  { %v5986_v47 = vcombine.low %v758_v35, %v762_v36 }
  0x74   :  { %6189 = vmatpush1.bf16.msk.msra.mxu1 %vm6188_vm5, %v7227_v18  ;;  %6317 = vmatpush1.bf16.msk.msra.mxu0 %vm6188_vm5, %v7227_v18  ;;  %vm252_vm5 = vcmp.eq.s32.totalorder %v7333_v19, %v7467_v45  ;;  %v770_v45 = vld [vmem:[#allocation4 + $0x220] sm:$0xff] }
  0x75   :  { %2531 = vmatprep.subr.bf16.mxu1 %v7226_v1  ;;  %4679 = vmatprep.subr.bf16.mxu0 %v7226_v1  ;;  %vm6200_vm7 = vmpackc.low %vm253_vm6, %vm252_vm5  ;;  %vm319_vm5 = vcmp.eq.s32.totalorder %v7288_v4, %v7545_v37 }
  0x77   :  { %2311 = vmatmul.mubr.bf16.gmra.mrb[4].mxu1 %v5714_v41  ;;  %4459 = vmatmul.mubr.bf16.gmra.mrb[4].mxu0 %v5938_v42  ;;  %v5763_v41 = vcombine.high %v982_v33, %v986_v34  ;;  %v5987_v42 = vcombine.high %v758_v35, %v762_v36  ;;  %v1030_v36 = vld [vmem:[#allocation7 + $0x340] sm:$0xff] }
  0x78   :  { %2318 = vmatprep.mubr.bf16.mxu1 %v5723_v43  ;;  %4466 = vmatprep.mubr.bf16.mxu0 %v5947_v44  ;;  %v994_v43 = vld [vmem:[#allocation7 + $0x220] sm:$0xff] }
  0x79   :  { %6191 = vmatpush1.bf16.msk.msra.mxu1 %vm6190_vm8, %v7227_v18  ;;  %6319 = vmatpush1.bf16.msk.msra.mxu0 %vm6190_vm8, %v7227_v18  ;;  %vm282_vm8 = vcmp.eq.s32.totalorder %v7282_v2, %v7505_v63  ;;  %v766_v44 = vld [vmem:[#allocation4 + $0x200] sm:$0xff]  ;;  %v5771_v48 = vcombine.high %v990_v7, %v994_v43  ;;  %v5770_v54 = vcombine.low %v990_v7, %v994_v43 }
  0x7a   :  { %2533 = vmatprep.subr.bf16.mxu1 %v7226_v1  ;;  %4681 = vmatprep.subr.bf16.mxu0 %v7226_v1  ;;  %vm6202_vm10 = vmpackc.low %vm283_vm9, %vm282_vm8  ;;  %vm321_vm8 = vcmp.eq.s32.totalorder %v7294_v6, %v7545_v37  ;;  %v5995_v49 = vcombine.high %v766_v44, %v770_v45  ;;  %v5994_v55 = vcombine.low %v766_v44, %v770_v45  ;;  %v1038_v44 = vld [vmem:[#allocation7 + $0x380] sm:$0xff] }
  0x7b   :  { %v1042_v45 = vld [vmem:[#allocation7 + $0x3a0] sm:$0xff] }
  0x7d   :  { %6193 = vmatpush1.bf16.msk.msra.mxu1 %vm6192_vm11, %v7227_v18  ;;  %6321 = vmatpush1.bf16.msk.msra.mxu0 %vm6192_vm11, %v7227_v18  ;;  %vm284_vm11 = vcmp.eq.s32.totalorder %v7291_v5, %v7505_v63 }
  0x7e   :  { %2535 = vmatprep.subr.bf16.mxu1 %v7226_v1  ;;  %4683 = vmatprep.subr.bf16.mxu0 %v7226_v1  ;;  %vm6204_vm13 = vmpackc.low %vm285_vm12, %vm284_vm11  ;;  %vm323_vm11 = vcmp.eq.s32.totalorder %v7316_v14, %v7545_v37 }
  0x7f   :  { %2319 = vmatmul.mubr.bf16.gmra.mrb[8].mxu1 %v5722_v50  ;;  %4467 = vmatmul.mubr.bf16.gmra.mrb[8].mxu0 %v5946_v51  ;;  %v998_v50 = vld [vmem:[#allocation7 + $0x240] sm:$0xff] }
  0x80   :  { %2326 = vmatprep.mubr.bf16.mxu1 %v5731_v52  ;;  %4474 = vmatprep.mubr.bf16.mxu0 %v5955_v53  ;;  %v1002_v51 = vld [vmem:[#allocation7 + $0x260] sm:$0xff] }
  0x81   :  { %6195 = vmatpush1.bf16.msk.msra.mxu1 %vm6194_vm14, %v7227_v18  ;;  %6323 = vmatpush1.bf16.msk.msra.mxu0 %vm6194_vm14, %v7227_v18  ;;  %vm286_vm14 = vcmp.eq.s32.totalorder %v7309_v11, %v7505_v63  ;;  %v774_v52 = vld [vmem:[#allocation4 + $0x240] sm:$0xff]  ;;  %v5779_v56 = vcombine.high %v998_v50, %v1002_v51 }
  0x82   :  { %2537 = vmatprep.subr.bf16.mxu1 %v7226_v1  ;;  %4685 = vmatprep.subr.bf16.mxu0 %v7226_v1  ;;  %vm6206_vm0 = vmpackc.low %vm287_vm15, %vm286_vm14  ;;  %v778_v53 = vld [vmem:[#allocation4 + $0x260] sm:$0xff]  ;;  %vm325_vm14 = vcmp.eq.s32.totalorder %v7338_v20, %v7545_v37 }
  0x83   :  { %v6003_v57 = vcombine.high %v774_v52, %v778_v53  ;;  %v6002_v0 = vcombine.low %v774_v52, %v778_v53  ;;  %v1046_v52 = vld [vmem:[#allocation7 + $0x3c0] sm:$0xff] }
  0x84   :  { %v1050_v53 = vld [vmem:[#allocation7 + $0x3e0] sm:$0xff] }
  0x85   :  { %6197 = vmatpush1.bf16.msk.msra.mxu1 %vm6196_vm1, %v7227_v18  ;;  %6325 = vmatpush1.bf16.msk.msra.mxu0 %vm6196_vm1, %v7227_v18  ;;  %vm288_vm1 = vcmp.eq.s32.totalorder %v7333_v19, %v7505_v63  ;;  %v5778_v63 = vcombine.low %v998_v50, %v1002_v51  ;;  %v5819_v50 = vcombine.high %v1038_v44, %v1042_v45 }
  0x86   :  { %2539 = vmatprep.subr.bf16.mxu1 %v7226_v1  ;;  %4687 = vmatprep.subr.bf16.mxu0 %v7226_v1  ;;  %vm6208_vm3 = vmpackc.low %vm289_vm2, %vm288_vm1 }
  0x87   :  { %2327 = vmatmul.mubr.bf16.gmra.mrb[12].mxu1 %v5730_v58  ;;  %4475 = vmatmul.mubr.bf16.gmra.mrb[12].mxu0 %v5954_v59  ;;  %v1006_v58 = vld [vmem:[#allocation7 + $0x280] sm:$0xff] }
  0x88   :  { %2334 = vmatprep.mubr.bf16.mxu1 %v5739_v61  ;;  %4482 = vmatprep.mubr.bf16.mxu0 %v5963_v62  ;;  %v1010_v59 = vld [vmem:[#allocation7 + $0x2a0] sm:$0xff] }
  0x89   :  { %6199 = vmatpush1.bf16.msk.msra.mxu1 %vm6198_vm4, %v7227_v18  ;;  %6327 = vmatpush1.bf16.msk.msra.mxu0 %vm6198_vm4, %v7227_v18  ;;  %vm318_vm4 = vcmp.eq.s32.totalorder %v7282_v2, %v7545_v37  ;;  %v782_v61 = vld [vmem:[#allocation4 + $0x280] sm:$0xff]  ;;  %v5787_v8 = vcombine.high %v1006_v58, %v1010_v59 }
  0x8a   :  { %2541 = vmatprep.subr.bf16.mxu1 %v7226_v1  ;;  %4689 = vmatprep.subr.bf16.mxu0 %v7226_v1  ;;  %vm6210_vm6 = vmpackc.low %vm319_vm5, %vm318_vm4  ;;  %v786_v62 = vld [vmem:[#allocation4 + $0x2a0] sm:$0xff] }
  0x8b   :  { %v6011_v9 = vcombine.high %v782_v61, %v786_v62  ;;  %v6010_v17 = vcombine.low %v782_v61, %v786_v62  ;;  %v1054_v61 = vld [vmem:[#allocation7 + $0x400] sm:$0xff] }
  0x8c   :  { %v1058_v62 = vld [vmem:[#allocation7 + $0x420] sm:$0xff] }
  0x8d   :  { %6201 = vmatpush1.bf16.msk.msra.mxu1 %vm6200_vm7, %v7227_v18  ;;  %6329 = vmatpush1.bf16.msk.msra.mxu0 %vm6200_vm7, %v7227_v18  ;;  %vm320_vm7 = vcmp.eq.s32.totalorder %v7291_v5, %v7545_v37 }
  0x8e   :  { %2543 = vmatprep.subr.bf16.mxu1 %v7226_v1  ;;  %4691 = vmatprep.subr.bf16.mxu0 %v7226_v1  ;;  %vm6212_vm9 = vmpackc.low %vm321_vm8, %vm320_vm7 }
  0x8f   :  { %2335 = vmatmul.mubr.bf16.gmra.mrb[16].mxu1 %v5738_v12  ;;  %4483 = vmatmul.mubr.bf16.gmra.mrb[16].mxu0 %v5962_v13  ;;  %v1018_v12 = vld [vmem:[#allocation7 + $0x2e0] sm:$0xff] }
  0x90   :  { %2342 = vmatprep.mubr.bf16.mxu1 %v5747_v15  ;;  %4490 = vmatprep.mubr.bf16.mxu0 %v5971_v16  ;;  %v790_v13 = vld [vmem:[#allocation4 + $0x2c0] sm:$0xff]  ;;  %v5786_v16 = vcombine.low %v1006_v58, %v1010_v59  ;;  %v5795_v22 = vcombine.high %v1014_v10, %v1018_v12  ;;  %v5827_v58 = vcombine.high %v1046_v52, %v1050_v53 }
  0x91   :  { %6203 = vmatpush1.bf16.msk.msra.mxu1 %vm6202_vm10, %v7227_v18  ;;  %6331 = vmatpush1.bf16.msk.msra.mxu0 %vm6202_vm10, %v7227_v18  ;;  %vm322_vm10 = vcmp.eq.s32.totalorder %v7309_v11, %v7545_v37  ;;  %v794_v15 = vld [vmem:[#allocation4 + $0x2e0] sm:$0xff] }
  0x92   :  { %2545 = vmatprep.subr.bf16.mxu1 %v7226_v1  ;;  %4693 = vmatprep.subr.bf16.mxu0 %v7226_v1  ;;  %vm6214_vm12 = vmpackc.low %vm323_vm11, %vm322_vm10  ;;  %v6019_v24 = vcombine.high %v790_v13, %v794_v15  ;;  %v6018_v33 = vcombine.low %v790_v13, %v794_v15  ;;  %v1062_v13 = vld [vmem:[#allocation7 + $0x440] sm:$0xff] }
  0x93   :  { %v1066_v15 = vld [vmem:[#allocation7 + $0x460] sm:$0xff] }
  0x95   :  { %6205 = vmatpush1.bf16.msk.msra.mxu1 %vm6204_vm13, %v7227_v18  ;;  %6333 = vmatpush1.bf16.msk.msra.mxu0 %vm6204_vm13, %v7227_v18  ;;  %vm324_vm13 = vcmp.eq.s32.totalorder %v7333_v19, %v7545_v37  ;;  %v1034_v37 = vld [vmem:[#allocation7 + $0x360] sm:$0xff] }
  0x96   :  { %2547 = vmatprep.subr.bf16.mxu1 %v7226_v1  ;;  %4695 = vmatprep.subr.bf16.mxu0 %v7226_v1  ;;  %vm6216_vm15 = vmpackc.low %vm325_vm14, %vm324_vm13  ;;  %v5811_v7 = vcombine.high %v1030_v36, %v1034_v37 }
  0x97   :  { %2343 = vmatmul.mubr.bf16.gmra.mrb[20].mxu1 %v5746_v28  ;;  %4491 = vmatmul.mubr.bf16.gmra.mrb[20].mxu0 %v5970_v29  ;;  %v1026_v28 = vld [vmem:[#allocation7 + $0x320] sm:$0xff] }
  0x98   :  { %2350 = vmatprep.mubr.bf16.mxu1 %v5755_v30  ;;  %4498 = vmatprep.mubr.bf16.mxu0 %v5979_v31  ;;  %v798_v29 = vld [vmem:[#allocation4 + $0x300] sm:$0xff]  ;;  %v5794_v31 = vcombine.low %v1014_v10, %v1018_v12  ;;  %v5803_v34 = vcombine.high %v1022_v26, %v1026_v28  ;;  %v5835_v10 = vcombine.high %v1054_v61, %v1058_v62 }
  0x99   :  { %6207 = vmatpush1.bf16.msk.msra.mxu1 %vm6206_vm0, %v7227_v18  ;;  %6335 = vmatpush1.bf16.msk.msra.mxu0 %vm6206_vm0, %v7227_v18  ;;  %v802_v30 = vld [vmem:[#allocation4 + $0x320] sm:$0xff] }
  0x9a   :  { %2549 = vmatprep.subr.bf16.mxu1 %v7226_v1  ;;  %4697 = vmatprep.subr.bf16.mxu0 %v7226_v1  ;;  %v6027_v35 = vcombine.high %v798_v29, %v802_v30 }
  0x9d   :  { %6209 = vmatpush1.bf16.msk.msra.mxu1 %vm6208_vm3, %v7227_v18  ;;  %6337 = vmatpush1.bf16.msk.msra.mxu0 %vm6208_vm3, %v7227_v18 }
  0x9e   :  { %2551 = vmatprep.subr.bf16.mxu1 %v7226_v1  ;;  %4699 = vmatprep.subr.bf16.mxu0 %v7226_v1 }
  0x9f   :  { %2351 = vmatmul.mubr.bf16.gmra.mrb[24].mxu1 %v5754_v38  ;;  %4499 = vmatmul.mubr.bf16.gmra.mrb[24].mxu0 %v5978_v39  ;;  %v806_v38 = vld [vmem:[#allocation4 + $0x340] sm:$0xff] }
  0xa0   :  { %2358 = vmatprep.mubr.bf16.mxu1 %v5763_v41  ;;  %4506 = vmatprep.mubr.bf16.mxu0 %v5987_v42  ;;  %v810_v39 = vld [vmem:[#allocation4 + $0x360] sm:$0xff]  ;;  %v5802_v41 = vcombine.low %v1022_v26, %v1026_v28  ;;  %v6026_v42 = vcombine.low %v798_v29, %v802_v30  ;;  %v5843_v26 = vcombine.high %v1062_v13, %v1066_v15 }
  0xa1   :  { %6211 = vmatpush1.bf16.msk.msra.mxu1 %vm6210_vm6, %v7227_v18  ;;  %6339 = vmatpush1.bf16.msk.msra.mxu0 %vm6210_vm6, %v7227_v18  ;;  %v6035_v43 = vcombine.high %v806_v38, %v810_v39  ;;  %v1070_v29 = vld [vmem:[#allocation7 + $0x480] sm:$0xff] }
  0xa2   :  { %2553 = vmatprep.subr.bf16.mxu1 %v7226_v1  ;;  %4701 = vmatprep.subr.bf16.mxu0 %v7226_v1  ;;  %v1074_v30 = vld [vmem:[#allocation7 + $0x4a0] sm:$0xff] }
  0xa5   :  { %6213 = vmatpush1.bf16.msk.msra.mxu1 %vm6212_vm9, %v7227_v18  ;;  %6341 = vmatpush1.bf16.msk.msra.mxu0 %vm6212_vm9, %v7227_v18 }
  0xa6   :  { %2555 = vmatprep.subr.bf16.mxu1 %v7226_v1  ;;  %4703 = vmatprep.subr.bf16.mxu0 %v7226_v1 }
  0xa7   :  { %2359 = vmatmul.mubr.bf16.gmra.mrb[28].mxu1 %v5762_v46  ;;  %4507 = vmatmul.mubr.bf16.gmra.mrb[28].mxu0 %v5986_v47  ;;  %v814_v46 = vld [vmem:[#allocation4 + $0x380] sm:$0xff] }
  0xa8   :  { %2366 = vmatprep.mubr.bf16.mxu1 %v5771_v48  ;;  %4514 = vmatprep.mubr.bf16.mxu0 %v5995_v49  ;;  %v818_v47 = vld [vmem:[#allocation4 + $0x3a0] sm:$0xff]  ;;  %v5810_v48 = vcombine.low %v1030_v36, %v1034_v37  ;;  %v6034_v49 = vcombine.low %v806_v38, %v810_v39  ;;  %v5851_v36 = vcombine.high %v1070_v29, %v1074_v30 }
  0xa9   :  { %6215 = vmatpush1.bf16.msk.msra.mxu1 %vm6214_vm12, %v7227_v18  ;;  %6343 = vmatpush1.bf16.msk.msra.mxu0 %vm6214_vm12, %v7227_v18  ;;  %v6043_v51 = vcombine.high %v814_v46, %v818_v47  ;;  %v1078_v38 = vld [vmem:[#allocation7 + $0x4c0] sm:$0xff] }
  0xaa   :  { %2557 = vmatprep.subr.bf16.mxu1 %v7226_v1  ;;  %4705 = vmatprep.subr.bf16.mxu0 %v7226_v1  ;;  %v1082_v39 = vld [vmem:[#allocation7 + $0x4e0] sm:$0xff] }
  0xad   :  { %6217 = vmatpush1.bf16.msk.msra.mxu1 %vm6216_vm15, %v7227_v18  ;;  %6345 = vmatpush1.bf16.msk.msra.mxu0 %vm6216_vm15, %v7227_v18 }
  0xae   :  { %2784 = vmatprep.subr.bf16.mxu1 %v7226_v1  ;;  %4932 = vmatprep.subr.bf16.mxu0 %v7226_v1 }
  0xaf   :  { %2367 = vmatmul.mubr.bf16.gmra.mrb[32].mxu1 %v5770_v54  ;;  %4515 = vmatmul.mubr.bf16.gmra.mrb[32].mxu0 %v5994_v55  ;;  %v822_v54 = vld [vmem:[#allocation4 + $0x3c0] sm:$0xff] }
  0xb0   :  { %2374 = vmatprep.mubr.bf16.mxu1 %v5779_v56  ;;  %4522 = vmatprep.mubr.bf16.mxu0 %v6003_v57  ;;  %v826_v55 = vld [vmem:[#allocation4 + $0x3e0] sm:$0xff]  ;;  %v5818_v56 = vcombine.low %v1038_v44, %v1042_v45  ;;  %v6042_v57 = vcombine.low %v814_v46, %v818_v47  ;;  %v5859_v44 = vcombine.high %v1078_v38, %v1082_v39 }
  0xb1   :  { %v6051_v59 = vcombine.high %v822_v54, %v826_v55  ;;  %v1086_v46 = vld [vmem:[#allocation7 + $0x500] sm:$0xff] }
  0xb2   :  { %v1090_v47 = vld [vmem:[#allocation7 + $0x520] sm:$0xff] }
  0xb7   :  { %2375 = vmatmul.mubr.bf16.gmra.mrb[36].mxu1 %v5778_v63  ;;  %4523 = vmatmul.mubr.bf16.gmra.mrb[36].mxu0 %v6002_v0  ;;  %v830_v63 = vld [vmem:[#allocation4 + $0x400] sm:$0xff] }
  0xb8   :  { %2382 = vmatprep.mubr.bf16.mxu1 %v5787_v8  ;;  %4530 = vmatprep.mubr.bf16.mxu0 %v6011_v9  ;;  %v834_v0 = vld [vmem:[#allocation4 + $0x420] sm:$0xff]  ;;  %v5826_v8 = vcombine.low %v1046_v52, %v1050_v53  ;;  %v6050_v9 = vcombine.low %v822_v54, %v826_v55  ;;  %v5867_v52 = vcombine.high %v1086_v46, %v1090_v47 }
  0xb9   :  { %v6059_v12 = vcombine.high %v830_v63, %v834_v0  ;;  %v1094_v54 = vld [vmem:[#allocation7 + $0x540] sm:$0xff] }
  0xba   :  { %v1098_v55 = vld [vmem:[#allocation7 + $0x560] sm:$0xff] }
  0xbf   :  { %2383 = vmatmul.mubr.bf16.gmra.mrb[40].mxu1 %v5786_v16  ;;  %4531 = vmatmul.mubr.bf16.gmra.mrb[40].mxu0 %v6010_v17  ;;  %v838_v16 = vld [vmem:[#allocation4 + $0x440] sm:$0xff] }
  0xc0   :  { %2390 = vmatprep.mubr.bf16.mxu1 %v5795_v22  ;;  %4538 = vmatprep.mubr.bf16.mxu0 %v6019_v24  ;;  %v842_v17 = vld [vmem:[#allocation4 + $0x460] sm:$0xff]  ;;  %v5834_v22 = vcombine.low %v1054_v61, %v1058_v62  ;;  %v6058_v24 = vcombine.low %v830_v63, %v834_v0  ;;  %v5875_v61 = vcombine.high %v1094_v54, %v1098_v55 }
  0xc1   :  { %v6067_v28 = vcombine.high %v838_v16, %v842_v17  ;;  %v1102_v63 = vld [vmem:[#allocation7 + $0x580] sm:$0xff] }
  0xc2   :  { %v1106_v0 = vld [vmem:[#allocation7 + $0x5a0] sm:$0xff] }
  0xc7   :  { %2391 = vmatmul.mubr.bf16.gmra.mrb[44].mxu1 %v5794_v31  ;;  %4539 = vmatmul.mubr.bf16.gmra.mrb[44].mxu0 %v6018_v33  ;;  %v846_v31 = vld [vmem:[#allocation4 + $0x480] sm:$0xff] }
  0xc8   :  { %2398 = vmatprep.mubr.bf16.mxu1 %v5803_v34  ;;  %4546 = vmatprep.mubr.bf16.mxu0 %v6027_v35  ;;  %v850_v33 = vld [vmem:[#allocation4 + $0x4a0] sm:$0xff]  ;;  %v5842_v34 = vcombine.low %v1062_v13, %v1066_v15  ;;  %v6066_v35 = vcombine.low %v838_v16, %v842_v17  ;;  %v5883_v13 = vcombine.high %v1102_v63, %v1106_v0 }
  0xc9   :  { %v6075_v37 = vcombine.high %v846_v31, %v850_v33  ;;  %v1110_v16 = vld [vmem:[#allocation7 + $0x5c0] sm:$0xff] }
  0xca   :  { %v1114_v17 = vld [vmem:[#allocation7 + $0x5e0] sm:$0xff] }
  0xcf   :  { %2399 = vmatmul.mubr.bf16.gmra.mrb[48].mxu1 %v5802_v41  ;;  %4547 = vmatmul.mubr.bf16.gmra.mrb[48].mxu0 %v6026_v42  ;;  %v854_v41 = vld [vmem:[#allocation4 + $0x4c0] sm:$0xff] }
  0xd0   :  { %2406 = vmatprep.mubr.bf16.mxu1 %v5811_v7  ;;  %4554 = vmatprep.mubr.bf16.mxu0 %v6035_v43  ;;  %v858_v42 = vld [vmem:[#allocation4 + $0x4e0] sm:$0xff]  ;;  %v5850_v7 = vcombine.low %v1070_v29, %v1074_v30  ;;  %v6074_v43 = vcombine.low %v846_v31, %v850_v33  ;;  %v5891_v29 = vcombine.high %v1110_v16, %v1114_v17 }
  0xd1   :  { %v6083_v45 = vcombine.high %v854_v41, %v858_v42  ;;  %v1118_v31 = vld [vmem:[#allocation7 + $0x600] sm:$0xff] }
  0xd2   :  { %v1122_v33 = vld [vmem:[#allocation7 + $0x620] sm:$0xff] }
  0xd7   :  { %2407 = vmatmul.mubr.bf16.gmra.mrb[52].mxu1 %v5810_v48  ;;  %4555 = vmatmul.mubr.bf16.gmra.mrb[52].mxu0 %v6034_v49  ;;  %v862_v48 = vld [vmem:[#allocation4 + $0x500] sm:$0xff] }
  0xd8   :  { %2414 = vmatprep.mubr.bf16.mxu1 %v5819_v50  ;;  %4562 = vmatprep.mubr.bf16.mxu0 %v6043_v51  ;;  %v866_v49 = vld [vmem:[#allocation4 + $0x520] sm:$0xff]  ;;  %v5858_v50 = vcombine.low %v1078_v38, %v1082_v39  ;;  %v6082_v51 = vcombine.low %v854_v41, %v858_v42  ;;  %v5899_v38 = vcombine.high %v1118_v31, %v1122_v33 }
  0xd9   :  { %v6091_v53 = vcombine.high %v862_v48, %v866_v49  ;;  %v1126_v41 = vld [vmem:[#allocation7 + $0x640] sm:$0xff] }
  0xda   :  { %v1130_v42 = vld [vmem:[#allocation7 + $0x660] sm:$0xff] }
  0xdf   :  { %2415 = vmatmul.mubr.bf16.gmra.mrb[56].mxu1 %v5818_v56  ;;  %4563 = vmatmul.mubr.bf16.gmra.mrb[56].mxu0 %v6042_v57  ;;  %v870_v56 = vld [vmem:[#allocation4 + $0x540] sm:$0xff] }
  0xe0   :  { %2422 = vmatprep.mubr.bf16.mxu1 %v5827_v58  ;;  %4570 = vmatprep.mubr.bf16.mxu0 %v6051_v59  ;;  %v874_v57 = vld [vmem:[#allocation4 + $0x560] sm:$0xff]  ;;  %v5866_v58 = vcombine.low %v1086_v46, %v1090_v47  ;;  %v6090_v59 = vcombine.low %v862_v48, %v866_v49  ;;  %v5907_v46 = vcombine.high %v1126_v41, %v1130_v42 }
  0xe1   :  { %v6099_v62 = vcombine.high %v870_v56, %v874_v57  ;;  %v1134_v48 = vld [vmem:[#allocation7 + $0x680] sm:$0xff] }
  0xe2   :  { %v1138_v49 = vld [vmem:[#allocation7 + $0x6a0] sm:$0xff] }
  0xe7   :  { %2423 = vmatmul.mubr.bf16.gmra.mrb[60].mxu1 %v5826_v8  ;;  %4571 = vmatmul.mubr.bf16.gmra.mrb[60].mxu0 %v6050_v9  ;;  %v878_v8 = vld [vmem:[#allocation4 + $0x580] sm:$0xff] }
  0xe8   :  { %2430 = vmatprep.mubr.bf16.mxu1 %v5835_v10  ;;  %4578 = vmatprep.mubr.bf16.mxu0 %v6059_v12  ;;  %v882_v9 = vld [vmem:[#allocation4 + $0x5a0] sm:$0xff]  ;;  %v5874_v10 = vcombine.low %v1094_v54, %v1098_v55  ;;  %v6098_v12 = vcombine.low %v870_v56, %v874_v57  ;;  %v5915_v54 = vcombine.high %v1134_v48, %v1138_v49 }
  0xe9   :  { %v6107_v15 = vcombine.high %v878_v8, %v882_v9  ;;  %v1142_v56 = vld [vmem:[#allocation7 + $0x6c0] sm:$0xff] }
  0xea   :  { %v1146_v57 = vld [vmem:[#allocation7 + $0x6e0] sm:$0xff] }
  0xef   :  { %2431 = vmatmul.mubr.bf16.gmra.mrb[64].mxu1 %v5834_v22  ;;  %4579 = vmatmul.mubr.bf16.gmra.mrb[64].mxu0 %v6058_v24  ;;  %v886_v22 = vld [vmem:[#allocation4 + $0x5c0] sm:$0xff] }
  0xf0   :  { %2438 = vmatprep.mubr.bf16.mxu1 %v5843_v26  ;;  %4586 = vmatprep.mubr.bf16.mxu0 %v6067_v28  ;;  %v890_v24 = vld [vmem:[#allocation4 + $0x5e0] sm:$0xff]  ;;  %v5882_v26 = vcombine.low %v1102_v63, %v1106_v0  ;;  %v6106_v28 = vcombine.low %v878_v8, %v882_v9  ;;  %v5923_v63 = vcombine.high %v1142_v56, %v1146_v57  ;;  %v927_v8 = vld [vmem:[#allocation7 + $0x8] sm:$0xff] }
  0xf1   :  { %v6115_v30 = vcombine.high %v886_v22, %v890_v24  ;;  %v931_v9 = vld [vmem:[#allocation7 + $0x28] sm:$0xff] }
  0xf7   :  { %2439 = vmatmul.mubr.bf16.gmra.mrb[68].mxu1 %v5842_v34  ;;  %4587 = vmatmul.mubr.bf16.gmra.mrb[68].mxu0 %v6066_v35  ;;  %v894_v34 = vld [vmem:[#allocation4 + $0x600] sm:$0xff] }
  0xf8   :  { %2446 = vmatprep.mubr.bf16.mxu1 %v5851_v36  ;;  %4594 = vmatprep.mubr.bf16.mxu0 %v6075_v37  ;;  %v898_v35 = vld [vmem:[#allocation4 + $0x620] sm:$0xff]  ;;  %v5890_v36 = vcombine.low %v1110_v16, %v1114_v17  ;;  %v6114_v37 = vcombine.low %v886_v22, %v890_v24  ;;  %v7588_v16 = vld [vmem:[%s7889_s0 + $0x8] sm:$0xff]  ;;  %v5709_v17 = vcombine.high %v927_v8, %v931_v9 }
  0xf9   :  { %v6123_v39 = vcombine.high %v894_v34, %v898_v35  ;;  %v353_v24 = vrot.slane %v7588_v16, %v64_v3  ;;  %v943_v3 = vld [vmem:[#allocation7 + $0x88] sm:$0xff] }
  0xfb   :  { %vm354_vm0 = vcmp.eq.s32.totalorder %v7282_v2, %v353_v24  ;;  %vm355_vm1 = vcmp.eq.s32.totalorder %v7288_v4, %v353_v24  ;;  %vm356_vm3 = vcmp.eq.s32.totalorder %v7291_v5, %v353_v24  ;;  %vm357_vm4 = vcmp.eq.s32.totalorder %v7294_v6, %v353_v24 }
  0xfc   :  { %vm6218_vm2 = vmpackc.low %vm355_vm1, %vm354_vm0  ;;  %vm358_vm6 = vcmp.eq.s32.totalorder %v7309_v11, %v353_v24  ;;  %vm359_vm7 = vcmp.eq.s32.totalorder %v7316_v14, %v353_v24  ;;  %vm360_vm9 = vcmp.eq.s32.totalorder %v7333_v19, %v353_v24  ;;  %vm361_vm10 = vcmp.eq.s32.totalorder %v7338_v20, %v353_v24 }
  0xfd   :  { %vm6220_vm5 = vmpackc.low %vm357_vm4, %vm356_vm3 }
  0xfe   :  { %vm6222_vm8 = vmpackc.low %vm359_vm7, %vm358_vm6 }
  0xff   :  { %2447 = vmatmul.mubr.bf16.gmra.mrb[72].mxu1 %v5850_v7  ;;  %4595 = vmatmul.mubr.bf16.gmra.mrb[72].mxu0 %v6074_v43  ;;  %v902_v7 = vld [vmem:[#allocation4 + $0x640] sm:$0xff]  ;;  %vm6224_vm11 = vmpackc.low %vm361_vm10, %vm360_vm9 }
 0x100   :  { %2454 = vmatprep.mubr.bf16.mxu1 %v5859_v44  ;;  %4602 = vmatprep.mubr.bf16.mxu0 %v6083_v45  ;;  %v906_v43 = vld [vmem:[#allocation4 + $0x660] sm:$0xff]  ;;  %v5898_v44 = vcombine.low %v1118_v31, %v1122_v33  ;;  %v6122_v45 = vcombine.low %v894_v34, %v898_v35  ;;  %v5708_v31 = vcombine.low %v927_v8, %v931_v9 }
 0x101   :  { %v6131_v47 = vcombine.high %v902_v7, %v906_v43 }
 0x107   :  { %2455 = vmatmul.mubr.bf16.gmra.mrb[76].mxu1 %v5858_v50  ;;  %4603 = vmatmul.mubr.bf16.gmra.mrb[76].mxu0 %v6082_v51  ;;  %v910_v50 = vld [vmem:[#allocation4 + $0x680] sm:$0xff] }
 0x108   :  { %2462 = vmatprep.mubr.bf16.mxu1 %v5867_v52  ;;  %4610 = vmatprep.mubr.bf16.mxu0 %v6091_v53  ;;  %v914_v51 = vld [vmem:[#allocation4 + $0x6a0] sm:$0xff]  ;;  %v5906_v52 = vcombine.low %v1126_v41, %v1130_v42  ;;  %v6130_v53 = vcombine.low %v902_v7, %v906_v43  ;;  %v7612_v43 = vrot.slane %v7588_v16, %v100_v21 }
 0x109   :  { %v6139_v55 = vcombine.high %v910_v50, %v914_v51 }
 0x10a   :  { %vm390_vm12 = vcmp.eq.s32.totalorder %v7282_v2, %v7612_v43  ;;  %vm391_vm13 = vcmp.eq.s32.totalorder %v7288_v4, %v7612_v43  ;;  %vm392_vm15 = vcmp.eq.s32.totalorder %v7291_v5, %v7612_v43  ;;  %vm393_vm0 = vcmp.eq.s32.totalorder %v7294_v6, %v7612_v43 }
 0x10b   :  { %vm6226_vm14 = vmpackc.low %vm391_vm13, %vm390_vm12  ;;  %vm395_vm3 = vcmp.eq.s32.totalorder %v7316_v14, %v7612_v43  ;;  %vm397_vm6 = vcmp.eq.s32.totalorder %v7338_v20, %v7612_v43 }
 0x10c   :  { %vm6228_vm1 = vmpackc.low %vm393_vm0, %vm392_vm15 }
 0x10f   :  { %2463 = vmatmul.mubr.bf16.gmra.mrb[80].mxu1 %v5866_v58  ;;  %4611 = vmatmul.mubr.bf16.gmra.mrb[80].mxu0 %v6090_v59  ;;  %v918_v58 = vld [vmem:[#allocation4 + $0x6c0] sm:$0xff] }
 0x110   :  { %2470 = vmatprep.mubr.bf16.mxu1 %v5875_v61  ;;  %4618 = vmatprep.mubr.bf16.mxu0 %v6099_v62  ;;  %v922_v59 = vld [vmem:[#allocation4 + $0x6e0] sm:$0xff]  ;;  %v5914_v61 = vcombine.low %v1134_v48, %v1138_v49  ;;  %v6138_v62 = vcombine.low %v910_v50, %v914_v51  ;;  %v959_v51 = vld [vmem:[#allocation7 + $0x108] sm:$0xff] }
 0x111   :  { %v6147_v0 = vcombine.high %v918_v58, %v922_v59 }
 0x117   :  { %2471 = vmatmul.mubr.bf16.gmra.mrb[84].mxu1 %v5874_v10  ;;  %4619 = vmatmul.mubr.bf16.gmra.mrb[84].mxu0 %v6098_v12  ;;  %v703_v10 = vld [vmem:[#allocation4 + $0x8] sm:$0xff] }
 0x118   :  { %2478 = vmatprep.mubr.bf16.mxu1 %v5883_v13  ;;  %4626 = vmatprep.mubr.bf16.mxu0 %v6107_v15  ;;  %v707_v12 = vld [vmem:[#allocation4 + $0x28] sm:$0xff]  ;;  %v5922_v13 = vcombine.low %v1142_v56, %v1146_v57  ;;  %v6146_v15 = vcombine.low %v918_v58, %v922_v59  ;;  %v7649_v59 = vrot.slane %v7588_v16, %v136_v23 }
 0x119   :  { %v5933_v22 = vcombine.high %v703_v10, %v707_v12  ;;  %v5932_v33 = vcombine.low %v703_v10, %v707_v12  ;;  %v975_v12 = vld [vmem:[#allocation7 + $0x188] sm:$0xff] }
 0x11a   :  { %vm427_vm9 = vcmp.eq.s32.totalorder %v7288_v4, %v7649_v59  ;;  %vm429_vm12 = vcmp.eq.s32.totalorder %v7294_v6, %v7649_v59  ;;  %vm431_vm15 = vcmp.eq.s32.totalorder %v7316_v14, %v7649_v59 }
 0x11f   :  { %2479 = vmatmul.mubr.bf16.gmra.mrb[88].mxu1 %v5882_v26  ;;  %4627 = vmatmul.mubr.bf16.gmra.mrb[88].mxu0 %v6106_v28  ;;  %v935_v26 = vld [vmem:[#allocation7 + $0x48] sm:$0xff] }
 0x120   :  { %2486 = vmatprep.mubr.bf16.mxu1 %v5891_v29  ;;  %4634 = vmatprep.mubr.bf16.mxu0 %v6115_v30  ;;  %v939_v28 = vld [vmem:[#allocation7 + $0x68] sm:$0xff] }
 0x121   :  { %v711_v29 = vld [vmem:[#allocation4 + $0x48] sm:$0xff]  ;;  %v5717_v34 = vcombine.high %v935_v26, %v939_v28 }
 0x122   :  { %v715_v30 = vld [vmem:[#allocation4 + $0x68] sm:$0xff] }
 0x123   :  { %v5941_v35 = vcombine.high %v711_v29, %v715_v30  ;;  %v5940_v41 = vcombine.low %v711_v29, %v715_v30  ;;  %v7686_v29 = vrot.slane %v7588_v16, %v172_v25  ;;  %v983_v30 = vld [vmem:[#allocation7 + $0x1c8] sm:$0xff] }
 0x127   :  { %2487 = vmatmul.mubr.bf16.gmra.mrb[92].mxu1 %v5890_v36  ;;  %4635 = vmatmul.mubr.bf16.gmra.mrb[92].mxu0 %v6114_v37  ;;  %v947_v36 = vld [vmem:[#allocation7 + $0xa8] sm:$0xff] }
 0x128   :  { %2494 = vmatprep.mubr.bf16.mxu1 %v5899_v38  ;;  %4642 = vmatprep.mubr.bf16.mxu0 %v6123_v39  ;;  %v719_v37 = vld [vmem:[#allocation4 + $0x88] sm:$0xff]  ;;  %v5716_v39 = vcombine.low %v935_v26, %v939_v28  ;;  %v5725_v42 = vcombine.high %v943_v3, %v947_v36  ;;  %v5724_v48 = vcombine.low %v943_v3, %v947_v36 }
 0x129   :  { %v723_v38 = vld [vmem:[#allocation4 + $0xa8] sm:$0xff] }
 0x12a   :  { %v5949_v7 = vcombine.high %v719_v37, %v723_v38  ;;  %v5948_v49 = vcombine.low %v719_v37, %v723_v38  ;;  %v991_v37 = vld [vmem:[#allocation7 + $0x208] sm:$0xff] }
 0x12b   :  { %v995_v38 = vld [vmem:[#allocation7 + $0x228] sm:$0xff] }
 0x12f   :  { %2495 = vmatmul.mubr.bf16.gmra.mrb[96].mxu1 %v5898_v44  ;;  %4643 = vmatmul.mubr.bf16.gmra.mrb[96].mxu0 %v6122_v45  ;;  %v951_v44 = vld [vmem:[#allocation7 + $0xc8] sm:$0xff] }
 0x130   :  { %2502 = vmatprep.mubr.bf16.mxu1 %v5907_v46  ;;  %4650 = vmatprep.mubr.bf16.mxu0 %v6131_v47  ;;  %v955_v45 = vld [vmem:[#allocation7 + $0xe8] sm:$0xff] }
 0x131   :  { %v727_v46 = vld [vmem:[#allocation4 + $0xc8] sm:$0xff]  ;;  %v5733_v21 = vcombine.high %v951_v44, %v955_v45 }
 0x132   :  { %v731_v47 = vld [vmem:[#allocation4 + $0xe8] sm:$0xff] }
 0x133   :  { %v5957_v50 = vcombine.high %v727_v46, %v731_v47  ;;  %v5956_v56 = vcombine.low %v727_v46, %v731_v47  ;;  %v1003_v46 = vld [vmem:[#allocation7 + $0x268] sm:$0xff] }
 0x134   :  { %v775_v47 = vld [vmem:[#allocation4 + $0x248] sm:$0xff] }
 0x137   :  { %2503 = vmatmul.mubr.bf16.gmra.mrb[100].mxu1 %v5906_v52  ;;  %4651 = vmatmul.mubr.bf16.gmra.mrb[100].mxu0 %v6130_v53  ;;  %v963_v52 = vld [vmem:[#allocation7 + $0x128] sm:$0xff] }
 0x138   :  { %2510 = vmatprep.mubr.bf16.mxu1 %v5915_v54  ;;  %4658 = vmatprep.mubr.bf16.mxu0 %v6139_v55  ;;  %v735_v53 = vld [vmem:[#allocation4 + $0x108] sm:$0xff]  ;;  %v5732_v55 = vcombine.low %v951_v44, %v955_v45  ;;  %v5741_v57 = vcombine.high %v959_v51, %v963_v52  ;;  %v5740_v8 = vcombine.low %v959_v51, %v963_v52 }
 0x139   :  { %v739_v54 = vld [vmem:[#allocation4 + $0x128] sm:$0xff] }
 0x13a   :  { %v5965_v58 = vcombine.high %v735_v53, %v739_v54  ;;  %v5964_v9 = vcombine.low %v735_v53, %v739_v54  ;;  %v999_v45 = vld [vmem:[#allocation7 + $0x248] sm:$0xff] }
 0x13b   :  { %v1007_v52 = vld [vmem:[#allocation7 + $0x288] sm:$0xff] }
 0x13c   :  { %v1011_v53 = vld [vmem:[#allocation7 + $0x2a8] sm:$0xff] }
 0x13d   :  { %v783_v54 = vld [vmem:[#allocation4 + $0x288] sm:$0xff] }
 0x13f   :  { %2511 = vmatmul.mubr.bf16.gmra.mrb[104].mxu1 %v5914_v61  ;;  %4659 = vmatmul.mubr.bf16.gmra.mrb[104].mxu0 %v6138_v62  ;;  %v967_v61 = vld [vmem:[#allocation7 + $0x148] sm:$0xff] }
 0x140   :  { %2518 = vmatprep.mubr.bf16.mxu1 %v5923_v63  ;;  %4666 = vmatprep.mubr.bf16.mxu0 %v6147_v0  ;;  %v971_v62 = vld [vmem:[#allocation7 + $0x168] sm:$0xff] }
 0x141   :  { %v743_v63 = vld [vmem:[#allocation4 + $0x148] sm:$0xff]  ;;  %v5749_v23 = vcombine.high %v967_v61, %v971_v62 }
 0x142   :  { %v747_v0 = vld [vmem:[#allocation4 + $0x168] sm:$0xff] }
 0x143   :  { %v5973_v10 = vcombine.high %v743_v63, %v747_v0  ;;  %v5972_v24 = vcombine.low %v743_v63, %v747_v0  ;;  %v791_v63 = vld [vmem:[#allocation4 + $0x2c8] sm:$0xff] }
 0x144   :  { %v795_v0 = vld [vmem:[#allocation4 + $0x2e8] sm:$0xff] }
 0x147   :  { %2519 = vmatmul.mubr.bf16.gmra.mrb[108].mxu1 %v5922_v13  ;;  %4667 = vmatmul.mubr.bf16.gmra.mrb[108].mxu0 %v6146_v15  ;;  %v979_v13 = vld [vmem:[#allocation7 + $0x1a8] sm:$0xff] }
 0x148   :  { %2559 = vmatprep.mubr.bf16.mxu1 %v5709_v17  ;;  %4707 = vmatprep.mubr.bf16.mxu0 %v5933_v22  ;;  %v751_v15 = vld [vmem:[#allocation4 + $0x188] sm:$0xff]  ;;  %v5748_v22 = vcombine.low %v967_v61, %v971_v62  ;;  %v5757_v26 = vcombine.high %v975_v12, %v979_v13 }
 0x149   :  { %v755_v17 = vld [vmem:[#allocation4 + $0x1a8] sm:$0xff] }
 0x14a   :  { %v5981_v28 = vcombine.high %v751_v15, %v755_v17  ;;  %v5980_v3 = vcombine.low %v751_v15, %v755_v17  ;;  %v1015_v61 = vld [vmem:[#allocation7 + $0x2c8] sm:$0xff] }
 0x14b   :  { %v1019_v62 = vld [vmem:[#allocation7 + $0x2e8] sm:$0xff] }
 0x14c   :  { %v799_v15 = vld [vmem:[#allocation4 + $0x308] sm:$0xff] }
 0x14d   :  { %v803_v17 = vld [vmem:[#allocation4 + $0x328] sm:$0xff] }
 0x14f   :  { %2560 = vmatmul.mubr.bf16.vlgmr.msra.gmra.mrb[0].mxu1 %v5708_v31  ;;  %4708 = vmatmul.mubr.bf16.vlgmr.msra.gmra.mrb[0].mxu0 %v5932_v33  ;;  %v987_v31 = vld [vmem:[#allocation7 + $0x1e8] sm:$0xff] }
 0x150   :  { %6219 = vmatpush1.bf16.msk.msra.mxu1 %vm6218_vm2, %v7227_v18  ;;  %6347 = vmatpush1.bf16.msk.msra.mxu0 %vm6218_vm2, %v7227_v18  ;;  %vm394_vm2 = vcmp.eq.s32.totalorder %v7309_v11, %v7612_v43  ;;  %v759_v33 = vld [vmem:[#allocation4 + $0x1c8] sm:$0xff]  ;;  %v5765_v25 = vcombine.high %v983_v30, %v987_v31 }
 0x151   :  { %2567 = vmatprep.mubr.bf16.mxu1 %v5717_v34  ;;  %4715 = vmatprep.mubr.bf16.mxu0 %v5941_v35  ;;  %vm6230_vm4 = vmpackc.low %vm395_vm3, %vm394_vm2  ;;  %vm433_vm2 = vcmp.eq.s32.totalorder %v7338_v20, %v7649_v59  ;;  %v763_v34 = vld [vmem:[#allocation4 + $0x1e8] sm:$0xff]  ;;  %v5756_v35 = vcombine.low %v975_v12, %v979_v13 }
 0x152   :  { %2786 = vmatprep.subr.bf16.mxu1 %v7226_v1  ;;  %4934 = vmatprep.subr.bf16.mxu0 %v7226_v1  ;;  %v5989_v36 = vcombine.high %v759_v33, %v763_v34  ;;  %v1023_v12 = vld [vmem:[#allocation7 + $0x308] sm:$0xff] }
 0x153   :  { %v1027_v13 = vld [vmem:[#allocation7 + $0x328] sm:$0xff] }
 0x154   :  { %6221 = vmatpush1.bf16.msk.msra.mxu1 %vm6220_vm5, %v7227_v18  ;;  %6349 = vmatpush1.bf16.msk.msra.mxu0 %vm6220_vm5, %v7227_v18  ;;  %vm396_vm5 = vcmp.eq.s32.totalorder %v7333_v19, %v7612_v43  ;;  %v5773_v43 = vcombine.high %v991_v37, %v995_v38 }
 0x155   :  { %2788 = vmatprep.subr.bf16.mxu1 %v7226_v1  ;;  %4936 = vmatprep.subr.bf16.mxu0 %v7226_v1  ;;  %vm6232_vm7 = vmpackc.low %vm397_vm6, %vm396_vm5  ;;  %vm463_vm5 = vcmp.eq.s32.totalorder %v7288_v4, %v7686_v29 }
 0x157   :  { %2568 = vmatmul.mubr.bf16.gmra.mrb[4].mxu1 %v5716_v39  ;;  %4716 = vmatmul.mubr.bf16.gmra.mrb[4].mxu0 %v5940_v41  ;;  %v767_v39 = vld [vmem:[#allocation4 + $0x208] sm:$0xff] }
 0x158   :  { %2575 = vmatprep.mubr.bf16.mxu1 %v5725_v42  ;;  %4723 = vmatprep.mubr.bf16.mxu0 %v5949_v7  ;;  %v771_v41 = vld [vmem:[#allocation4 + $0x228] sm:$0xff]  ;;  %v5764_v42 = vcombine.low %v983_v30, %v987_v31  ;;  %v5988_v7 = vcombine.low %v759_v33, %v763_v34  ;;  %v5804_v34 = vcombine.low %v1023_v12, %v1027_v13 }
 0x159   :  { %6223 = vmatpush1.bf16.msk.msra.mxu1 %vm6222_vm8, %v7227_v18  ;;  %6351 = vmatpush1.bf16.msk.msra.mxu0 %vm6222_vm8, %v7227_v18  ;;  %vm426_vm8 = vcmp.eq.s32.totalorder %v7282_v2, %v7649_v59  ;;  %v5997_v44 = vcombine.high %v767_v39, %v771_v41  ;;  %v1035_v30 = vld [vmem:[#allocation7 + $0x368] sm:$0xff] }
 0x15a   :  { %2790 = vmatprep.subr.bf16.mxu1 %v7226_v1  ;;  %4938 = vmatprep.subr.bf16.mxu0 %v7226_v1  ;;  %vm6234_vm10 = vmpackc.low %vm427_vm9, %vm426_vm8  ;;  %vm465_vm8 = vcmp.eq.s32.totalorder %v7294_v6, %v7686_v29  ;;  %v807_v31 = vld [vmem:[#allocation4 + $0x348] sm:$0xff] }
 0x15b   :  { %v811_v33 = vld [vmem:[#allocation4 + $0x368] sm:$0xff] }
 0x15d   :  { %6225 = vmatpush1.bf16.msk.msra.mxu1 %vm6224_vm11, %v7227_v18  ;;  %6353 = vmatpush1.bf16.msk.msra.mxu0 %vm6224_vm11, %v7227_v18  ;;  %vm428_vm11 = vcmp.eq.s32.totalorder %v7291_v5, %v7649_v59 }
 0x15e   :  { %2792 = vmatprep.subr.bf16.mxu1 %v7226_v1  ;;  %4940 = vmatprep.subr.bf16.mxu0 %v7226_v1  ;;  %vm6236_vm13 = vmpackc.low %vm429_vm12, %vm428_vm11  ;;  %vm467_vm11 = vcmp.eq.s32.totalorder %v7316_v14, %v7686_v29 }
 0x15f   :  { %2576 = vmatmul.mubr.bf16.gmra.mrb[8].mxu1 %v5724_v48  ;;  %4724 = vmatmul.mubr.bf16.gmra.mrb[8].mxu0 %v5948_v49  ;;  %v779_v48 = vld [vmem:[#allocation4 + $0x268] sm:$0xff]  ;;  %v5772_v49 = vcombine.low %v991_v37, %v995_v38 }
 0x160   :  { %2583 = vmatprep.mubr.bf16.mxu1 %v5733_v21  ;;  %4731 = vmatprep.mubr.bf16.mxu0 %v5957_v50  ;;  %v5996_v21 = vcombine.low %v767_v39, %v771_v41  ;;  %v5781_v50 = vcombine.high %v999_v45, %v1003_v46  ;;  %v6005_v51 = vcombine.high %v775_v47, %v779_v48  ;;  %v1043_v37 = vld [vmem:[#allocation7 + $0x3a8] sm:$0xff] }
 0x161   :  { %6227 = vmatpush1.bf16.msk.msra.mxu1 %vm6226_vm14, %v7227_v18  ;;  %6355 = vmatpush1.bf16.msk.msra.mxu0 %vm6226_vm14, %v7227_v18  ;;  %vm430_vm14 = vcmp.eq.s32.totalorder %v7309_v11, %v7649_v59  ;;  %v815_v38 = vld [vmem:[#allocation4 + $0x388] sm:$0xff] }
 0x162   :  { %2794 = vmatprep.subr.bf16.mxu1 %v7226_v1  ;;  %4942 = vmatprep.subr.bf16.mxu0 %v7226_v1  ;;  %vm6238_vm0 = vmpackc.low %vm431_vm15, %vm430_vm14  ;;  %vm469_vm14 = vcmp.eq.s32.totalorder %v7338_v20, %v7686_v29  ;;  %v819_v39 = vld [vmem:[#allocation4 + $0x3a8] sm:$0xff] }
 0x165   :  { %6229 = vmatpush1.bf16.msk.msra.mxu1 %vm6228_vm1, %v7227_v18  ;;  %6357 = vmatpush1.bf16.msk.msra.mxu0 %vm6228_vm1, %v7227_v18  ;;  %vm432_vm1 = vcmp.eq.s32.totalorder %v7333_v19, %v7649_v59 }
 0x166   :  { %2796 = vmatprep.subr.bf16.mxu1 %v7226_v1  ;;  %4944 = vmatprep.subr.bf16.mxu0 %v7226_v1  ;;  %vm6240_vm3 = vmpackc.low %vm433_vm2, %vm432_vm1 }
 0x167   :  { %2584 = vmatmul.mubr.bf16.gmra.mrb[12].mxu1 %v5732_v55  ;;  %4732 = vmatmul.mubr.bf16.gmra.mrb[12].mxu0 %v5956_v56  ;;  %v787_v55 = vld [vmem:[#allocation4 + $0x2a8] sm:$0xff]  ;;  %v5780_v56 = vcombine.low %v999_v45, %v1003_v46 }
 0x168   :  { %2591 = vmatprep.mubr.bf16.mxu1 %v5741_v57  ;;  %4739 = vmatprep.mubr.bf16.mxu0 %v5965_v58  ;;  %v6004_v57 = vcombine.low %v775_v47, %v779_v48  ;;  %v5789_v58 = vcombine.high %v1007_v52, %v1011_v53  ;;  %v6013_v59 = vcombine.high %v783_v54, %v787_v55  ;;  %v1051_v45 = vld [vmem:[#allocation7 + $0x3e8] sm:$0xff] }
 0x169   :  { %6231 = vmatpush1.bf16.msk.msra.mxu1 %vm6230_vm4, %v7227_v18  ;;  %6359 = vmatpush1.bf16.msk.msra.mxu0 %vm6230_vm4, %v7227_v18  ;;  %vm462_vm4 = vcmp.eq.s32.totalorder %v7282_v2, %v7686_v29  ;;  %v823_v46 = vld [vmem:[#allocation4 + $0x3c8] sm:$0xff] }
 0x16a   :  { %2798 = vmatprep.subr.bf16.mxu1 %v7226_v1  ;;  %4946 = vmatprep.subr.bf16.mxu0 %v7226_v1  ;;  %vm6242_vm6 = vmpackc.low %vm463_vm5, %vm462_vm4  ;;  %v827_v47 = vld [vmem:[#allocation4 + $0x3e8] sm:$0xff] }
 0x16d   :  { %6233 = vmatpush1.bf16.msk.msra.mxu1 %vm6232_vm7, %v7227_v18  ;;  %6361 = vmatpush1.bf16.msk.msra.mxu0 %vm6232_vm7, %v7227_v18  ;;  %vm464_vm7 = vcmp.eq.s32.totalorder %v7291_v5, %v7686_v29 }
 0x16e   :  { %2800 = vmatprep.subr.bf16.mxu1 %v7226_v1  ;;  %4948 = vmatprep.subr.bf16.mxu0 %v7226_v1  ;;  %vm6244_vm9 = vmpackc.low %vm465_vm8, %vm464_vm7 }
 0x16f   :  { %2592 = vmatmul.mubr.bf16.gmra.mrb[16].mxu1 %v5740_v8  ;;  %4740 = vmatmul.mubr.bf16.gmra.mrb[16].mxu0 %v5964_v9  ;;  %v5788_v8 = vcombine.low %v1007_v52, %v1011_v53  ;;  %v6012_v9 = vcombine.low %v783_v54, %v787_v55  ;;  %v1059_v52 = vld [vmem:[#allocation7 + $0x428] sm:$0xff] }
 0x170   :  { %2599 = vmatprep.mubr.bf16.mxu1 %v5749_v23  ;;  %4747 = vmatprep.mubr.bf16.mxu0 %v5973_v10  ;;  %v5797_v23 = vcombine.high %v1015_v61, %v1019_v62  ;;  %v6021_v10 = vcombine.high %v791_v63, %v795_v0  ;;  %v831_v53 = vld [vmem:[#allocation4 + $0x408] sm:$0xff] }
 0x171   :  { %6235 = vmatpush1.bf16.msk.msra.mxu1 %vm6234_vm10, %v7227_v18  ;;  %6363 = vmatpush1.bf16.msk.msra.mxu0 %vm6234_vm10, %v7227_v18  ;;  %vm466_vm10 = vcmp.eq.s32.totalorder %v7309_v11, %v7686_v29  ;;  %v835_v54 = vld [vmem:[#allocation4 + $0x428] sm:$0xff] }
 0x172   :  { %2802 = vmatprep.subr.bf16.mxu1 %v7226_v1  ;;  %4950 = vmatprep.subr.bf16.mxu0 %v7226_v1  ;;  %vm6246_vm12 = vmpackc.low %vm467_vm11, %vm466_vm10 }
 0x175   :  { %6237 = vmatpush1.bf16.msk.msra.mxu1 %vm6236_vm13, %v7227_v18  ;;  %6365 = vmatpush1.bf16.msk.msra.mxu0 %vm6236_vm13, %v7227_v18  ;;  %vm468_vm13 = vcmp.eq.s32.totalorder %v7333_v19, %v7686_v29  ;;  %v1031_v29 = vld [vmem:[#allocation7 + $0x348] sm:$0xff] }
 0x176   :  { %2804 = vmatprep.subr.bf16.mxu1 %v7226_v1  ;;  %4952 = vmatprep.subr.bf16.mxu0 %v7226_v1  ;;  %vm6248_vm15 = vmpackc.low %vm469_vm14, %vm468_vm13  ;;  %v5812_v41 = vcombine.low %v1031_v29, %v1035_v30 }
 0x177   :  { %2600 = vmatmul.mubr.bf16.gmra.mrb[20].mxu1 %v5748_v22  ;;  %4748 = vmatmul.mubr.bf16.gmra.mrb[20].mxu0 %v5972_v24  ;;  %v5796_v22 = vcombine.low %v1015_v61, %v1019_v62  ;;  %v6020_v24 = vcombine.low %v791_v63, %v795_v0  ;;  %v1067_v61 = vld [vmem:[#allocation7 + $0x468] sm:$0xff] }
 0x178   :  { %2607 = vmatprep.mubr.bf16.mxu1 %v5757_v26  ;;  %4755 = vmatprep.mubr.bf16.mxu0 %v5981_v28  ;;  %v5805_v26 = vcombine.high %v1023_v12, %v1027_v13  ;;  %v6029_v28 = vcombine.high %v799_v15, %v803_v17  ;;  %v839_v62 = vld [vmem:[#allocation4 + $0x448] sm:$0xff] }
 0x179   :  { %6239 = vmatpush1.bf16.msk.msra.mxu1 %vm6238_vm0, %v7227_v18  ;;  %6367 = vmatpush1.bf16.msk.msra.mxu0 %vm6238_vm0, %v7227_v18  ;;  %v843_v63 = vld [vmem:[#allocation4 + $0x468] sm:$0xff] }
 0x17a   :  { %2806 = vmatprep.subr.bf16.mxu1 %v7226_v1  ;;  %4954 = vmatprep.subr.bf16.mxu0 %v7226_v1  ;;  %v1075_v12 = vld [vmem:[#allocation7 + $0x4a8] sm:$0xff] }
 0x17b   :  { %v847_v13 = vld [vmem:[#allocation4 + $0x488] sm:$0xff] }
 0x17d   :  { %6241 = vmatpush1.bf16.msk.msra.mxu1 %vm6240_vm3, %v7227_v18  ;;  %6369 = vmatpush1.bf16.msk.msra.mxu0 %vm6240_vm3, %v7227_v18 }
 0x17e   :  { %2808 = vmatprep.subr.bf16.mxu1 %v7226_v1  ;;  %4956 = vmatprep.subr.bf16.mxu0 %v7226_v1 }
 0x17f   :  { %2608 = vmatmul.mubr.bf16.gmra.mrb[24].mxu1 %v5756_v35  ;;  %4756 = vmatmul.mubr.bf16.gmra.mrb[24].mxu0 %v5980_v3  ;;  %v6028_v35 = vcombine.low %v799_v15, %v803_v17  ;;  %v5813_v3 = vcombine.high %v1031_v29, %v1035_v30  ;;  %v851_v15 = vld [vmem:[#allocation4 + $0x4a8] sm:$0xff] }
 0x180   :  { %2615 = vmatprep.mubr.bf16.mxu1 %v5765_v25  ;;  %4763 = vmatprep.mubr.bf16.mxu0 %v5989_v36  ;;  %v6037_v25 = vcombine.high %v807_v31, %v811_v33  ;;  %v1039_v36 = vld [vmem:[#allocation7 + $0x388] sm:$0xff] }
 0x181   :  { %6243 = vmatpush1.bf16.msk.msra.mxu1 %vm6242_vm6, %v7227_v18  ;;  %6371 = vmatpush1.bf16.msk.msra.mxu0 %vm6242_vm6, %v7227_v18  ;;  %v5820_v48 = vcombine.low %v1039_v36, %v1043_v37  ;;  %v1083_v29 = vld [vmem:[#allocation7 + $0x4e8] sm:$0xff] }
 0x182   :  { %2810 = vmatprep.subr.bf16.mxu1 %v7226_v1  ;;  %4958 = vmatprep.subr.bf16.mxu0 %v7226_v1  ;;  %v855_v30 = vld [vmem:[#allocation4 + $0x4c8] sm:$0xff] }
 0x185   :  { %6245 = vmatpush1.bf16.msk.msra.mxu1 %vm6244_vm9, %v7227_v18  ;;  %6373 = vmatpush1.bf16.msk.msra.mxu0 %vm6244_vm9, %v7227_v18 }
 0x186   :  { %2812 = vmatprep.subr.bf16.mxu1 %v7226_v1  ;;  %4960 = vmatprep.subr.bf16.mxu0 %v7226_v1 }
 0x187   :  { %2616 = vmatmul.mubr.bf16.gmra.mrb[28].mxu1 %v5764_v42  ;;  %4764 = vmatmul.mubr.bf16.gmra.mrb[28].mxu0 %v5988_v7  ;;  %v6036_v42 = vcombine.low %v807_v31, %v811_v33  ;;  %v5821_v7 = vcombine.high %v1039_v36, %v1043_v37  ;;  %v859_v31 = vld [vmem:[#allocation4 + $0x4e8] sm:$0xff] }
 0x188   :  { %2623 = vmatprep.mubr.bf16.mxu1 %v5773_v43  ;;  %4771 = vmatprep.mubr.bf16.mxu0 %v5997_v44  ;;  %v6045_v43 = vcombine.high %v815_v38, %v819_v39  ;;  %v1047_v44 = vld [vmem:[#allocation7 + $0x3c8] sm:$0xff] }
 0x189   :  { %6247 = vmatpush1.bf16.msk.msra.mxu1 %vm6246_vm12, %v7227_v18  ;;  %6375 = vmatpush1.bf16.msk.msra.mxu0 %vm6246_vm12, %v7227_v18  ;;  %v5828_v55 = vcombine.low %v1047_v44, %v1051_v45  ;;  %v1091_v36 = vld [vmem:[#allocation7 + $0x528] sm:$0xff] }
 0x18a   :  { %2814 = vmatprep.subr.bf16.mxu1 %v7226_v1  ;;  %4962 = vmatprep.subr.bf16.mxu0 %v7226_v1  ;;  %v863_v37 = vld [vmem:[#allocation4 + $0x508] sm:$0xff] }
 0x18d   :  { %6249 = vmatpush1.bf16.msk.msra.mxu1 %vm6248_vm15, %v7227_v18  ;;  %6377 = vmatpush1.bf16.msk.msra.mxu0 %vm6248_vm15, %v7227_v18 }
 0x18e   :  { %3041 = vmatprep.subr.bf16.mxu1 %v7226_v1  ;;  %5189 = vmatprep.subr.bf16.mxu0 %v7226_v1 }
 0x18f   :  { %2624 = vmatmul.mubr.bf16.gmra.mrb[32].mxu1 %v5772_v49  ;;  %4772 = vmatmul.mubr.bf16.gmra.mrb[32].mxu0 %v5996_v21  ;;  %v6044_v49 = vcombine.low %v815_v38, %v819_v39  ;;  %v5829_v21 = vcombine.high %v1047_v44, %v1051_v45  ;;  %v867_v38 = vld [vmem:[#allocation4 + $0x528] sm:$0xff] }
 0x190   :  { %2631 = vmatprep.mubr.bf16.mxu1 %v5781_v50  ;;  %4779 = vmatprep.mubr.bf16.mxu0 %v6005_v51  ;;  %v6053_v50 = vcombine.high %v823_v46, %v827_v47  ;;  %v1055_v51 = vld [vmem:[#allocation7 + $0x408] sm:$0xff] }
 0x191   :  { %v5836_v0 = vcombine.low %v1055_v51, %v1059_v52  ;;  %v1099_v44 = vld [vmem:[#allocation7 + $0x568] sm:$0xff] }
 0x192   :  { %v871_v45 = vld [vmem:[#allocation4 + $0x548] sm:$0xff] }
 0x197   :  { %2632 = vmatmul.mubr.bf16.gmra.mrb[36].mxu1 %v5780_v56  ;;  %4780 = vmatmul.mubr.bf16.gmra.mrb[36].mxu0 %v6004_v57  ;;  %v6052_v56 = vcombine.low %v823_v46, %v827_v47  ;;  %v5837_v57 = vcombine.high %v1055_v51, %v1059_v52  ;;  %v875_v46 = vld [vmem:[#allocation4 + $0x568] sm:$0xff] }
 0x198   :  { %2639 = vmatprep.mubr.bf16.mxu1 %v5789_v58  ;;  %4787 = vmatprep.mubr.bf16.mxu0 %v6013_v59  ;;  %v6061_v58 = vcombine.high %v831_v53, %v835_v54  ;;  %v1063_v59 = vld [vmem:[#allocation7 + $0x448] sm:$0xff] }
 0x199   :  { %v5844_v17 = vcombine.low %v1063_v59, %v1067_v61  ;;  %v1107_v51 = vld [vmem:[#allocation7 + $0x5a8] sm:$0xff] }
 0x19a   :  { %v879_v52 = vld [vmem:[#allocation4 + $0x588] sm:$0xff] }
 0x19f   :  { %2640 = vmatmul.mubr.bf16.gmra.mrb[40].mxu1 %v5788_v8  ;;  %4788 = vmatmul.mubr.bf16.gmra.mrb[40].mxu0 %v6012_v9  ;;  %v6060_v8 = vcombine.low %v831_v53, %v835_v54  ;;  %v5845_v9 = vcombine.high %v1063_v59, %v1067_v61  ;;  %v883_v53 = vld [vmem:[#allocation4 + $0x5a8] sm:$0xff] }
 0x1a0   :  { %2647 = vmatprep.mubr.bf16.mxu1 %v5797_v23  ;;  %4795 = vmatprep.mubr.bf16.mxu0 %v6021_v10  ;;  %v6069_v23 = vcombine.high %v839_v62, %v843_v63  ;;  %v1071_v10 = vld [vmem:[#allocation7 + $0x488] sm:$0xff] }
 0x1a1   :  { %v5852_v33 = vcombine.low %v1071_v10, %v1075_v12  ;;  %v1115_v59 = vld [vmem:[#allocation7 + $0x5e8] sm:$0xff] }
 0x1a2   :  { %v887_v61 = vld [vmem:[#allocation4 + $0x5c8] sm:$0xff] }
 0x1a7   :  { %2648 = vmatmul.mubr.bf16.gmra.mrb[44].mxu1 %v5796_v22  ;;  %4796 = vmatmul.mubr.bf16.gmra.mrb[44].mxu0 %v6020_v24  ;;  %v6068_v22 = vcombine.low %v839_v62, %v843_v63  ;;  %v5853_v24 = vcombine.high %v1071_v10, %v1075_v12  ;;  %v891_v62 = vld [vmem:[#allocation4 + $0x5e8] sm:$0xff] }
 0x1a8   :  { %2655 = vmatprep.mubr.bf16.mxu1 %v5805_v26  ;;  %4803 = vmatprep.mubr.bf16.mxu0 %v6029_v28  ;;  %v6077_v26 = vcombine.high %v847_v13, %v851_v15  ;;  %v1079_v28 = vld [vmem:[#allocation7 + $0x4c8] sm:$0xff] }
 0x1a9   :  { %v5860_v39 = vcombine.low %v1079_v28, %v1083_v29  ;;  %v1123_v10 = vld [vmem:[#allocation7 + $0x628] sm:$0xff] }
 0x1aa   :  { %v895_v12 = vld [vmem:[#allocation4 + $0x608] sm:$0xff] }
 0x1af   :  { %2656 = vmatmul.mubr.bf16.gmra.mrb[48].mxu1 %v5804_v34  ;;  %4804 = vmatmul.mubr.bf16.gmra.mrb[48].mxu0 %v6028_v35  ;;  %v6076_v34 = vcombine.low %v847_v13, %v851_v15  ;;  %v5861_v35 = vcombine.high %v1079_v28, %v1083_v29  ;;  %v899_v13 = vld [vmem:[#allocation4 + $0x628] sm:$0xff] }
 0x1b0   :  { %2663 = vmatprep.mubr.bf16.mxu1 %v5813_v3  ;;  %4811 = vmatprep.mubr.bf16.mxu0 %v6037_v25  ;;  %v6085_v3 = vcombine.high %v855_v30, %v859_v31  ;;  %v1087_v25 = vld [vmem:[#allocation7 + $0x508] sm:$0xff] }
 0x1b1   :  { %v5868_v47 = vcombine.low %v1087_v25, %v1091_v36  ;;  %v1131_v28 = vld [vmem:[#allocation7 + $0x668] sm:$0xff] }
 0x1b2   :  { %v903_v29 = vld [vmem:[#allocation4 + $0x648] sm:$0xff] }
 0x1b7   :  { %2664 = vmatmul.mubr.bf16.gmra.mrb[52].mxu1 %v5812_v41  ;;  %4812 = vmatmul.mubr.bf16.gmra.mrb[52].mxu0 %v6036_v42  ;;  %v6084_v41 = vcombine.low %v855_v30, %v859_v31  ;;  %v5869_v42 = vcombine.high %v1087_v25, %v1091_v36  ;;  %v907_v30 = vld [vmem:[#allocation4 + $0x668] sm:$0xff] }
 0x1b8   :  { %2671 = vmatprep.mubr.bf16.mxu1 %v5821_v7  ;;  %4819 = vmatprep.mubr.bf16.mxu0 %v6045_v43  ;;  %v6093_v7 = vcombine.high %v863_v37, %v867_v38  ;;  %v1095_v43 = vld [vmem:[#allocation7 + $0x548] sm:$0xff] }
 0x1b9   :  { %v5876_v54 = vcombine.low %v1095_v43, %v1099_v44  ;;  %v1139_v25 = vld [vmem:[#allocation7 + $0x6a8] sm:$0xff] }
 0x1ba   :  { %v911_v36 = vld [vmem:[#allocation4 + $0x688] sm:$0xff] }
 0x1bf   :  { %2672 = vmatmul.mubr.bf16.gmra.mrb[56].mxu1 %v5820_v48  ;;  %4820 = vmatmul.mubr.bf16.gmra.mrb[56].mxu0 %v6044_v49  ;;  %v6092_v48 = vcombine.low %v863_v37, %v867_v38  ;;  %v5877_v49 = vcombine.high %v1095_v43, %v1099_v44  ;;  %v915_v37 = vld [vmem:[#allocation4 + $0x6a8] sm:$0xff] }
 0x1c0   :  { %2679 = vmatprep.mubr.bf16.mxu1 %v5829_v21  ;;  %4827 = vmatprep.mubr.bf16.mxu0 %v6053_v50  ;;  %v6101_v21 = vcombine.high %v871_v45, %v875_v46  ;;  %v1103_v50 = vld [vmem:[#allocation7 + $0x588] sm:$0xff] }
 0x1c1   :  { %v5884_v63 = vcombine.low %v1103_v50, %v1107_v51  ;;  %v1147_v43 = vld [vmem:[#allocation7 + $0x6e8] sm:$0xff] }
 0x1c2   :  { %v919_v44 = vld [vmem:[#allocation4 + $0x6c8] sm:$0xff] }
 0x1c7   :  { %2680 = vmatmul.mubr.bf16.gmra.mrb[60].mxu1 %v5828_v55  ;;  %4828 = vmatmul.mubr.bf16.gmra.mrb[60].mxu0 %v6052_v56  ;;  %v6100_v55 = vcombine.low %v871_v45, %v875_v46  ;;  %v5885_v56 = vcombine.high %v1103_v50, %v1107_v51  ;;  %v923_v45 = vld [vmem:[#allocation4 + $0x6e8] sm:$0xff]  ;;  %v932_v50 = vld [vmem:[#allocation7 + $0x30] sm:$0xff] }
 0x1c8   :  { %2687 = vmatprep.mubr.bf16.mxu1 %v5837_v57  ;;  %4835 = vmatprep.mubr.bf16.mxu0 %v6061_v58  ;;  %v6109_v57 = vcombine.high %v879_v52, %v883_v53  ;;  %v1111_v58 = vld [vmem:[#allocation7 + $0x5c8] sm:$0xff]  ;;  %v704_v51 = vld [vmem:[#allocation4 + $0x10] sm:$0xff] }
 0x1c9   :  { %v5892_v15 = vcombine.low %v1111_v58, %v1115_v59 }
 0x1cf   :  { %2688 = vmatmul.mubr.bf16.gmra.mrb[64].mxu1 %v5836_v0  ;;  %4836 = vmatmul.mubr.bf16.gmra.mrb[64].mxu0 %v6060_v8  ;;  %v6108_v0 = vcombine.low %v879_v52, %v883_v53  ;;  %v5893_v8 = vcombine.high %v1111_v58, %v1115_v59  ;;  %v708_v52 = vld [vmem:[#allocation4 + $0x30] sm:$0xff] }
 0x1d0   :  { %2695 = vmatprep.mubr.bf16.mxu1 %v5845_v9  ;;  %4843 = vmatprep.mubr.bf16.mxu0 %v6069_v23  ;;  %v6117_v9 = vcombine.high %v887_v61, %v891_v62  ;;  %v1119_v23 = vld [vmem:[#allocation7 + $0x608] sm:$0xff]  ;;  %v936_v58 = vld [vmem:[#allocation7 + $0x50] sm:$0xff] }
 0x1d1   :  { %v5900_v31 = vcombine.low %v1119_v23, %v1123_v10  ;;  %v940_v59 = vld [vmem:[#allocation7 + $0x70] sm:$0xff] }
 0x1d7   :  { %2696 = vmatmul.mubr.bf16.gmra.mrb[68].mxu1 %v5844_v17  ;;  %4844 = vmatmul.mubr.bf16.gmra.mrb[68].mxu0 %v6068_v22  ;;  %v6116_v17 = vcombine.low %v887_v61, %v891_v62  ;;  %v5901_v22 = vcombine.high %v1119_v23, %v1123_v10  ;;  %v712_v61 = vld [vmem:[#allocation4 + $0x50] sm:$0xff] }
 0x1d8   :  { %2703 = vmatprep.mubr.bf16.mxu1 %v5853_v24  ;;  %4851 = vmatprep.mubr.bf16.mxu0 %v6077_v26  ;;  %v6125_v24 = vcombine.high %v895_v12, %v899_v13  ;;  %v1127_v26 = vld [vmem:[#allocation7 + $0x648] sm:$0xff]  ;;  %v716_v62 = vld [vmem:[#allocation4 + $0x70] sm:$0xff] }
 0x1d9   :  { %v5908_v38 = vcombine.low %v1127_v26, %v1131_v28  ;;  %v948_v23 = vld [vmem:[#allocation7 + $0xb0] sm:$0xff] }
 0x1da   :  { %v720_v10 = vld [vmem:[#allocation4 + $0x90] sm:$0xff] }
 0x1df   :  { %2704 = vmatmul.mubr.bf16.gmra.mrb[72].mxu1 %v5852_v33  ;;  %4852 = vmatmul.mubr.bf16.gmra.mrb[72].mxu0 %v6076_v34  ;;  %v6124_v33 = vcombine.low %v895_v12, %v899_v13  ;;  %v5909_v34 = vcombine.high %v1127_v26, %v1131_v28  ;;  %v724_v12 = vld [vmem:[#allocation4 + $0xb0] sm:$0xff]  ;;  %v5718_v13 = vcombine.low %v936_v58, %v940_v59 }
 0x1e0   :  { %2711 = vmatprep.mubr.bf16.mxu1 %v5861_v35  ;;  %4859 = vmatprep.mubr.bf16.mxu0 %v6085_v3  ;;  %v6133_v35 = vcombine.high %v903_v29, %v907_v30  ;;  %v1135_v3 = vld [vmem:[#allocation7 + $0x688] sm:$0xff]  ;;  %v952_v26 = vld [vmem:[#allocation7 + $0xd0] sm:$0xff] }
 0x1e1   :  { %v5916_v46 = vcombine.low %v1135_v3, %v1139_v25  ;;  %v956_v28 = vld [vmem:[#allocation7 + $0xf0] sm:$0xff] }
 0x1e7   :  { %2712 = vmatmul.mubr.bf16.gmra.mrb[76].mxu1 %v5860_v39  ;;  %4860 = vmatmul.mubr.bf16.gmra.mrb[76].mxu0 %v6084_v41  ;;  %v6132_v39 = vcombine.low %v903_v29, %v907_v30  ;;  %v5917_v41 = vcombine.high %v1135_v3, %v1139_v25  ;;  %v728_v29 = vld [vmem:[#allocation4 + $0xd0] sm:$0xff] }
 0x1e8   :  { %2719 = vmatprep.mubr.bf16.mxu1 %v5869_v42  ;;  %4867 = vmatprep.mubr.bf16.mxu0 %v6093_v7  ;;  %v6141_v42 = vcombine.high %v911_v36, %v915_v37  ;;  %v1143_v7 = vld [vmem:[#allocation7 + $0x6c8] sm:$0xff]  ;;  %v732_v30 = vld [vmem:[#allocation4 + $0xf0] sm:$0xff] }
 0x1e9   :  { %v5924_v53 = vcombine.low %v1143_v7, %v1147_v43  ;;  %v736_v3 = vld [vmem:[#allocation4 + $0x110] sm:$0xff] }
 0x1ea   :  { %v740_v25 = vld [vmem:[#allocation4 + $0x130] sm:$0xff] }
 0x1ef   :  { %2720 = vmatmul.mubr.bf16.gmra.mrb[80].mxu1 %v5868_v47  ;;  %4868 = vmatmul.mubr.bf16.gmra.mrb[80].mxu0 %v6092_v48  ;;  %v6140_v47 = vcombine.low %v911_v36, %v915_v37  ;;  %v5925_v48 = vcombine.high %v1143_v7, %v1147_v43  ;;  %v5734_v36 = vcombine.low %v952_v26, %v956_v28  ;;  %v968_v7 = vld [vmem:[#allocation7 + $0x150] sm:$0xff] }
 0x1f0   :  { %2727 = vmatprep.mubr.bf16.mxu1 %v5877_v49  ;;  %4875 = vmatprep.mubr.bf16.mxu0 %v6101_v21  ;;  %v6149_v49 = vcombine.high %v919_v44, %v923_v45  ;;  %v928_v21 = vld [vmem:[#allocation7 + $0x10] sm:$0xff]  ;;  %v5958_v37 = vcombine.low %v728_v29, %v732_v30 }
 0x1f1   :  { %v972_v43 = vld [vmem:[#allocation7 + $0x170] sm:$0xff] }
 0x1f7   :  { %2728 = vmatmul.mubr.bf16.gmra.mrb[84].mxu1 %v5876_v54  ;;  %4876 = vmatmul.mubr.bf16.gmra.mrb[84].mxu0 %v6100_v55  ;;  %v6148_v54 = vcombine.low %v919_v44, %v923_v45  ;;  %v5711_v55 = vcombine.high %v928_v21, %v932_v50  ;;  %v744_v44 = vld [vmem:[#allocation4 + $0x150] sm:$0xff] }
 0x1f8   :  { %2735 = vmatprep.mubr.bf16.mxu1 %v5885_v56  ;;  %4883 = vmatprep.mubr.bf16.mxu0 %v6109_v57  ;;  %v5935_v56 = vcombine.high %v704_v51, %v708_v52  ;;  %v497_v57 = vrot.slane %v7588_v16, %v208_v27  ;;  %v944_v27 = vld [vmem:[#allocation7 + $0x90] sm:$0xff] }
 0x1f9   :  { %v748_v45 = vld [vmem:[#allocation4 + $0x170] sm:$0xff] }
 0x1fa   :  { %vm498_vm0 = vcmp.eq.s32.totalorder %v7282_v2, %v497_v57  ;;  %vm499_vm1 = vcmp.eq.s32.totalorder %v7288_v4, %v497_v57  ;;  %vm500_vm3 = vcmp.eq.s32.totalorder %v7291_v5, %v497_v57  ;;  %vm501_vm4 = vcmp.eq.s32.totalorder %v7294_v6, %v497_v57 }
 0x1fb   :  { %vm6250_vm2 = vmpackc.low %vm499_vm1, %vm498_vm0  ;;  %vm502_vm6 = vcmp.eq.s32.totalorder %v7309_v11, %v497_v57  ;;  %vm503_vm7 = vcmp.eq.s32.totalorder %v7316_v14, %v497_v57  ;;  %vm504_vm9 = vcmp.eq.s32.totalorder %v7333_v19, %v497_v57  ;;  %vm505_vm10 = vcmp.eq.s32.totalorder %v7338_v20, %v497_v57  ;;  %v984_v57 = vld [vmem:[#allocation7 + $0x1d0] sm:$0xff] }
 0x1fc   :  { %vm6252_vm5 = vmpackc.low %vm501_vm4, %vm500_vm3 }
 0x1fd   :  { %vm6254_vm8 = vmpackc.low %vm503_vm7, %vm502_vm6 }
 0x1fe   :  { %vm6256_vm11 = vmpackc.low %vm505_vm10, %vm504_vm9 }
 0x1ff   :  { %2736 = vmatmul.mubr.bf16.gmra.mrb[88].mxu1 %v5884_v63  ;;  %4884 = vmatmul.mubr.bf16.gmra.mrb[88].mxu0 %v6108_v0  ;;  %v5710_v63 = vcombine.low %v928_v21, %v932_v50  ;;  %v5934_v0 = vcombine.low %v704_v51, %v708_v52  ;;  %v980_v21 = vld [vmem:[#allocation7 + $0x1b0] sm:$0xff]  ;;  %v5750_v52 = vcombine.low %v968_v7, %v972_v43 }
 0x200   :  { %2743 = vmatprep.mubr.bf16.mxu1 %v5893_v8  ;;  %4891 = vmatprep.mubr.bf16.mxu0 %v6117_v9  ;;  %v5719_v8 = vcombine.high %v936_v58, %v940_v59  ;;  %v5943_v9 = vcombine.high %v712_v61, %v716_v62  ;;  %v752_v50 = vld [vmem:[#allocation4 + $0x190] sm:$0xff] }
 0x201   :  { %v756_v51 = vld [vmem:[#allocation4 + $0x1b0] sm:$0xff] }
 0x202   :  { %v988_v58 = vld [vmem:[#allocation7 + $0x1f0] sm:$0xff] }
 0x203   :  { %v760_v59 = vld [vmem:[#allocation4 + $0x1d0] sm:$0xff] }
 0x207   :  { %2744 = vmatmul.mubr.bf16.gmra.mrb[92].mxu1 %v5892_v15  ;;  %4892 = vmatmul.mubr.bf16.gmra.mrb[92].mxu0 %v6116_v17  ;;  %v5942_v15 = vcombine.low %v712_v61, %v716_v62  ;;  %v5727_v17 = vcombine.high %v944_v27, %v948_v23  ;;  %v764_v61 = vld [vmem:[#allocation4 + $0x1f0] sm:$0xff] }
 0x208   :  { %2751 = vmatprep.mubr.bf16.mxu1 %v5901_v22  ;;  %4899 = vmatprep.mubr.bf16.mxu0 %v6125_v24  ;;  %v5951_v22 = vcombine.high %v720_v10, %v724_v12  ;;  %v7750_v24 = vrot.slane %v7588_v16, %v244_v40  ;;  %v5735_v40 = vcombine.high %v952_v26, %v956_v28  ;;  %v1008_v28 = vld [vmem:[#allocation7 + $0x290] sm:$0xff] }
 0x209   :  { %v5959_v16 = vcombine.high %v728_v29, %v732_v30  ;;  %v1012_v29 = vld [vmem:[#allocation7 + $0x2b0] sm:$0xff] }
 0x20a   :  { %vm534_vm12 = vcmp.eq.s32.totalorder %v7282_v2, %v7750_v24  ;;  %vm535_vm13 = vcmp.eq.s32.totalorder %v7288_v4, %v7750_v24  ;;  %vm536_vm15 = vcmp.eq.s32.totalorder %v7291_v5, %v7750_v24  ;;  %vm537_vm0 = vcmp.eq.s32.totalorder %v7294_v6, %v7750_v24  ;;  %v784_v30 = vld [vmem:[#allocation4 + $0x290] sm:$0xff] }
 0x20b   :  { %vm6258_vm14 = vmpackc.low %vm535_vm13, %vm534_vm12  ;;  %vm539_vm3 = vcmp.eq.s32.totalorder %v7316_v14, %v7750_v24  ;;  %vm541_vm6 = vcmp.eq.s32.totalorder %v7338_v20, %v7750_v24 }
 0x20c   :  { %vm6260_vm1 = vmpackc.low %vm537_vm0, %vm536_vm15 }
 0x20f   :  { %2752 = vmatmul.mubr.bf16.gmra.mrb[96].mxu1 %v5900_v31  ;;  %4900 = vmatmul.mubr.bf16.gmra.mrb[96].mxu0 %v6124_v33  ;;  %v5726_v31 = vcombine.low %v944_v27, %v948_v23  ;;  %v5950_v33 = vcombine.low %v720_v10, %v724_v12  ;;  %v5766_v27 = vcombine.low %v984_v57, %v988_v58 }
 0x210   :  { %2759 = vmatprep.mubr.bf16.mxu1 %v5909_v34  ;;  %4907 = vmatprep.mubr.bf16.mxu0 %v6133_v35  ;;  %v960_v34 = vld [vmem:[#allocation7 + $0x110] sm:$0xff]  ;;  %v5990_v23 = vcombine.low %v760_v59, %v764_v61 }
 0x211   :  { %v964_v35 = vld [vmem:[#allocation7 + $0x130] sm:$0xff] }
 0x217   :  { %2760 = vmatmul.mubr.bf16.gmra.mrb[100].mxu1 %v5908_v38  ;;  %4908 = vmatmul.mubr.bf16.gmra.mrb[100].mxu0 %v6132_v39  ;;  %v5743_v38 = vcombine.high %v960_v34, %v964_v35  ;;  %v5967_v39 = vcombine.high %v736_v3, %v740_v25 }
 0x218   :  { %2767 = vmatprep.mubr.bf16.mxu1 %v5917_v41  ;;  %4915 = vmatprep.mubr.bf16.mxu0 %v6141_v42  ;;  %v7149_v41 = vld [vmem:[%s7889_s0 + $0x8] sm:$0xff] }
 0x219   :  { %v7789_v42 = vrot.slane %v7149_v41, %v280_v60  ;;  %v5751_v60 = vcombine.high %v968_v7, %v972_v43 }
 0x21b   :  { %vm571_vm9 = vcmp.eq.s32.totalorder %v7288_v4, %v7789_v42  ;;  %vm573_vm12 = vcmp.eq.s32.totalorder %v7294_v6, %v7789_v42  ;;  %vm575_vm15 = vcmp.eq.s32.totalorder %v7316_v14, %v7789_v42 }
 0x21f   :  { %2768 = vmatmul.mubr.bf16.gmra.mrb[104].mxu1 %v5916_v46  ;;  %4916 = vmatmul.mubr.bf16.gmra.mrb[104].mxu0 %v6140_v47  ;;  %v5742_v46 = vcombine.low %v960_v34, %v964_v35  ;;  %v5966_v47 = vcombine.low %v736_v3, %v740_v25  ;;  %v1020_v34 = vld [vmem:[#allocation7 + $0x2f0] sm:$0xff]  ;;  %v5790_v25 = vcombine.low %v1008_v28, %v1012_v29 }
 0x220   :  { %2775 = vmatprep.mubr.bf16.mxu1 %v5925_v48  ;;  %4923 = vmatprep.mubr.bf16.mxu0 %v6149_v49  ;;  %v5975_v48 = vcombine.high %v744_v44, %v748_v45  ;;  %v976_v49 = vld [vmem:[#allocation7 + $0x190] sm:$0xff] }
 0x221   :  { %v5758_v62 = vcombine.low %v976_v49, %v980_v21  ;;  %v792_v35 = vld [vmem:[#allocation4 + $0x2d0] sm:$0xff] }
 0x222   :  { %v796_v3 = vld [vmem:[#allocation4 + $0x2f0] sm:$0xff] }
 0x223   :  { %v6022_v43 = vcombine.low %v792_v35, %v796_v3 }
 0x227   :  { %2776 = vmatmul.mubr.bf16.gmra.mrb[108].mxu1 %v5924_v53  ;;  %4924 = vmatmul.mubr.bf16.gmra.mrb[108].mxu0 %v6148_v54  ;;  %v5974_v53 = vcombine.low %v744_v44, %v748_v45  ;;  %v5759_v54 = vcombine.high %v976_v49, %v980_v21 }
 0x228   :  { %2816 = vmatprep.mubr.bf16.mxu1 %v5711_v55  ;;  %4964 = vmatprep.mubr.bf16.mxu0 %v5935_v56  ;;  %v5983_v55 = vcombine.high %v752_v50, %v756_v51  ;;  %v7825_v56 = vrot.slane %v7149_v41, %v316_v32  ;;  %v5767_v32 = vcombine.high %v984_v57, %v988_v58  ;;  %v800_v41 = vld [vmem:[#allocation4 + $0x310] sm:$0xff] }
 0x229   :  { %v1048_v57 = vld [vmem:[#allocation7 + $0x3d0] sm:$0xff] }
 0x22a   :  { %v1052_v58 = vld [vmem:[#allocation7 + $0x3f0] sm:$0xff] }
 0x22f   :  { %2817 = vmatmul.mubr.bf16.vlgmr.msra.gmra.mrb[0].mxu1 %v5710_v63  ;;  %4965 = vmatmul.mubr.bf16.vlgmr.msra.gmra.mrb[0].mxu0 %v5934_v0  ;;  %v5982_v63 = vcombine.low %v752_v50, %v756_v51  ;;  %v5991_v0 = vcombine.high %v760_v59, %v764_v61  ;;  %v1044_v50 = vld [vmem:[#allocation7 + $0x3b0] sm:$0xff] }
 0x230   :  { %6251 = vmatpush1.bf16.msk.msra.mxu1 %vm6250_vm2, %v7227_v18  ;;  %6379 = vmatpush1.bf16.msk.msra.mxu0 %vm6250_vm2, %v7227_v18  ;;  %vm538_vm2 = vcmp.eq.s32.totalorder %v7309_v11, %v7750_v24  ;;  %v816_v51 = vld [vmem:[#allocation4 + $0x390] sm:$0xff] }
 0x231   :  { %2824 = vmatprep.mubr.bf16.mxu1 %v5719_v8  ;;  %4972 = vmatprep.mubr.bf16.mxu0 %v5943_v9  ;;  %vm6262_vm4 = vmpackc.low %vm539_vm3, %vm538_vm2  ;;  %vm577_vm2 = vcmp.eq.s32.totalorder %v7338_v20, %v7789_v42  ;;  %v992_v8 = vld [vmem:[#allocation7 + $0x210] sm:$0xff] }
 0x232   :  { %3043 = vmatprep.subr.bf16.mxu1 %v7226_v1  ;;  %5191 = vmatprep.subr.bf16.mxu0 %v7226_v1  ;;  %v772_v9 = vld [vmem:[#allocation4 + $0x230] sm:$0xff] }
 0x233   :  { %v824_v59 = vld [vmem:[#allocation4 + $0x3d0] sm:$0xff] }
 0x234   :  { %6253 = vmatpush1.bf16.msk.msra.mxu1 %vm6252_vm5, %v7227_v18  ;;  %6381 = vmatpush1.bf16.msk.msra.mxu0 %vm6252_vm5, %v7227_v18  ;;  %vm540_vm5 = vcmp.eq.s32.totalorder %v7333_v19, %v7750_v24  ;;  %v828_v61 = vld [vmem:[#allocation4 + $0x3f0] sm:$0xff] }
 0x235   :  { %3045 = vmatprep.subr.bf16.mxu1 %v7226_v1  ;;  %5193 = vmatprep.subr.bf16.mxu0 %v7226_v1  ;;  %vm6264_vm7 = vmpackc.low %vm541_vm6, %vm540_vm5  ;;  %vm607_vm5 = vcmp.eq.s32.totalorder %v7288_v4, %v7825_v56  ;;  %v768_v4 = vld [vmem:[#allocation4 + $0x210] sm:$0xff] }
 0x236   :  { %v5999_v12 = vcombine.high %v768_v4, %v772_v9 }
 0x237   :  { %2825 = vmatmul.mubr.bf16.gmra.mrb[4].mxu1 %v5718_v13  ;;  %4973 = vmatmul.mubr.bf16.gmra.mrb[4].mxu0 %v5942_v15  ;;  %v776_v13 = vld [vmem:[#allocation4 + $0x250] sm:$0xff] }
 0x238   :  { %2832 = vmatprep.mubr.bf16.mxu1 %v5727_v17  ;;  %4980 = vmatprep.mubr.bf16.mxu0 %v5951_v22  ;;  %v780_v15 = vld [vmem:[#allocation4 + $0x270] sm:$0xff]  ;;  %v5998_v22 = vcombine.low %v768_v4, %v772_v9 }
 0x239   :  { %6255 = vmatpush1.bf16.msk.msra.mxu1 %vm6254_vm8, %v7227_v18  ;;  %6383 = vmatpush1.bf16.msk.msra.mxu0 %vm6254_vm8, %v7227_v18  ;;  %vm570_vm8 = vcmp.eq.s32.totalorder %v7282_v2, %v7789_v42  ;;  %v6007_v26 = vcombine.high %v776_v13, %v780_v15  ;;  %v832_v4 = vld [vmem:[#allocation4 + $0x410] sm:$0xff] }
 0x23a   :  { %3047 = vmatprep.subr.bf16.mxu1 %v7226_v1  ;;  %5195 = vmatprep.subr.bf16.mxu0 %v7226_v1  ;;  %vm6266_vm10 = vmpackc.low %vm571_vm9, %vm570_vm8  ;;  %vm609_vm8 = vcmp.eq.s32.totalorder %v7294_v6, %v7825_v56  ;;  %v1004_v6 = vld [vmem:[#allocation7 + $0x270] sm:$0xff] }
 0x23b   :  { %v836_v9 = vld [vmem:[#allocation4 + $0x430] sm:$0xff] }
 0x23d   :  { %6257 = vmatpush1.bf16.msk.msra.mxu1 %vm6256_vm11, %v7227_v18  ;;  %6385 = vmatpush1.bf16.msk.msra.mxu0 %vm6256_vm11, %v7227_v18  ;;  %vm572_vm11 = vcmp.eq.s32.totalorder %v7291_v5, %v7789_v42 }
 0x23e   :  { %3049 = vmatprep.subr.bf16.mxu1 %v7226_v1  ;;  %5197 = vmatprep.subr.bf16.mxu0 %v7226_v1  ;;  %vm6268_vm13 = vmpackc.low %vm573_vm12, %vm572_vm11  ;;  %vm611_vm11 = vcmp.eq.s32.totalorder %v7316_v14, %v7825_v56  ;;  %v1016_v14 = vld [vmem:[#allocation7 + $0x2d0] sm:$0xff] }
 0x23f   :  { %2833 = vmatmul.mubr.bf16.gmra.mrb[8].mxu1 %v5726_v31  ;;  %4981 = vmatmul.mubr.bf16.gmra.mrb[8].mxu0 %v5950_v33  ;;  %v788_v31 = vld [vmem:[#allocation4 + $0x2b0] sm:$0xff]  ;;  %v5798_v7 = vcombine.low %v1016_v14, %v1020_v34 }
 0x240   :  { %2840 = vmatprep.mubr.bf16.mxu1 %v5735_v40  ;;  %4988 = vmatprep.mubr.bf16.mxu0 %v5959_v16  ;;  %v5791_v40 = vcombine.high %v1008_v28, %v1012_v29  ;;  %v6015_v16 = vcombine.high %v784_v30, %v788_v31  ;;  %v1072_v28 = vld [vmem:[#allocation7 + $0x490] sm:$0xff] }
 0x241   :  { %6259 = vmatpush1.bf16.msk.msra.mxu1 %vm6258_vm14, %v7227_v18  ;;  %6387 = vmatpush1.bf16.msk.msra.mxu0 %vm6258_vm14, %v7227_v18  ;;  %vm574_vm14 = vcmp.eq.s32.totalorder %v7309_v11, %v7789_v42  ;;  %v1076_v29 = vld [vmem:[#allocation7 + $0x4b0] sm:$0xff] }
 0x242   :  { %3051 = vmatprep.subr.bf16.mxu1 %v7226_v1  ;;  %5199 = vmatprep.subr.bf16.mxu0 %v7226_v1  ;;  %vm6270_vm0 = vmpackc.low %vm575_vm15, %vm574_vm14  ;;  %vm613_vm14 = vcmp.eq.s32.totalorder %v7338_v20, %v7825_v56  ;;  %v1036_v20 = vld [vmem:[#allocation7 + $0x370] sm:$0xff] }
 0x245   :  { %6261 = vmatpush1.bf16.msk.msra.mxu1 %vm6260_vm1, %v7227_v18  ;;  %6389 = vmatpush1.bf16.msk.msra.mxu0 %vm6260_vm1, %v7227_v18  ;;  %vm576_vm1 = vcmp.eq.s32.totalorder %v7333_v19, %v7789_v42  ;;  %v804_v42 = vld [vmem:[#allocation4 + $0x330] sm:$0xff] }
 0x246   :  { %3053 = vmatprep.subr.bf16.mxu1 %v7226_v1  ;;  %5201 = vmatprep.subr.bf16.mxu0 %v7226_v1  ;;  %vm6272_vm3 = vmpackc.low %vm577_vm2, %vm576_vm1  ;;  %v6031_v45 = vcombine.high %v800_v41, %v804_v42 }
 0x247   :  { %2841 = vmatmul.mubr.bf16.gmra.mrb[12].mxu1 %v5734_v36  ;;  %4989 = vmatmul.mubr.bf16.gmra.mrb[12].mxu0 %v5958_v37  ;;  %v6014_v36 = vcombine.low %v784_v30, %v788_v31  ;;  %v5799_v37 = vcombine.high %v1016_v14, %v1020_v34  ;;  %v848_v30 = vld [vmem:[#allocation4 + $0x490] sm:$0xff] }
 0x248   :  { %2848 = vmatprep.mubr.bf16.mxu1 %v5743_v38  ;;  %4996 = vmatprep.mubr.bf16.mxu0 %v5967_v39  ;;  %v6023_v38 = vcombine.high %v792_v35, %v796_v3  ;;  %v1028_v39 = vld [vmem:[#allocation7 + $0x330] sm:$0xff] }
 0x249   :  { %6263 = vmatpush1.bf16.msk.msra.mxu1 %vm6262_vm4, %v7227_v18  ;;  %6391 = vmatpush1.bf16.msk.msra.mxu0 %vm6262_vm4, %v7227_v18  ;;  %vm606_vm4 = vcmp.eq.s32.totalorder %v7282_v2, %v7825_v56  ;;  %v996_v2 = vld [vmem:[#allocation7 + $0x230] sm:$0xff] }
 0x24a   :  { %3055 = vmatprep.subr.bf16.mxu1 %v7226_v1  ;;  %5203 = vmatprep.subr.bf16.mxu0 %v7226_v1  ;;  %vm6274_vm6 = vmpackc.low %vm607_vm5, %vm606_vm4  ;;  %v5775_v10 = vcombine.high %v992_v8, %v996_v2  ;;  %v5774_v17 = vcombine.low %v992_v8, %v996_v2  ;;  %v1056_v8 = vld [vmem:[#allocation7 + $0x410] sm:$0xff] }
 0x24b   :  { %v1060_v2 = vld [vmem:[#allocation7 + $0x430] sm:$0xff] }
 0x24c   :  { %v852_v31 = vld [vmem:[#allocation4 + $0x4b0] sm:$0xff] }
 0x24d   :  { %6265 = vmatpush1.bf16.msk.msra.mxu1 %vm6264_vm7, %v7227_v18  ;;  %6393 = vmatpush1.bf16.msk.msra.mxu0 %vm6264_vm7, %v7227_v18  ;;  %vm608_vm7 = vcmp.eq.s32.totalorder %v7291_v5, %v7825_v56  ;;  %v1000_v5 = vld [vmem:[#allocation7 + $0x250] sm:$0xff] }
 0x24e   :  { %3057 = vmatprep.subr.bf16.mxu1 %v7226_v1  ;;  %5205 = vmatprep.subr.bf16.mxu0 %v7226_v1  ;;  %vm6276_vm9 = vmpackc.low %vm609_vm8, %vm608_vm7  ;;  %v5783_v24 = vcombine.high %v1000_v5, %v1004_v6  ;;  %v5782_v33 = vcombine.low %v1000_v5, %v1004_v6  ;;  %v1064_v5 = vld [vmem:[#allocation7 + $0x450] sm:$0xff] }
 0x24f   :  { %2849 = vmatmul.mubr.bf16.gmra.mrb[16].mxu1 %v5742_v46  ;;  %4997 = vmatmul.mubr.bf16.gmra.mrb[16].mxu0 %v5966_v47  ;;  %v808_v46 = vld [vmem:[#allocation4 + $0x350] sm:$0xff] }
 0x250   :  { %2856 = vmatprep.mubr.bf16.mxu1 %v5751_v60  ;;  %5004 = vmatprep.mubr.bf16.mxu0 %v5975_v48  ;;  %v812_v47 = vld [vmem:[#allocation4 + $0x370] sm:$0xff]  ;;  %v6030_v48 = vcombine.low %v800_v41, %v804_v42 }
 0x251   :  { %6267 = vmatpush1.bf16.msk.msra.mxu1 %vm6266_vm10, %v7227_v18  ;;  %6395 = vmatpush1.bf16.msk.msra.mxu0 %vm6266_vm10, %v7227_v18  ;;  %vm610_vm10 = vcmp.eq.s32.totalorder %v7309_v11, %v7825_v56  ;;  %v6006_v11 = vcombine.low %v776_v13, %v780_v15  ;;  %v6039_v21 = vcombine.high %v808_v46, %v812_v47  ;;  %v1068_v6 = vld [vmem:[#allocation7 + $0x470] sm:$0xff] }
 0x252   :  { %3059 = vmatprep.subr.bf16.mxu1 %v7226_v1  ;;  %5207 = vmatprep.subr.bf16.mxu0 %v7226_v1  ;;  %vm6278_vm12 = vmpackc.low %vm611_vm11, %vm610_vm10  ;;  %v840_v13 = vld [vmem:[#allocation4 + $0x450] sm:$0xff] }
 0x253   :  { %v844_v15 = vld [vmem:[#allocation4 + $0x470] sm:$0xff] }
 0x254   :  { %v1080_v14 = vld [vmem:[#allocation7 + $0x4d0] sm:$0xff] }
 0x255   :  { %6269 = vmatpush1.bf16.msk.msra.mxu1 %vm6268_vm13, %v7227_v18  ;;  %6397 = vmatpush1.bf16.msk.msra.mxu0 %vm6268_vm13, %v7227_v18  ;;  %vm612_vm13 = vcmp.eq.s32.totalorder %v7333_v19, %v7825_v56  ;;  %v1032_v19 = vld [vmem:[#allocation7 + $0x350] sm:$0xff] }
 0x256   :  { %3061 = vmatprep.subr.bf16.mxu1 %v7226_v1  ;;  %5209 = vmatprep.subr.bf16.mxu0 %v7226_v1  ;;  %vm6280_vm15 = vmpackc.low %vm613_vm14, %vm612_vm13  ;;  %v5815_v49 = vcombine.high %v1032_v19, %v1036_v20  ;;  %v1084_v34 = vld [vmem:[#allocation7 + $0x4f0] sm:$0xff] }
 0x257   :  { %2857 = vmatmul.mubr.bf16.gmra.mrb[20].mxu1 %v5750_v52  ;;  %5005 = vmatmul.mubr.bf16.gmra.mrb[20].mxu0 %v5974_v53  ;;  %v820_v52 = vld [vmem:[#allocation4 + $0x3b0] sm:$0xff]  ;;  %v5814_v53 = vcombine.low %v1032_v19, %v1036_v20 }
 0x258   :  { %2864 = vmatprep.mubr.bf16.mxu1 %v5759_v54  ;;  %5012 = vmatprep.mubr.bf16.mxu0 %v5983_v55  ;;  %v6038_v54 = vcombine.low %v808_v46, %v812_v47  ;;  %v6047_v56 = vcombine.high %v816_v51, %v820_v52  ;;  %v856_v35 = vld [vmem:[#allocation4 + $0x4d0] sm:$0xff] }
 0x259   :  { %6271 = vmatpush1.bf16.msk.msra.mxu1 %vm6270_vm0, %v7227_v18  ;;  %6399 = vmatpush1.bf16.msk.msra.mxu0 %vm6270_vm0, %v7227_v18  ;;  %v860_v3 = vld [vmem:[#allocation4 + $0x4f0] sm:$0xff] }
 0x25a   :  { %3063 = vmatprep.subr.bf16.mxu1 %v7226_v1  ;;  %5211 = vmatprep.subr.bf16.mxu0 %v7226_v1  ;;  %v864_v41 = vld [vmem:[#allocation4 + $0x510] sm:$0xff] }
 0x25b   :  { %v868_v42 = vld [vmem:[#allocation4 + $0x530] sm:$0xff] }
 0x25c   :  { %v1096_v19 = vld [vmem:[#allocation7 + $0x550] sm:$0xff] }
 0x25d   :  { %6273 = vmatpush1.bf16.msk.msra.mxu1 %vm6272_vm3, %v7227_v18  ;;  %6401 = vmatpush1.bf16.msk.msra.mxu0 %vm6272_vm3, %v7227_v18  ;;  %v1100_v20 = vld [vmem:[#allocation7 + $0x570] sm:$0xff] }
 0x25e   :  { %3065 = vmatprep.subr.bf16.mxu1 %v7226_v1  ;;  %5213 = vmatprep.subr.bf16.mxu0 %v7226_v1  ;;  %v872_v46 = vld [vmem:[#allocation4 + $0x550] sm:$0xff] }
 0x25f   :  { %2865 = vmatmul.mubr.bf16.gmra.mrb[24].mxu1 %v5758_v62  ;;  %5013 = vmatmul.mubr.bf16.gmra.mrb[24].mxu0 %v5982_v63  ;;  %v6046_v63 = vcombine.low %v816_v51, %v820_v52  ;;  %v876_v47 = vld [vmem:[#allocation4 + $0x570] sm:$0xff] }
 0x260   :  { %2872 = vmatprep.mubr.bf16.mxu1 %v5767_v32  ;;  %5020 = vmatprep.mubr.bf16.mxu0 %v5991_v0  ;;  %v5831_v32 = vcombine.high %v1048_v57, %v1052_v58  ;;  %v6055_v0 = vcombine.high %v824_v59, %v828_v61  ;;  %v880_v51 = vld [vmem:[#allocation4 + $0x590] sm:$0xff] }
 0x261   :  { %6275 = vmatpush1.bf16.msk.msra.mxu1 %vm6274_vm6, %v7227_v18  ;;  %6403 = vmatpush1.bf16.msk.msra.mxu0 %vm6274_vm6, %v7227_v18  ;;  %v884_v52 = vld [vmem:[#allocation4 + $0x5b0] sm:$0xff] }
 0x262   :  { %3067 = vmatprep.subr.bf16.mxu1 %v7226_v1  ;;  %5215 = vmatprep.subr.bf16.mxu0 %v7226_v1 }
 0x265   :  { %6277 = vmatpush1.bf16.msk.msra.mxu1 %vm6276_vm9, %v7227_v18  ;;  %6405 = vmatpush1.bf16.msk.msra.mxu0 %vm6276_vm9, %v7227_v18 }
 0x266   :  { %3069 = vmatprep.subr.bf16.mxu1 %v7226_v1  ;;  %5217 = vmatprep.subr.bf16.mxu0 %v7226_v1 }
 0x267   :  { %2873 = vmatmul.mubr.bf16.gmra.mrb[28].mxu1 %v5766_v27  ;;  %5021 = vmatmul.mubr.bf16.gmra.mrb[28].mxu0 %v5990_v23  ;;  %v5830_v27 = vcombine.low %v1048_v57, %v1052_v58  ;;  %v6054_v23 = vcombine.low %v824_v59, %v828_v61  ;;  %v1112_v57 = vld [vmem:[#allocation7 + $0x5d0] sm:$0xff] }
 0x268   :  { %2880 = vmatprep.mubr.bf16.mxu1 %v5775_v10  ;;  %5028 = vmatprep.mubr.bf16.mxu0 %v5999_v12  ;;  %v5839_v10 = vcombine.high %v1056_v8, %v1060_v2  ;;  %v6063_v12 = vcombine.high %v832_v4, %v836_v9  ;;  %v1116_v58 = vld [vmem:[#allocation7 + $0x5f0] sm:$0xff] }
 0x269   :  { %6279 = vmatpush1.bf16.msk.msra.mxu1 %vm6278_vm12, %v7227_v18  ;;  %6407 = vmatpush1.bf16.msk.msra.mxu0 %vm6278_vm12, %v7227_v18  ;;  %v888_v59 = vld [vmem:[#allocation4 + $0x5d0] sm:$0xff] }
 0x26a   :  { %3071 = vmatprep.subr.bf16.mxu1 %v7226_v1  ;;  %5219 = vmatprep.subr.bf16.mxu0 %v7226_v1  ;;  %v1024_v1 = vld [vmem:[#allocation7 + $0x310] sm:$0xff] }
 0x26b   :  { %v5807_v44 = vcombine.high %v1024_v1, %v1028_v39  ;;  %v5806_v60 = vcombine.low %v1024_v1, %v1028_v39  ;;  %v1088_v1 = vld [vmem:[#allocation7 + $0x510] sm:$0xff] }
 0x26c   :  { %v1092_v39 = vld [vmem:[#allocation7 + $0x530] sm:$0xff] }
 0x26d   :  { %6281 = vmatpush1.bf16.msk.msra.mxu1 %vm6280_vm15, %v7227_v18  ;;  %6409 = vmatpush1.bf16.msk.msra.mxu0 %vm6280_vm15, %v7227_v18  ;;  %v1040_v18 = vld [vmem:[#allocation7 + $0x390] sm:$0xff] }
 0x26e   :  { %v5823_v55 = vcombine.high %v1040_v18, %v1044_v50  ;;  %v5822_v62 = vcombine.low %v1040_v18, %v1044_v50  ;;  %v1104_v18 = vld [vmem:[#allocation7 + $0x590] sm:$0xff] }
 0x26f   :  { %2881 = vmatmul.mubr.bf16.gmra.mrb[32].mxu1 %v5774_v17  ;;  %5029 = vmatmul.mubr.bf16.gmra.mrb[32].mxu0 %v5998_v22  ;;  %v5838_v17 = vcombine.low %v1056_v8, %v1060_v2  ;;  %v6062_v22 = vcombine.low %v832_v4, %v836_v9  ;;  %v1108_v50 = vld [vmem:[#allocation7 + $0x5b0] sm:$0xff] }
 0x270   :  { %2888 = vmatprep.mubr.bf16.mxu1 %v5783_v24  ;;  %5036 = vmatprep.mubr.bf16.mxu0 %v6007_v26  ;;  %v5847_v24 = vcombine.high %v1064_v5, %v1068_v6  ;;  %v6071_v26 = vcombine.high %v840_v13, %v844_v15  ;;  %v892_v61 = vld [vmem:[#allocation4 + $0x5f0] sm:$0xff] }
 0x271   :  { %v1120_v8 = vld [vmem:[#allocation7 + $0x610] sm:$0xff] }
 0x272   :  { %v1124_v2 = vld [vmem:[#allocation7 + $0x630] sm:$0xff] }
 0x273   :  { %v896_v4 = vld [vmem:[#allocation4 + $0x610] sm:$0xff] }
 0x274   :  { %v900_v9 = vld [vmem:[#allocation4 + $0x630] sm:$0xff] }
 0x277   :  { %2889 = vmatmul.mubr.bf16.gmra.mrb[36].mxu1 %v5782_v33  ;;  %5037 = vmatmul.mubr.bf16.gmra.mrb[36].mxu0 %v6006_v11  ;;  %v5846_v33 = vcombine.low %v1064_v5, %v1068_v6  ;;  %v6070_v11 = vcombine.low %v840_v13, %v844_v15  ;;  %v1128_v5 = vld [vmem:[#allocation7 + $0x650] sm:$0xff] }
 0x278   :  { %2896 = vmatprep.mubr.bf16.mxu1 %v5791_v40  ;;  %5044 = vmatprep.mubr.bf16.mxu0 %v6015_v16  ;;  %v5855_v40 = vcombine.high %v1072_v28, %v1076_v29  ;;  %v6079_v16 = vcombine.high %v848_v30, %v852_v31  ;;  %v1132_v6 = vld [vmem:[#allocation7 + $0x670] sm:$0xff] }
 0x279   :  { %v904_v13 = vld [vmem:[#allocation4 + $0x650] sm:$0xff] }
 0x27a   :  { %v908_v15 = vld [vmem:[#allocation4 + $0x670] sm:$0xff] }
 0x27f   :  { %2897 = vmatmul.mubr.bf16.gmra.mrb[40].mxu1 %v5790_v25  ;;  %5045 = vmatmul.mubr.bf16.gmra.mrb[40].mxu0 %v6014_v36  ;;  %v5854_v25 = vcombine.low %v1072_v28, %v1076_v29  ;;  %v6078_v36 = vcombine.low %v848_v30, %v852_v31  ;;  %v1136_v28 = vld [vmem:[#allocation7 + $0x690] sm:$0xff] }
 0x280   :  { %2904 = vmatprep.mubr.bf16.mxu1 %v5799_v37  ;;  %5052 = vmatprep.mubr.bf16.mxu0 %v6023_v38  ;;  %v5863_v37 = vcombine.high %v1080_v14, %v1084_v34  ;;  %v6087_v38 = vcombine.high %v856_v35, %v860_v3  ;;  %v1140_v29 = vld [vmem:[#allocation7 + $0x6b0] sm:$0xff] }
 0x281   :  { %v912_v30 = vld [vmem:[#allocation4 + $0x690] sm:$0xff] }
 0x282   :  { %v916_v31 = vld [vmem:[#allocation4 + $0x6b0] sm:$0xff] }
 0x287   :  { %2905 = vmatmul.mubr.bf16.gmra.mrb[44].mxu1 %v5798_v7  ;;  %5053 = vmatmul.mubr.bf16.gmra.mrb[44].mxu0 %v6022_v43  ;;  %v5862_v7 = vcombine.low %v1080_v14, %v1084_v34  ;;  %v6086_v43 = vcombine.low %v856_v35, %v860_v3  ;;  %v1144_v14 = vld [vmem:[#allocation7 + $0x6d0] sm:$0xff] }
 0x288   :  { %2912 = vmatprep.mubr.bf16.mxu1 %v5807_v44  ;;  %5060 = vmatprep.mubr.bf16.mxu0 %v6031_v45  ;;  %v5871_v44 = vcombine.high %v1088_v1, %v1092_v39  ;;  %v6095_v45 = vcombine.high %v864_v41, %v868_v42  ;;  %v1148_v34 = vld [vmem:[#allocation7 + $0x6f0] sm:$0xff] }
 0x289   :  { %v920_v35 = vld [vmem:[#allocation4 + $0x6d0] sm:$0xff] }
 0x28a   :  { %v924_v3 = vld [vmem:[#allocation4 + $0x6f0] sm:$0xff] }
 0x28f   :  { %2913 = vmatmul.mubr.bf16.gmra.mrb[48].mxu1 %v5806_v60  ;;  %5061 = vmatmul.mubr.bf16.gmra.mrb[48].mxu0 %v6030_v48  ;;  %v5870_v60 = vcombine.low %v1088_v1, %v1092_v39  ;;  %v6094_v48 = vcombine.low %v864_v41, %v868_v42  ;;  %v929_v1 = vld [vmem:[#allocation7 + $0x18] sm:$0xff] }
 0x290   :  { %2920 = vmatprep.mubr.bf16.mxu1 %v5815_v49  ;;  %5068 = vmatprep.mubr.bf16.mxu0 %v6039_v21  ;;  %v5879_v49 = vcombine.high %v1096_v19, %v1100_v20  ;;  %v6103_v21 = vcombine.high %v872_v46, %v876_v47  ;;  %v933_v39 = vld [vmem:[#allocation7 + $0x38] sm:$0xff] }
 0x291   :  { %v705_v41 = vld [vmem:[#allocation4 + $0x18] sm:$0xff] }
 0x292   :  { %v709_v42 = vld [vmem:[#allocation4 + $0x38] sm:$0xff] }
 0x297   :  { %2921 = vmatmul.mubr.bf16.gmra.mrb[52].mxu1 %v5814_v53  ;;  %5069 = vmatmul.mubr.bf16.gmra.mrb[52].mxu0 %v6038_v54  ;;  %v5878_v53 = vcombine.low %v1096_v19, %v1100_v20  ;;  %v6102_v54 = vcombine.low %v872_v46, %v876_v47  ;;  %v937_v19 = vld [vmem:[#allocation7 + $0x58] sm:$0xff] }
 0x298   :  { %2928 = vmatprep.mubr.bf16.mxu1 %v5823_v55  ;;  %5076 = vmatprep.mubr.bf16.mxu0 %v6047_v56  ;;  %v5887_v55 = vcombine.high %v1104_v18, %v1108_v50  ;;  %v6111_v56 = vcombine.high %v880_v51, %v884_v52  ;;  %v941_v20 = vld [vmem:[#allocation7 + $0x78] sm:$0xff] }
 0x299   :  { %v713_v46 = vld [vmem:[#allocation4 + $0x58] sm:$0xff] }
 0x29a   :  { %v717_v47 = vld [vmem:[#allocation4 + $0x78] sm:$0xff] }
 0x29f   :  { %2929 = vmatmul.mubr.bf16.gmra.mrb[56].mxu1 %v5822_v62  ;;  %5077 = vmatmul.mubr.bf16.gmra.mrb[56].mxu0 %v6046_v63  ;;  %v5886_v62 = vcombine.low %v1104_v18, %v1108_v50  ;;  %v6110_v63 = vcombine.low %v880_v51, %v884_v52  ;;  %v945_v18 = vld [vmem:[#allocation7 + $0x98] sm:$0xff] }
 0x2a0   :  { %2936 = vmatprep.mubr.bf16.mxu1 %v5831_v32  ;;  %5084 = vmatprep.mubr.bf16.mxu0 %v6055_v0  ;;  %v5895_v32 = vcombine.high %v1112_v57, %v1116_v58  ;;  %v6119_v0 = vcombine.high %v888_v59, %v892_v61  ;;  %v949_v50 = vld [vmem:[#allocation7 + $0xb8] sm:$0xff] }
 0x2a1   :  { %v721_v51 = vld [vmem:[#allocation4 + $0x98] sm:$0xff] }
 0x2a2   :  { %v725_v52 = vld [vmem:[#allocation4 + $0xb8] sm:$0xff] }
 0x2a7   :  { %2937 = vmatmul.mubr.bf16.gmra.mrb[60].mxu1 %v5830_v27  ;;  %5085 = vmatmul.mubr.bf16.gmra.mrb[60].mxu0 %v6054_v23  ;;  %v5894_v27 = vcombine.low %v1112_v57, %v1116_v58  ;;  %v6118_v23 = vcombine.low %v888_v59, %v892_v61  ;;  %v953_v57 = vld [vmem:[#allocation7 + $0xd8] sm:$0xff] }
 0x2a8   :  { %2944 = vmatprep.mubr.bf16.mxu1 %v5839_v10  ;;  %5092 = vmatprep.mubr.bf16.mxu0 %v6063_v12  ;;  %v5903_v10 = vcombine.high %v1120_v8, %v1124_v2  ;;  %v6127_v12 = vcombine.high %v896_v4, %v900_v9  ;;  %v957_v58 = vld [vmem:[#allocation7 + $0xf8] sm:$0xff] }
 0x2a9   :  { %v729_v59 = vld [vmem:[#allocation4 + $0xd8] sm:$0xff] }
 0x2aa   :  { %v733_v61 = vld [vmem:[#allocation4 + $0xf8] sm:$0xff] }
 0x2af   :  { %2945 = vmatmul.mubr.bf16.gmra.mrb[64].mxu1 %v5838_v17  ;;  %5093 = vmatmul.mubr.bf16.gmra.mrb[64].mxu0 %v6062_v22  ;;  %v5902_v17 = vcombine.low %v1120_v8, %v1124_v2  ;;  %v6126_v22 = vcombine.low %v896_v4, %v900_v9  ;;  %v961_v8 = vld [vmem:[#allocation7 + $0x118] sm:$0xff] }
 0x2b0   :  { %2952 = vmatprep.mubr.bf16.mxu1 %v5847_v24  ;;  %5100 = vmatprep.mubr.bf16.mxu0 %v6071_v26  ;;  %v5911_v24 = vcombine.high %v1128_v5, %v1132_v6  ;;  %v6135_v26 = vcombine.high %v904_v13, %v908_v15  ;;  %v965_v2 = vld [vmem:[#allocation7 + $0x138] sm:$0xff] }
 0x2b1   :  { %v737_v4 = vld [vmem:[#allocation4 + $0x118] sm:$0xff] }
 0x2b2   :  { %v741_v9 = vld [vmem:[#allocation4 + $0x138] sm:$0xff] }
 0x2b7   :  { %2953 = vmatmul.mubr.bf16.gmra.mrb[68].mxu1 %v5846_v33  ;;  %5101 = vmatmul.mubr.bf16.gmra.mrb[68].mxu0 %v6070_v11  ;;  %v5910_v33 = vcombine.low %v1128_v5, %v1132_v6  ;;  %v6134_v11 = vcombine.low %v904_v13, %v908_v15  ;;  %v969_v5 = vld [vmem:[#allocation7 + $0x158] sm:$0xff] }
 0x2b8   :  { %2960 = vmatprep.mubr.bf16.mxu1 %v5855_v40  ;;  %5108 = vmatprep.mubr.bf16.mxu0 %v6079_v16  ;;  %v5919_v40 = vcombine.high %v1136_v28, %v1140_v29  ;;  %v6143_v16 = vcombine.high %v912_v30, %v916_v31  ;;  %v973_v6 = vld [vmem:[#allocation7 + $0x178] sm:$0xff] }
 0x2b9   :  { %v745_v13 = vld [vmem:[#allocation4 + $0x158] sm:$0xff] }
 0x2ba   :  { %v749_v15 = vld [vmem:[#allocation4 + $0x178] sm:$0xff] }
 0x2bf   :  { %2961 = vmatmul.mubr.bf16.gmra.mrb[72].mxu1 %v5854_v25  ;;  %5109 = vmatmul.mubr.bf16.gmra.mrb[72].mxu0 %v6078_v36  ;;  %v5918_v25 = vcombine.low %v1136_v28, %v1140_v29  ;;  %v6142_v36 = vcombine.low %v912_v30, %v916_v31  ;;  %v977_v28 = vld [vmem:[#allocation7 + $0x198] sm:$0xff] }
 0x2c0   :  { %2968 = vmatprep.mubr.bf16.mxu1 %v5863_v37  ;;  %5116 = vmatprep.mubr.bf16.mxu0 %v6087_v38  ;;  %v5927_v37 = vcombine.high %v1144_v14, %v1148_v34  ;;  %v6151_v38 = vcombine.high %v920_v35, %v924_v3  ;;  %v981_v29 = vld [vmem:[#allocation7 + $0x1b8] sm:$0xff] }
 0x2c1   :  { %v753_v30 = vld [vmem:[#allocation4 + $0x198] sm:$0xff] }
 0x2c2   :  { %v757_v31 = vld [vmem:[#allocation4 + $0x1b8] sm:$0xff] }
 0x2c7   :  { %2969 = vmatmul.mubr.bf16.gmra.mrb[76].mxu1 %v5862_v7  ;;  %5117 = vmatmul.mubr.bf16.gmra.mrb[76].mxu0 %v6086_v43  ;;  %v5926_v7 = vcombine.low %v1144_v14, %v1148_v34  ;;  %v6150_v43 = vcombine.low %v920_v35, %v924_v3  ;;  %v985_v14 = vld [vmem:[#allocation7 + $0x1d8] sm:$0xff] }
 0x2c8   :  { %2976 = vmatprep.mubr.bf16.mxu1 %v5871_v44  ;;  %5124 = vmatprep.mubr.bf16.mxu0 %v6095_v45  ;;  %v5713_v44 = vcombine.high %v929_v1, %v933_v39  ;;  %v5937_v45 = vcombine.high %v705_v41, %v709_v42  ;;  %v989_v34 = vld [vmem:[#allocation7 + $0x1f8] sm:$0xff] }
 0x2c9   :  { %v761_v35 = vld [vmem:[#allocation4 + $0x1d8] sm:$0xff] }
 0x2ca   :  { %v765_v3 = vld [vmem:[#allocation4 + $0x1f8] sm:$0xff] }
 0x2cf   :  { %2977 = vmatmul.mubr.bf16.gmra.mrb[80].mxu1 %v5870_v60  ;;  %5125 = vmatmul.mubr.bf16.gmra.mrb[80].mxu0 %v6094_v48  ;;  %v5712_v60 = vcombine.low %v929_v1, %v933_v39  ;;  %v5936_v48 = vcombine.low %v705_v41, %v709_v42  ;;  %v993_v1 = vld [vmem:[#allocation7 + $0x218] sm:$0xff] }
 0x2d0   :  { %2984 = vmatprep.mubr.bf16.mxu1 %v5879_v49  ;;  %5132 = vmatprep.mubr.bf16.mxu0 %v6103_v21  ;;  %v5721_v49 = vcombine.high %v937_v19, %v941_v20  ;;  %v5945_v21 = vcombine.high %v713_v46, %v717_v47  ;;  %v997_v39 = vld [vmem:[#allocation7 + $0x238] sm:$0xff] }
 0x2d1   :  { %v769_v41 = vld [vmem:[#allocation4 + $0x218] sm:$0xff] }
 0x2d2   :  { %v773_v42 = vld [vmem:[#allocation4 + $0x238] sm:$0xff] }
 0x2d7   :  { %2985 = vmatmul.mubr.bf16.gmra.mrb[84].mxu1 %v5878_v53  ;;  %5133 = vmatmul.mubr.bf16.gmra.mrb[84].mxu0 %v6102_v54  ;;  %v5720_v53 = vcombine.low %v937_v19, %v941_v20  ;;  %v5944_v54 = vcombine.low %v713_v46, %v717_v47  ;;  %v1001_v19 = vld [vmem:[#allocation7 + $0x258] sm:$0xff] }
 0x2d8   :  { %2992 = vmatprep.mubr.bf16.mxu1 %v5887_v55  ;;  %5140 = vmatprep.mubr.bf16.mxu0 %v6111_v56  ;;  %v5729_v55 = vcombine.high %v945_v18, %v949_v50  ;;  %v5953_v56 = vcombine.high %v721_v51, %v725_v52  ;;  %v1005_v20 = vld [vmem:[#allocation7 + $0x278] sm:$0xff] }
 0x2d9   :  { %v777_v46 = vld [vmem:[#allocation4 + $0x258] sm:$0xff] }
 0x2da   :  { %v781_v47 = vld [vmem:[#allocation4 + $0x278] sm:$0xff] }
 0x2df   :  { %2993 = vmatmul.mubr.bf16.gmra.mrb[88].mxu1 %v5886_v62  ;;  %5141 = vmatmul.mubr.bf16.gmra.mrb[88].mxu0 %v6110_v63  ;;  %v5728_v62 = vcombine.low %v945_v18, %v949_v50  ;;  %v5952_v63 = vcombine.low %v721_v51, %v725_v52  ;;  %v1009_v18 = vld [vmem:[#allocation7 + $0x298] sm:$0xff] }
 0x2e0   :  { %3000 = vmatprep.mubr.bf16.mxu1 %v5895_v32  ;;  %5148 = vmatprep.mubr.bf16.mxu0 %v6119_v0  ;;  %v5737_v32 = vcombine.high %v953_v57, %v957_v58  ;;  %v5961_v0 = vcombine.high %v729_v59, %v733_v61  ;;  %v1013_v50 = vld [vmem:[#allocation7 + $0x2b8] sm:$0xff] }
 0x2e1   :  { %v785_v51 = vld [vmem:[#allocation4 + $0x298] sm:$0xff] }
 0x2e2   :  { %v789_v52 = vld [vmem:[#allocation4 + $0x2b8] sm:$0xff] }
 0x2e7   :  { %3001 = vmatmul.mubr.bf16.gmra.mrb[92].mxu1 %v5894_v27  ;;  %5149 = vmatmul.mubr.bf16.gmra.mrb[92].mxu0 %v6118_v23  ;;  %v5736_v27 = vcombine.low %v953_v57, %v957_v58  ;;  %v5960_v23 = vcombine.low %v729_v59, %v733_v61  ;;  %v1017_v57 = vld [vmem:[#allocation7 + $0x2d8] sm:$0xff] }
 0x2e8   :  { %3008 = vmatprep.mubr.bf16.mxu1 %v5903_v10  ;;  %5156 = vmatprep.mubr.bf16.mxu0 %v6127_v12  ;;  %v5745_v10 = vcombine.high %v961_v8, %v965_v2  ;;  %v5969_v12 = vcombine.high %v737_v4, %v741_v9  ;;  %v1021_v58 = vld [vmem:[#allocation7 + $0x2f8] sm:$0xff] }
 0x2e9   :  { %v793_v59 = vld [vmem:[#allocation4 + $0x2d8] sm:$0xff] }
 0x2ea   :  { %v797_v61 = vld [vmem:[#allocation4 + $0x2f8] sm:$0xff] }
 0x2ef   :  { %3009 = vmatmul.mubr.bf16.gmra.mrb[96].mxu1 %v5902_v17  ;;  %5157 = vmatmul.mubr.bf16.gmra.mrb[96].mxu0 %v6126_v22  ;;  %v5744_v17 = vcombine.low %v961_v8, %v965_v2  ;;  %v5968_v22 = vcombine.low %v737_v4, %v741_v9  ;;  %v1025_v8 = vld [vmem:[#allocation7 + $0x318] sm:$0xff] }
 0x2f0   :  { %3016 = vmatprep.mubr.bf16.mxu1 %v5911_v24  ;;  %5164 = vmatprep.mubr.bf16.mxu0 %v6135_v26  ;;  %v5753_v24 = vcombine.high %v969_v5, %v973_v6  ;;  %v5977_v26 = vcombine.high %v745_v13, %v749_v15  ;;  %v1029_v2 = vld [vmem:[#allocation7 + $0x338] sm:$0xff] }
 0x2f1   :  { %v801_v4 = vld [vmem:[#allocation4 + $0x318] sm:$0xff] }
 0x2f2   :  { %v805_v9 = vld [vmem:[#allocation4 + $0x338] sm:$0xff] }
 0x2f7   :  { %3017 = vmatmul.mubr.bf16.gmra.mrb[100].mxu1 %v5910_v33  ;;  %5165 = vmatmul.mubr.bf16.gmra.mrb[100].mxu0 %v6134_v11  ;;  %v5752_v33 = vcombine.low %v969_v5, %v973_v6  ;;  %v5976_v11 = vcombine.low %v745_v13, %v749_v15  ;;  %v1033_v5 = vld [vmem:[#allocation7 + $0x358] sm:$0xff] }
 0x2f8   :  { %3024 = vmatprep.mubr.bf16.mxu1 %v5919_v40  ;;  %5172 = vmatprep.mubr.bf16.mxu0 %v6143_v16  ;;  %v5761_v40 = vcombine.high %v977_v28, %v981_v29  ;;  %v5985_v16 = vcombine.high %v753_v30, %v757_v31  ;;  %v1037_v6 = vld [vmem:[#allocation7 + $0x378] sm:$0xff] }
 0x2f9   :  { %v809_v13 = vld [vmem:[#allocation4 + $0x358] sm:$0xff] }
 0x2fa   :  { %v813_v15 = vld [vmem:[#allocation4 + $0x378] sm:$0xff] }
 0x2ff   :  { %3025 = vmatmul.mubr.bf16.gmra.mrb[104].mxu1 %v5918_v25  ;;  %5173 = vmatmul.mubr.bf16.gmra.mrb[104].mxu0 %v6142_v36  ;;  %v5760_v25 = vcombine.low %v977_v28, %v981_v29  ;;  %v5984_v36 = vcombine.low %v753_v30, %v757_v31  ;;  %v1041_v28 = vld [vmem:[#allocation7 + $0x398] sm:$0xff] }
 0x300   :  { %3032 = vmatprep.mubr.bf16.mxu1 %v5927_v37  ;;  %5180 = vmatprep.mubr.bf16.mxu0 %v6151_v38  ;;  %v5769_v37 = vcombine.high %v985_v14, %v989_v34  ;;  %v5993_v38 = vcombine.high %v761_v35, %v765_v3  ;;  %v1045_v29 = vld [vmem:[#allocation7 + $0x3b8] sm:$0xff] }
 0x301   :  { %v817_v30 = vld [vmem:[#allocation4 + $0x398] sm:$0xff] }
 0x302   :  { %v821_v31 = vld [vmem:[#allocation4 + $0x3b8] sm:$0xff] }
 0x307   :  { %3033 = vmatmul.mubr.bf16.gmra.mrb[108].mxu1 %v5926_v7  ;;  %5181 = vmatmul.mubr.bf16.gmra.mrb[108].mxu0 %v6150_v43  ;;  %v5768_v7 = vcombine.low %v985_v14, %v989_v34  ;;  %v5992_v43 = vcombine.low %v761_v35, %v765_v3  ;;  %v1049_v14 = vld [vmem:[#allocation7 + $0x3d8] sm:$0xff] }
 0x308   :  { %3073 = vmatprep.mubr.bf16.mxu1 %v5713_v44  ;;  %5221 = vmatprep.mubr.bf16.mxu0 %v5937_v45  ;;  %v5777_v44 = vcombine.high %v993_v1, %v997_v39  ;;  %v6001_v45 = vcombine.high %v769_v41, %v773_v42  ;;  %v1053_v34 = vld [vmem:[#allocation7 + $0x3f8] sm:$0xff] }
 0x309   :  { %v825_v35 = vld [vmem:[#allocation4 + $0x3d8] sm:$0xff] }
 0x30a   :  { %v829_v3 = vld [vmem:[#allocation4 + $0x3f8] sm:$0xff] }
 0x30f   :  { %3074 = vmatmul.mubr.bf16.vlgmr.msra.gmra.mrb[0].mxu1 %v5712_v60  ;;  %5222 = vmatmul.mubr.bf16.vlgmr.msra.gmra.mrb[0].mxu0 %v5936_v48  ;;  %v5776_v60 = vcombine.low %v993_v1, %v997_v39  ;;  %v6000_v48 = vcombine.low %v769_v41, %v773_v42  ;;  %v1057_v1 = vld [vmem:[#allocation7 + $0x418] sm:$0xff] }
 0x310   :  { %3081 = vmatprep.mubr.bf16.mxu1 %v5721_v49  ;;  %5229 = vmatprep.mubr.bf16.mxu0 %v5945_v21  ;;  %v5785_v49 = vcombine.high %v1001_v19, %v1005_v20  ;;  %v6009_v21 = vcombine.high %v777_v46, %v781_v47  ;;  %v1061_v39 = vld [vmem:[#allocation7 + $0x438] sm:$0xff] }
 0x311   :  { %v833_v41 = vld [vmem:[#allocation4 + $0x418] sm:$0xff] }
 0x312   :  { %v837_v42 = vld [vmem:[#allocation4 + $0x438] sm:$0xff] }
 0x317   :  { %3082 = vmatmul.mubr.bf16.gmra.mrb[4].mxu1 %v5720_v53  ;;  %5230 = vmatmul.mubr.bf16.gmra.mrb[4].mxu0 %v5944_v54  ;;  %v5784_v53 = vcombine.low %v1001_v19, %v1005_v20  ;;  %v6008_v54 = vcombine.low %v777_v46, %v781_v47  ;;  %v1065_v19 = vld [vmem:[#allocation7 + $0x458] sm:$0xff] }
 0x318   :  { %3089 = vmatprep.mubr.bf16.mxu1 %v5729_v55  ;;  %5237 = vmatprep.mubr.bf16.mxu0 %v5953_v56  ;;  %v5793_v55 = vcombine.high %v1009_v18, %v1013_v50  ;;  %v6017_v56 = vcombine.high %v785_v51, %v789_v52  ;;  %v1069_v20 = vld [vmem:[#allocation7 + $0x478] sm:$0xff] }
 0x319   :  { %v841_v46 = vld [vmem:[#allocation4 + $0x458] sm:$0xff] }
 0x31a   :  { %v845_v47 = vld [vmem:[#allocation4 + $0x478] sm:$0xff] }
 0x31f   :  { %3090 = vmatmul.mubr.bf16.gmra.mrb[8].mxu1 %v5728_v62  ;;  %5238 = vmatmul.mubr.bf16.gmra.mrb[8].mxu0 %v5952_v63  ;;  %v5792_v62 = vcombine.low %v1009_v18, %v1013_v50  ;;  %v6016_v63 = vcombine.low %v785_v51, %v789_v52  ;;  %v1073_v18 = vld [vmem:[#allocation7 + $0x498] sm:$0xff] }
 0x320   :  { %3097 = vmatprep.mubr.bf16.mxu1 %v5737_v32  ;;  %5245 = vmatprep.mubr.bf16.mxu0 %v5961_v0  ;;  %v5801_v32 = vcombine.high %v1017_v57, %v1021_v58  ;;  %v6025_v0 = vcombine.high %v793_v59, %v797_v61  ;;  %v1077_v50 = vld [vmem:[#allocation7 + $0x4b8] sm:$0xff] }
 0x321   :  { %v849_v51 = vld [vmem:[#allocation4 + $0x498] sm:$0xff] }
 0x322   :  { %v853_v52 = vld [vmem:[#allocation4 + $0x4b8] sm:$0xff] }
 0x327   :  { %3098 = vmatmul.mubr.bf16.gmra.mrb[12].mxu1 %v5736_v27  ;;  %5246 = vmatmul.mubr.bf16.gmra.mrb[12].mxu0 %v5960_v23  ;;  %v5800_v27 = vcombine.low %v1017_v57, %v1021_v58  ;;  %v6024_v23 = vcombine.low %v793_v59, %v797_v61  ;;  %v1081_v57 = vld [vmem:[#allocation7 + $0x4d8] sm:$0xff] }
 0x328   :  { %3105 = vmatprep.mubr.bf16.mxu1 %v5745_v10  ;;  %5253 = vmatprep.mubr.bf16.mxu0 %v5969_v12  ;;  %v5809_v10 = vcombine.high %v1025_v8, %v1029_v2  ;;  %v6033_v12 = vcombine.high %v801_v4, %v805_v9  ;;  %v1085_v58 = vld [vmem:[#allocation7 + $0x4f8] sm:$0xff] }
 0x329   :  { %v857_v59 = vld [vmem:[#allocation4 + $0x4d8] sm:$0xff] }
 0x32a   :  { %v861_v61 = vld [vmem:[#allocation4 + $0x4f8] sm:$0xff] }
 0x32f   :  { %3106 = vmatmul.mubr.bf16.gmra.mrb[16].mxu1 %v5744_v17  ;;  %5254 = vmatmul.mubr.bf16.gmra.mrb[16].mxu0 %v5968_v22  ;;  %v5808_v17 = vcombine.low %v1025_v8, %v1029_v2  ;;  %v6032_v22 = vcombine.low %v801_v4, %v805_v9  ;;  %v1089_v8 = vld [vmem:[#allocation7 + $0x518] sm:$0xff] }
 0x330   :  { %3113 = vmatprep.mubr.bf16.mxu1 %v5753_v24  ;;  %5261 = vmatprep.mubr.bf16.mxu0 %v5977_v26  ;;  %v5817_v24 = vcombine.high %v1033_v5, %v1037_v6  ;;  %v6041_v26 = vcombine.high %v809_v13, %v813_v15  ;;  %v1093_v2 = vld [vmem:[#allocation7 + $0x538] sm:$0xff] }
 0x331   :  { %v865_v4 = vld [vmem:[#allocation4 + $0x518] sm:$0xff] }
 0x332   :  { %v869_v9 = vld [vmem:[#allocation4 + $0x538] sm:$0xff] }
 0x337   :  { %3114 = vmatmul.mubr.bf16.gmra.mrb[20].mxu1 %v5752_v33  ;;  %5262 = vmatmul.mubr.bf16.gmra.mrb[20].mxu0 %v5976_v11  ;;  %v5816_v33 = vcombine.low %v1033_v5, %v1037_v6  ;;  %v6040_v11 = vcombine.low %v809_v13, %v813_v15  ;;  %v1097_v5 = vld [vmem:[#allocation7 + $0x558] sm:$0xff] }
 0x338   :  { %3121 = vmatprep.mubr.bf16.mxu1 %v5761_v40  ;;  %5269 = vmatprep.mubr.bf16.mxu0 %v5985_v16  ;;  %v5825_v40 = vcombine.high %v1041_v28, %v1045_v29  ;;  %v6049_v16 = vcombine.high %v817_v30, %v821_v31  ;;  %v1101_v6 = vld [vmem:[#allocation7 + $0x578] sm:$0xff] }
 0x339   :  { %v873_v13 = vld [vmem:[#allocation4 + $0x558] sm:$0xff] }
 0x33a   :  { %v877_v15 = vld [vmem:[#allocation4 + $0x578] sm:$0xff] }
 0x33f   :  { %3122 = vmatmul.mubr.bf16.gmra.mrb[24].mxu1 %v5760_v25  ;;  %5270 = vmatmul.mubr.bf16.gmra.mrb[24].mxu0 %v5984_v36  ;;  %v5824_v25 = vcombine.low %v1041_v28, %v1045_v29  ;;  %v6048_v36 = vcombine.low %v817_v30, %v821_v31  ;;  %v1105_v28 = vld [vmem:[#allocation7 + $0x598] sm:$0xff] }
 0x340   :  { %3129 = vmatprep.mubr.bf16.mxu1 %v5769_v37  ;;  %5277 = vmatprep.mubr.bf16.mxu0 %v5993_v38  ;;  %v5833_v37 = vcombine.high %v1049_v14, %v1053_v34  ;;  %v6057_v38 = vcombine.high %v825_v35, %v829_v3  ;;  %v1109_v29 = vld [vmem:[#allocation7 + $0x5b8] sm:$0xff] }
 0x341   :  { %v881_v30 = vld [vmem:[#allocation4 + $0x598] sm:$0xff] }
 0x342   :  { %v885_v31 = vld [vmem:[#allocation4 + $0x5b8] sm:$0xff] }
 0x347   :  { %3130 = vmatmul.mubr.bf16.gmra.mrb[28].mxu1 %v5768_v7  ;;  %5278 = vmatmul.mubr.bf16.gmra.mrb[28].mxu0 %v5992_v43  ;;  %v5832_v7 = vcombine.low %v1049_v14, %v1053_v34  ;;  %v6056_v43 = vcombine.low %v825_v35, %v829_v3  ;;  %v5528_v14 = vld [vmem:[%s7892_s3] sm:$0xff]  ;;  %v5529_v34 = vld [vmem:[%s7892_s3 + $0x8] sm:$0xff]  ;;  %v5530_v35 = vld [vmem:[%s7892_s3 + $0x10] sm:$0xff] }
 0x348   :  { %3137 = vmatprep.mubr.bf16.mxu1 %v5777_v44  ;;  %5285 = vmatprep.mubr.bf16.mxu0 %v6001_v45  ;;  %v5841_v44 = vcombine.high %v1057_v1, %v1061_v39  ;;  %v6065_v45 = vcombine.high %v833_v41, %v837_v42  ;;  %v1113_v3 = vld [vmem:[#allocation7 + $0x5d8] sm:$0xff] }
 0x349   :  { %5534 = vperm.xlu0 %7147, %v5528_v14   ;;  %5544 = vperm.xlu1 %7148, %v5530_v35  }
 0x34d   :  { %5539 = vperm.xlu0 %7147, %v5529_v34  }
 0x34f   :  { %3138 = vmatmul.mubr.bf16.gmra.mrb[32].mxu1 %v5776_v60  ;;  %5286 = vmatmul.mubr.bf16.gmra.mrb[32].mxu0 %v6000_v48  ;;  %v5840_v60 = vcombine.low %v1057_v1, %v1061_v39  ;;  %v6064_v48 = vcombine.low %v833_v41, %v837_v42  ;;  %v6112_v1 = vcombine.low %v881_v30, %v885_v31  ;;  %v5531_v42 = vld [vmem:[%s7892_s3 + $0x18] sm:$0xff]  ;;  %s7228_s3 = smov [#allocation9]  }
 0x350   :  { %3145 = vmatprep.mubr.bf16.mxu1 %v5785_v49  ;;  %5293 = vmatprep.mubr.bf16.mxu0 %v6009_v21  ;;  %v5849_v49 = vcombine.high %v1065_v19, %v1069_v20  ;;  %v6073_v21 = vcombine.high %v841_v46, %v845_v47  ;;  %s5565_s26 = sshll.u32 %s7228_s3, 4  ;;  %s5566_s26 = int_to_ptr.vmem [resolvable:$true] %s5565_s26 }
 0x351   :  { %5549 = vperm.xlu1 %7148, %v5531_v42   ;;  %s7194_s27 = scalar_lea.vmem %s5566_s26, 512  ;;  %p7199_p3 = scmp.lt.s32.totalorder %s5566_s26, %s5566_s26 }
 0x352   :  { %p7195_p2 = scmp.ne.s32.totalorder %s5566_s26, %s7194_s27  ;;  %p7200_p4 = scmp.lt.s32.totalorder %s7194_s27, %s7194_s27 }
 0x354   :  { %p7201_p5 = por %p7200_p4, %p7199_p3 }
 0x356   :  { %p7202_p6 = pnand %p7201_p5, %p7195_p2 }
 0x357   :  { %3146 = vmatmul.mubr.bf16.gmra.mrb[36].mxu1 %v5784_v53  ;;  %5294 = vmatmul.mubr.bf16.gmra.mrb[36].mxu0 %v6008_v54  ;;  %v5848_v53 = vcombine.low %v1065_v19, %v1069_v20  ;;  %v6072_v54 = vcombine.low %v841_v46, %v845_v47 }
 0x358   :  { %3153 = vmatprep.mubr.bf16.mxu1 %v5793_v55  ;;  %5301 = vmatprep.mubr.bf16.mxu0 %v6017_v56  ;;  %v5857_v55 = vcombine.high %v1073_v18, %v1077_v50  ;;  %v6081_v56 = vcombine.high %v849_v51, %v853_v52 }
 0x35f   :  { %3154 = vmatmul.mubr.bf16.gmra.mrb[40].mxu1 %v5792_v62  ;;  %5302 = vmatmul.mubr.bf16.gmra.mrb[40].mxu0 %v6016_v63  ;;  %v5856_v62 = vcombine.low %v1073_v18, %v1077_v50  ;;  %v6080_v63 = vcombine.low %v849_v51, %v853_v52 }
 0x360   :  { %3161 = vmatprep.mubr.bf16.mxu1 %v5801_v32  ;;  %5309 = vmatprep.mubr.bf16.mxu0 %v6025_v0  ;;  %v5865_v32 = vcombine.high %v1081_v57, %v1085_v58  ;;  %v6089_v0 = vcombine.high %v857_v59, %v861_v61 }
 0x367   :  { %3162 = vmatmul.mubr.bf16.gmra.mrb[44].mxu1 %v5800_v27  ;;  %5310 = vmatmul.mubr.bf16.gmra.mrb[44].mxu0 %v6024_v23  ;;  %v5864_v27 = vcombine.low %v1081_v57, %v1085_v58  ;;  %v6088_v23 = vcombine.low %v857_v59, %v861_v61 }
 0x368   :  { %3169 = vmatprep.mubr.bf16.mxu1 %v5809_v10  ;;  %5317 = vmatprep.mubr.bf16.mxu0 %v6033_v12  ;;  %v5873_v10 = vcombine.high %v1089_v8, %v1093_v2  ;;  %v6097_v12 = vcombine.high %v865_v4, %v869_v9 }
 0x36f   :  { %3170 = vmatmul.mubr.bf16.gmra.mrb[48].mxu1 %v5808_v17  ;;  %5318 = vmatmul.mubr.bf16.gmra.mrb[48].mxu0 %v6032_v22  ;;  %v5872_v17 = vcombine.low %v1089_v8, %v1093_v2  ;;  %v6096_v22 = vcombine.low %v865_v4, %v869_v9 }
 0x370   :  { %3177 = vmatprep.mubr.bf16.mxu1 %v5817_v24  ;;  %5325 = vmatprep.mubr.bf16.mxu0 %v6041_v26  ;;  %v5881_v24 = vcombine.high %v1097_v5, %v1101_v6  ;;  %v6105_v26 = vcombine.high %v873_v13, %v877_v15 }
 0x377   :  { %3178 = vmatmul.mubr.bf16.gmra.mrb[52].mxu1 %v5816_v33  ;;  %5326 = vmatmul.mubr.bf16.gmra.mrb[52].mxu0 %v6040_v11  ;;  %v5880_v33 = vcombine.low %v1097_v5, %v1101_v6  ;;  %v6104_v11 = vcombine.low %v873_v13, %v877_v15 }
 0x378   :  { %3185 = vmatprep.mubr.bf16.mxu1 %v5825_v40  ;;  %5333 = vmatprep.mubr.bf16.mxu0 %v6049_v16  ;;  %v5889_v40 = vcombine.high %v1105_v28, %v1109_v29  ;;  %v6113_v16 = vcombine.high %v881_v30, %v885_v31 }
 0x37f   :  { %3186 = vmatmul.mubr.bf16.gmra.mrb[56].mxu1 %v5824_v25  ;;  %5334 = vmatmul.mubr.bf16.gmra.mrb[56].mxu0 %v6048_v36  ;;  %v1117_v25 = vld [vmem:[#allocation7 + $0x5f8] sm:$0xff] }
 0x380   :  { %3193 = vmatprep.mubr.bf16.mxu1 %v5833_v37  ;;  %5341 = vmatprep.mubr.bf16.mxu0 %v6057_v38  ;;  %v889_v36 = vld [vmem:[#allocation4 + $0x5d8] sm:$0xff]  ;;  %v5888_v38 = vcombine.low %v1105_v28, %v1109_v29  ;;  %v5897_v39 = vcombine.high %v1113_v3, %v1117_v25  ;;  %v5896_v19 = vcombine.low %v1113_v3, %v1117_v25 }
 0x381   :  { %v893_v37 = vld [vmem:[#allocation4 + $0x5f8] sm:$0xff] }
 0x382   :  { %v6121_v41 = vcombine.high %v889_v36, %v893_v37  ;;  %v6120_v20 = vcombine.low %v889_v36, %v893_v37 }
 0x387   :  { %3194 = vmatmul.mubr.bf16.gmra.mrb[60].mxu1 %v5832_v7  ;;  %5342 = vmatmul.mubr.bf16.gmra.mrb[60].mxu0 %v6056_v43  ;;  %v1121_v7 = vld [vmem:[#allocation7 + $0x618] sm:$0xff] }
 0x388   :  { %3201 = vmatprep.mubr.bf16.mxu1 %v5841_v44  ;;  %5349 = vmatprep.mubr.bf16.mxu0 %v6065_v45  ;;  %v1125_v43 = vld [vmem:[#allocation7 + $0x638] sm:$0xff] }
 0x389   :  { %v897_v44 = vld [vmem:[#allocation4 + $0x618] sm:$0xff]  ;;  %v5905_v46 = vcombine.high %v1121_v7, %v1125_v43  ;;  %v5904_v18 = vcombine.low %v1121_v7, %v1125_v43 }
 0x38a   :  { %v901_v45 = vld [vmem:[#allocation4 + $0x638] sm:$0xff] }
 0x38b   :  { %v6129_v47 = vcombine.high %v897_v44, %v901_v45  ;;  %v6128_v50 = vcombine.low %v897_v44, %v901_v45 }
 0x38f   :  { %3202 = vmatmul.mubr.bf16.gmra.mrb[64].mxu1 %v5840_v60  ;;  %5350 = vmatmul.mubr.bf16.gmra.mrb[64].mxu0 %v6064_v48  ;;  %v1129_v60 = vld [vmem:[#allocation7 + $0x658] sm:$0xff] }
 0x390   :  { %3209 = vmatprep.mubr.bf16.mxu1 %v5849_v49  ;;  %5357 = vmatprep.mubr.bf16.mxu0 %v6073_v21  ;;  %v1133_v48 = vld [vmem:[#allocation7 + $0x678] sm:$0xff] }
 0x391   :  { %v905_v49 = vld [vmem:[#allocation4 + $0x658] sm:$0xff]  ;;  %v5913_v51 = vcombine.high %v1129_v60, %v1133_v48  ;;  %v5912_v57 = vcombine.low %v1129_v60, %v1133_v48 }
 0x392   :  { %v909_v21 = vld [vmem:[#allocation4 + $0x678] sm:$0xff] }
 0x393   :  { %v6137_v52 = vcombine.high %v905_v49, %v909_v21  ;;  %v6136_v58 = vcombine.low %v905_v49, %v909_v21 }
 0x397   :  { %3210 = vmatmul.mubr.bf16.gmra.mrb[68].mxu1 %v5848_v53  ;;  %5358 = vmatmul.mubr.bf16.gmra.mrb[68].mxu0 %v6072_v54  ;;  %v1137_v53 = vld [vmem:[#allocation7 + $0x698] sm:$0xff] }
 0x398   :  { %3217 = vmatprep.mubr.bf16.mxu1 %v5857_v55  ;;  %5365 = vmatprep.mubr.bf16.mxu0 %v6081_v56  ;;  %v1141_v54 = vld [vmem:[#allocation7 + $0x6b8] sm:$0xff] }
 0x399   :  { %v913_v55 = vld [vmem:[#allocation4 + $0x698] sm:$0xff]  ;;  %v5921_v59 = vcombine.high %v1137_v53, %v1141_v54  ;;  %v5920_v8 = vcombine.low %v1137_v53, %v1141_v54 }
 0x39a   :  { %v917_v56 = vld [vmem:[#allocation4 + $0x6b8] sm:$0xff] }
 0x39b   :  { %v6145_v61 = vcombine.high %v913_v55, %v917_v56  ;;  %v6144_v2 = vcombine.low %v913_v55, %v917_v56 }
 0x39f   :  { %3218 = vmatmul.mubr.bf16.gmra.mrb[72].mxu1 %v5856_v62  ;;  %5366 = vmatmul.mubr.bf16.gmra.mrb[72].mxu0 %v6080_v63  ;;  %v1145_v62 = vld [vmem:[#allocation7 + $0x6d8] sm:$0xff] }
 0x3a0   :  { %3225 = vmatprep.mubr.bf16.mxu1 %v5865_v32  ;;  %5373 = vmatprep.mubr.bf16.mxu0 %v6089_v0  ;;  %v1149_v63 = vld [vmem:[#allocation7 + $0x6f8] sm:$0xff] }
 0x3a1   :  { %v921_v32 = vld [vmem:[#allocation4 + $0x6d8] sm:$0xff]  ;;  %v5929_v4 = vcombine.high %v1145_v62, %v1149_v63  ;;  %v5928_v6 = vcombine.low %v1145_v62, %v1149_v63 }
 0x3a2   :  { %v925_v0 = vld [vmem:[#allocation4 + $0x6f8] sm:$0xff] }
 0x3a3   :  { %v6153_v9 = vcombine.high %v921_v32, %v925_v0  ;;  %v6152_v13 = vcombine.low %v921_v32, %v925_v0 }
 0x3a7   :  { %3226 = vmatmul.mubr.bf16.gmra.mrb[76].mxu1 %v5864_v27  ;;  %5374 = vmatmul.mubr.bf16.gmra.mrb[76].mxu0 %v6088_v23 }
 0x3a8   :  { %3233 = vmatprep.mubr.bf16.mxu1 %v5873_v10  ;;  %5381 = vmatprep.mubr.bf16.mxu0 %v6097_v12 }
 0x3af   :  { %3234 = vmatmul.mubr.bf16.gmra.mrb[80].mxu1 %v5872_v17  ;;  %5382 = vmatmul.mubr.bf16.gmra.mrb[80].mxu0 %v6096_v22 }
 0x3b0   :  { %3241 = vmatprep.mubr.bf16.mxu1 %v5881_v24  ;;  %5389 = vmatprep.mubr.bf16.mxu0 %v6105_v26 }
 0x3b7   :  { %3242 = vmatmul.mubr.bf16.gmra.mrb[84].mxu1 %v5880_v33  ;;  %5390 = vmatmul.mubr.bf16.gmra.mrb[84].mxu0 %v6104_v11 }
 0x3b8   :  { %3249 = vmatprep.mubr.bf16.mxu1 %v5889_v40  ;;  %5397 = vmatprep.mubr.bf16.mxu0 %v6113_v16 }
 0x3bf   :  { %3250 = vmatmul.mubr.bf16.gmra.mrb[88].mxu1 %v5888_v38  ;;  %5398 = vmatmul.mubr.bf16.gmra.mrb[88].mxu0 %v6112_v1 }
 0x3c0   :  { %3257 = vmatprep.mubr.bf16.mxu1 %v5897_v39  ;;  %5405 = vmatprep.mubr.bf16.mxu0 %v6121_v41 }
 0x3c7   :  { %3258 = vmatmul.mubr.bf16.gmra.mrb[92].mxu1 %v5896_v19  ;;  %5406 = vmatmul.mubr.bf16.gmra.mrb[92].mxu0 %v6120_v20 }
 0x3c8   :  { %3265 = vmatprep.mubr.bf16.mxu1 %v5905_v46  ;;  %5413 = vmatprep.mubr.bf16.mxu0 %v6129_v47 }
 0x3cf   :  { %3266 = vmatmul.mubr.bf16.gmra.mrb[96].mxu1 %v5904_v18  ;;  %5414 = vmatmul.mubr.bf16.gmra.mrb[96].mxu0 %v6128_v50 }
 0x3d0   :  { %3273 = vmatprep.mubr.bf16.mxu1 %v5913_v51  ;;  %5421 = vmatprep.mubr.bf16.mxu0 %v6137_v52 }
 0x3d7   :  { %3274 = vmatmul.mubr.bf16.gmra.mrb[100].mxu1 %v5912_v57  ;;  %5422 = vmatmul.mubr.bf16.gmra.mrb[100].mxu0 %v6136_v58 }
 0x3d8   :  { %3281 = vmatprep.mubr.bf16.mxu1 %v5921_v59  ;;  %5429 = vmatprep.mubr.bf16.mxu0 %v6145_v61 }
 0x3df   :  { %3282 = vmatmul.mubr.bf16.gmra.mrb[104].mxu1 %v5920_v8  ;;  %5430 = vmatmul.mubr.bf16.gmra.mrb[104].mxu0 %v6144_v2 }
 0x3e0   :  { %3289 = vmatprep.mubr.bf16.mxu1 %v5929_v4  ;;  %5437 = vmatprep.mubr.bf16.mxu0 %v6153_v9 }
 0x3e2   :  { %v3075_v27 = vpop.f32.mrb[0].mxu1  ;;  %v5223_v23 = vpop.f32.mrb[0].mxu0 }
 0x3e3   :  { %v6410_v10 = vadd.f32 %v5223_v23, %v3075_v27  ;;  %v3077_v12 = vpop.f32.mrb[1].mxu1  ;;  %v5225_v5 = vpop.f32.mrb[1].mxu0 }
 0x3e4   :  { %v3078_v15 = vpop.f32.mrb[2].mxu1  ;;  %v5226_v17 = vpop.f32.mrb[2].mxu0 }
 0x3e5   :  { %v6411_v22 = vadd.f32 %v5226_v17, %v3078_v15  ;;  %v3080_v24 = vpop.f32.mrb[3].mxu1  ;;  %v5228_v26 = vpop.f32.mrb[3].mxu0 }
 0x3e7   :  { %3290 = vmatmul.mubr.bf16.gmra.mrb[108].mxu1 %v5928_v6  ;;  %5438 = vmatmul.mubr.bf16.gmra.mrb[108].mxu0 %v6152_v13 }
 0x3ea   :  { %v3083_v28 = vpop.f32.mrb[4].mxu1  ;;  %v5231_v29 = vpop.f32.mrb[4].mxu0 }
 0x3eb   :  { %v6412_v30 = vadd.f32 %v5231_v29, %v3083_v28  ;;  %v3085_v31 = vpop.f32.mrb[5].mxu1  ;;  %v5233_v33 = vpop.f32.mrb[5].mxu0 }
 0x3ec   :  { %v3086_v11 = vpop.f32.mrb[6].mxu1  ;;  %v5234_v40 = vpop.f32.mrb[6].mxu0 }
 0x3ed   :  { %v6413_v16 = vadd.f32 %v5234_v40, %v3086_v11  ;;  %v3088_v14 = vpop.f32.mrb[7].mxu1  ;;  %v5236_v34 = vpop.f32.mrb[7].mxu0 }
 0x3f2   :  { %v3091_v35 = vpop.f32.mrb[8].mxu1  ;;  %v5239_v3 = vpop.f32.mrb[8].mxu0 }
 0x3f3   :  { %v6414_v25 = vadd.f32 %v5239_v3, %v3091_v35  ;;  %v3093_v36 = vpop.f32.mrb[9].mxu1  ;;  %v5241_v37 = vpop.f32.mrb[9].mxu0 }
 0x3f4   :  { %v3094_v38 = vpop.f32.mrb[10].mxu1  ;;  %v5242_v1 = vpop.f32.mrb[10].mxu0 }
 0x3f5   :  { %v5446_v39 = vmax.f32 %v6410_v10, %v6414_v25  ;;  %v6415_v41 = vadd.f32 %v5242_v1, %v3094_v38  ;;  %v3096_v42 = vpop.f32.mrb[11].mxu1  ;;  %v5244_v7 = vpop.f32.mrb[11].mxu0 }
 0x3f7   :  { %v5447_v43 = vmax.f32 %v6411_v22, %v6415_v41 }
 0x3fa   :  { %v3099_v44 = vpop.f32.mrb[12].mxu1  ;;  %v5247_v45 = vpop.f32.mrb[12].mxu0 }
 0x3fb   :  { %v6416_v19 = vadd.f32 %v5247_v45, %v3099_v44  ;;  %v3101_v20 = vpop.f32.mrb[13].mxu1  ;;  %v5249_v46 = vpop.f32.mrb[13].mxu0 }
 0x3fc   :  { %v3102_v47 = vpop.f32.mrb[14].mxu1  ;;  %v5250_v60 = vpop.f32.mrb[14].mxu0 }
 0x3fd   :  { %v5448_v48 = vmax.f32 %v6412_v30, %v6416_v19  ;;  %v6417_v49 = vadd.f32 %v5250_v60, %v3102_v47  ;;  %v3104_v21 = vpop.f32.mrb[15].mxu1  ;;  %v5252_v18 = vpop.f32.mrb[15].mxu0 }
 0x3ff   :  { %v5449_v50 = vmax.f32 %v6413_v16, %v6417_v49 }
 0x402   :  { %v3107_v51 = vpop.f32.mrb[16].mxu1  ;;  %v5255_v52 = vpop.f32.mrb[16].mxu0 }
 0x403   :  { %v6418_v53 = vadd.f32 %v5255_v52, %v3107_v51  ;;  %v3109_v54 = vpop.f32.mrb[17].mxu1  ;;  %v5257_v55 = vpop.f32.mrb[17].mxu0 }
 0x404   :  { %v3110_v56 = vpop.f32.mrb[18].mxu1  ;;  %v5258_v57 = vpop.f32.mrb[18].mxu0 }
 0x405   :  { %v5450_v58 = vmax.f32 %v5446_v39, %v6418_v53  ;;  %v6419_v59 = vadd.f32 %v5258_v57, %v3110_v56  ;;  %v3112_v61 = vpop.f32.mrb[19].mxu1  ;;  %v5260_v62 = vpop.f32.mrb[19].mxu0 }
 0x407   :  { %v5451_v63 = vmax.f32 %v5447_v43, %v6419_v59 }
 0x40a   :  { %v3115_v32 = vpop.f32.mrb[20].mxu1  ;;  %v5263_v0 = vpop.f32.mrb[20].mxu0 }
 0x40b   :  { %v6420_v8 = vadd.f32 %v5263_v0, %v3115_v32  ;;  %v3117_v2 = vpop.f32.mrb[21].mxu1  ;;  %v5265_v4 = vpop.f32.mrb[21].mxu0 }
 0x40c   :  { %v3118_v9 = vpop.f32.mrb[22].mxu1  ;;  %v5266_v27 = vpop.f32.mrb[22].mxu0 }
 0x40d   :  { %v5452_v23 = vmax.f32 %v5448_v48, %v6420_v8  ;;  %v6421_v10 = vadd.f32 %v5266_v27, %v3118_v9  ;;  %v3120_v12 = vpop.f32.mrb[23].mxu1  ;;  %v5268_v5 = vpop.f32.mrb[23].mxu0 }
 0x40f   :  { %v5453_v6 = vmax.f32 %v5449_v50, %v6421_v10 }
 0x412   :  { %v3123_v13 = vpop.f32.mrb[24].mxu1  ;;  %v5271_v15 = vpop.f32.mrb[24].mxu0 }
 0x413   :  { %v6422_v17 = vadd.f32 %v5271_v15, %v3123_v13  ;;  %v3125_v22 = vpop.f32.mrb[25].mxu1  ;;  %v5273_v24 = vpop.f32.mrb[25].mxu0 }
 0x414   :  { %v3126_v26 = vpop.f32.mrb[26].mxu1  ;;  %v5274_v28 = vpop.f32.mrb[26].mxu0 }
 0x415   :  { %v5454_v29 = vmax.f32 %v5450_v58, %v6422_v17  ;;  %v6423_v30 = vadd.f32 %v5274_v28, %v3126_v26  ;;  %v3128_v31 = vpop.f32.mrb[27].mxu1  ;;  %v5276_v33 = vpop.f32.mrb[27].mxu0 }
 0x417   :  { %v5455_v11 = vmax.f32 %v5451_v63, %v6423_v30 }
 0x41a   :  { %v3131_v40 = vpop.f32.mrb[28].mxu1  ;;  %v5279_v16 = vpop.f32.mrb[28].mxu0 }
 0x41b   :  { %v6424_v14 = vadd.f32 %v5279_v16, %v3131_v40  ;;  %v3133_v34 = vpop.f32.mrb[29].mxu1  ;;  %v5281_v35 = vpop.f32.mrb[29].mxu0 }
 0x41c   :  { %v3134_v3 = vpop.f32.mrb[30].mxu1  ;;  %v5282_v25 = vpop.f32.mrb[30].mxu0 }
 0x41d   :  { %v5456_v36 = vmax.f32 %v5452_v23, %v6424_v14  ;;  %v6425_v37 = vadd.f32 %v5282_v25, %v3134_v3  ;;  %v3136_v38 = vpop.f32.mrb[31].mxu1  ;;  %v5284_v1 = vpop.f32.mrb[31].mxu0 }
 0x41f   :  { %v5457_v39 = vmax.f32 %v5453_v6, %v6425_v37 }
 0x422   :  { %v3139_v41 = vpop.f32.mrb[32].mxu1  ;;  %v5287_v42 = vpop.f32.mrb[32].mxu0 }
 0x423   :  { %v6426_v7 = vadd.f32 %v5287_v42, %v3139_v41  ;;  %v3141_v43 = vpop.f32.mrb[33].mxu1  ;;  %v5289_v44 = vpop.f32.mrb[33].mxu0 }
 0x424   :  { %v3142_v45 = vpop.f32.mrb[34].mxu1  ;;  %v5290_v19 = vpop.f32.mrb[34].mxu0 }
 0x425   :  { %v5458_v20 = vmax.f32 %v5454_v29, %v6426_v7  ;;  %v6427_v46 = vadd.f32 %v5290_v19, %v3142_v45  ;;  %v3144_v47 = vpop.f32.mrb[35].mxu1  ;;  %v5292_v60 = vpop.f32.mrb[35].mxu0 }
 0x427   :  { %v5459_v48 = vmax.f32 %v5455_v11, %v6427_v46 }
 0x42a   :  { %v3147_v49 = vpop.f32.mrb[36].mxu1  ;;  %v5295_v21 = vpop.f32.mrb[36].mxu0 }
 0x42b   :  { %v6428_v18 = vadd.f32 %v5295_v21, %v3147_v49  ;;  %v3149_v50 = vpop.f32.mrb[37].mxu1  ;;  %v5297_v51 = vpop.f32.mrb[37].mxu0 }
 0x42c   :  { %v3150_v52 = vpop.f32.mrb[38].mxu1  ;;  %v5298_v53 = vpop.f32.mrb[38].mxu0 }
 0x42d   :  { %v5460_v54 = vmax.f32 %v5456_v36, %v6428_v18  ;;  %v6429_v55 = vadd.f32 %v5298_v53, %v3150_v52  ;;  %v3152_v56 = vpop.f32.mrb[39].mxu1  ;;  %v5300_v57 = vpop.f32.mrb[39].mxu0 }
 0x42f   :  { %v5461_v58 = vmax.f32 %v5457_v39, %v6429_v55 }
 0x432   :  { %v3155_v59 = vpop.f32.mrb[40].mxu1  ;;  %v5303_v61 = vpop.f32.mrb[40].mxu0 }
 0x433   :  { %v6430_v62 = vadd.f32 %v5303_v61, %v3155_v59  ;;  %v3157_v63 = vpop.f32.mrb[41].mxu1  ;;  %v5305_v32 = vpop.f32.mrb[41].mxu0 }
 0x434   :  { %v3158_v0 = vpop.f32.mrb[42].mxu1  ;;  %v5306_v8 = vpop.f32.mrb[42].mxu0 }
 0x435   :  { %v5462_v2 = vmax.f32 %v5458_v20, %v6430_v62  ;;  %v6431_v4 = vadd.f32 %v5306_v8, %v3158_v0  ;;  %v3160_v9 = vpop.f32.mrb[43].mxu1  ;;  %v5308_v27 = vpop.f32.mrb[43].mxu0 }
 0x437   :  { %v5463_v23 = vmax.f32 %v5459_v48, %v6431_v4 }
 0x43a   :  { %v3163_v10 = vpop.f32.mrb[44].mxu1  ;;  %v5311_v12 = vpop.f32.mrb[44].mxu0 }
 0x43b   :  { %v6432_v5 = vadd.f32 %v5311_v12, %v3163_v10  ;;  %v3165_v6 = vpop.f32.mrb[45].mxu1  ;;  %v5313_v13 = vpop.f32.mrb[45].mxu0 }
 0x43c   :  { %v3166_v15 = vpop.f32.mrb[46].mxu1  ;;  %v5314_v17 = vpop.f32.mrb[46].mxu0 }
 0x43d   :  { %v5464_v22 = vmax.f32 %v5460_v54, %v6432_v5  ;;  %v6433_v24 = vadd.f32 %v5314_v17, %v3166_v15  ;;  %v3168_v26 = vpop.f32.mrb[47].mxu1  ;;  %v5316_v28 = vpop.f32.mrb[47].mxu0 }
 0x43f   :  { %v5465_v29 = vmax.f32 %v5461_v58, %v6433_v24 }
 0x442   :  { %v3171_v30 = vpop.f32.mrb[48].mxu1  ;;  %v5319_v31 = vpop.f32.mrb[48].mxu0 }
 0x443   :  { %v6434_v33 = vadd.f32 %v5319_v31, %v3171_v30  ;;  %v3173_v11 = vpop.f32.mrb[49].mxu1  ;;  %v5321_v40 = vpop.f32.mrb[49].mxu0 }
 0x444   :  { %v3174_v16 = vpop.f32.mrb[50].mxu1  ;;  %v5322_v14 = vpop.f32.mrb[50].mxu0 }
 0x445   :  { %v5466_v34 = vmax.f32 %v5462_v2, %v6434_v33  ;;  %v6435_v35 = vadd.f32 %v5322_v14, %v3174_v16  ;;  %v3176_v3 = vpop.f32.mrb[51].mxu1  ;;  %v5324_v25 = vpop.f32.mrb[51].mxu0 }
 0x447   :  { %v5467_v36 = vmax.f32 %v5463_v23, %v6435_v35 }
 0x44a   :  { %v3179_v37 = vpop.f32.mrb[52].mxu1  ;;  %v5327_v38 = vpop.f32.mrb[52].mxu0 }
 0x44b   :  { %v6436_v1 = vadd.f32 %v5327_v38, %v3179_v37  ;;  %v3181_v39 = vpop.f32.mrb[53].mxu1  ;;  %v5329_v41 = vpop.f32.mrb[53].mxu0 }
 0x44c   :  { %v3182_v42 = vpop.f32.mrb[54].mxu1  ;;  %v5330_v7 = vpop.f32.mrb[54].mxu0 }
 0x44d   :  { %v5468_v43 = vmax.f32 %v5464_v22, %v6436_v1  ;;  %v6437_v44 = vadd.f32 %v5330_v7, %v3182_v42  ;;  %v3184_v45 = vpop.f32.mrb[55].mxu1  ;;  %v5332_v19 = vpop.f32.mrb[55].mxu0 }
 0x44f   :  { %v5469_v20 = vmax.f32 %v5465_v29, %v6437_v44 }
 0x452   :  { %v3187_v46 = vpop.f32.mrb[56].mxu1  ;;  %v5335_v47 = vpop.f32.mrb[56].mxu0 }
 0x453   :  { %v6438_v60 = vadd.f32 %v5335_v47, %v3187_v46  ;;  %v3189_v48 = vpop.f32.mrb[57].mxu1  ;;  %v5337_v49 = vpop.f32.mrb[57].mxu0 }
 0x454   :  { %v3190_v21 = vpop.f32.mrb[58].mxu1  ;;  %v5338_v18 = vpop.f32.mrb[58].mxu0 }
 0x455   :  { %v5470_v50 = vmax.f32 %v5466_v34, %v6438_v60  ;;  %v6439_v51 = vadd.f32 %v5338_v18, %v3190_v21  ;;  %v3192_v52 = vpop.f32.mrb[59].mxu1  ;;  %v5340_v53 = vpop.f32.mrb[59].mxu0 }
 0x457   :  { %v5471_v54 = vmax.f32 %v5467_v36, %v6439_v51 }
 0x45a   :  { %v3195_v55 = vpop.f32.mrb[60].mxu1  ;;  %v5343_v56 = vpop.f32.mrb[60].mxu0 }
 0x45b   :  { %v6440_v57 = vadd.f32 %v5343_v56, %v3195_v55  ;;  %v3197_v58 = vpop.f32.mrb[61].mxu1  ;;  %v5345_v59 = vpop.f32.mrb[61].mxu0 }
 0x45c   :  { %v3198_v61 = vpop.f32.mrb[62].mxu1  ;;  %v5346_v62 = vpop.f32.mrb[62].mxu0 }
 0x45d   :  { %v5472_v63 = vmax.f32 %v5468_v43, %v6440_v57  ;;  %v6441_v32 = vadd.f32 %v5346_v62, %v3198_v61  ;;  %v3200_v0 = vpop.f32.mrb[63].mxu1  ;;  %v5348_v8 = vpop.f32.mrb[63].mxu0 }
 0x45f   :  { %v5473_v2 = vmax.f32 %v5469_v20, %v6441_v32 }
 0x462   :  { %v3203_v4 = vpop.f32.mrb[64].mxu1  ;;  %v5351_v9 = vpop.f32.mrb[64].mxu0 }
 0x463   :  { %v6442_v27 = vadd.f32 %v5351_v9, %v3203_v4  ;;  %v3205_v23 = vpop.f32.mrb[65].mxu1  ;;  %v5353_v10 = vpop.f32.mrb[65].mxu0 }
 0x464   :  { %v3206_v12 = vpop.f32.mrb[66].mxu1  ;;  %v5354_v5 = vpop.f32.mrb[66].mxu0 }
 0x465   :  { %v5474_v6 = vmax.f32 %v5470_v50, %v6442_v27  ;;  %v6443_v13 = vadd.f32 %v5354_v5, %v3206_v12  ;;  %v3208_v15 = vpop.f32.mrb[67].mxu1  ;;  %v5356_v17 = vpop.f32.mrb[67].mxu0 }
 0x467   :  { %v5475_v22 = vmax.f32 %v5471_v54, %v6443_v13 }
 0x46a   :  { %v3211_v24 = vpop.f32.mrb[68].mxu1  ;;  %v5359_v26 = vpop.f32.mrb[68].mxu0 }
 0x46b   :  { %v6444_v28 = vadd.f32 %v5359_v26, %v3211_v24  ;;  %v3213_v29 = vpop.f32.mrb[69].mxu1  ;;  %v5361_v30 = vpop.f32.mrb[69].mxu0 }
 0x46c   :  { %v3214_v31 = vpop.f32.mrb[70].mxu1  ;;  %v5362_v33 = vpop.f32.mrb[70].mxu0 }
 0x46d   :  { %v5476_v11 = vmax.f32 %v5472_v63, %v6444_v28  ;;  %v6445_v40 = vadd.f32 %v5362_v33, %v3214_v31  ;;  %v3216_v16 = vpop.f32.mrb[71].mxu1  ;;  %v5364_v14 = vpop.f32.mrb[71].mxu0 }
 0x46f   :  { %v5477_v34 = vmax.f32 %v5473_v2, %v6445_v40 }
 0x472   :  { %v3219_v35 = vpop.f32.mrb[72].mxu1  ;;  %v5367_v3 = vpop.f32.mrb[72].mxu0 }
 0x473   :  { %v6446_v25 = vadd.f32 %v5367_v3, %v3219_v35  ;;  %v3221_v36 = vpop.f32.mrb[73].mxu1  ;;  %v5369_v37 = vpop.f32.mrb[73].mxu0 }
 0x474   :  { %v3222_v38 = vpop.f32.mrb[74].mxu1  ;;  %v5370_v1 = vpop.f32.mrb[74].mxu0 }
 0x475   :  { %v5478_v39 = vmax.f32 %v5474_v6, %v6446_v25  ;;  %v6447_v41 = vadd.f32 %v5370_v1, %v3222_v38  ;;  %v3224_v42 = vpop.f32.mrb[75].mxu1  ;;  %v5372_v7 = vpop.f32.mrb[75].mxu0 }
 0x477   :  { %v5479_v43 = vmax.f32 %v5475_v22, %v6447_v41 }
 0x47a   :  { %v3227_v44 = vpop.f32.mrb[76].mxu1  ;;  %v5375_v45 = vpop.f32.mrb[76].mxu0 }
 0x47b   :  { %v6448_v19 = vadd.f32 %v5375_v45, %v3227_v44  ;;  %v3229_v20 = vpop.f32.mrb[77].mxu1  ;;  %v5377_v46 = vpop.f32.mrb[77].mxu0 }
 0x47c   :  { %v3230_v47 = vpop.f32.mrb[78].mxu1  ;;  %v5378_v60 = vpop.f32.mrb[78].mxu0 }
 0x47d   :  { %v5480_v48 = vmax.f32 %v5476_v11, %v6448_v19  ;;  %v6449_v49 = vadd.f32 %v5378_v60, %v3230_v47  ;;  %v3232_v21 = vpop.f32.mrb[79].mxu1  ;;  %v5380_v18 = vpop.f32.mrb[79].mxu0 }
 0x47f   :  { %v5481_v50 = vmax.f32 %v5477_v34, %v6449_v49 }
 0x482   :  { %v3235_v51 = vpop.f32.mrb[80].mxu1  ;;  %v5383_v52 = vpop.f32.mrb[80].mxu0 }
 0x483   :  { %v6450_v53 = vadd.f32 %v5383_v52, %v3235_v51  ;;  %v3237_v54 = vpop.f32.mrb[81].mxu1  ;;  %v5385_v55 = vpop.f32.mrb[81].mxu0 }
 0x484   :  { %v3238_v56 = vpop.f32.mrb[82].mxu1  ;;  %v5386_v57 = vpop.f32.mrb[82].mxu0 }
 0x485   :  { %v5482_v58 = vmax.f32 %v5478_v39, %v6450_v53  ;;  %v6451_v59 = vadd.f32 %v5386_v57, %v3238_v56  ;;  %v3240_v61 = vpop.f32.mrb[83].mxu1  ;;  %v5388_v62 = vpop.f32.mrb[83].mxu0 }
 0x487   :  { %v5483_v63 = vmax.f32 %v5479_v43, %v6451_v59  ;;  %v5535_v59 = vpop.permute.xlu0 %5534 }
 0x48a   :  { %v3243_v32 = vpop.f32.mrb[84].mxu1  ;;  %v5391_v0 = vpop.f32.mrb[84].mxu0 }
 0x48b   :  { %v6452_v8 = vadd.f32 %v5391_v0, %v3243_v32  ;;  %v3245_v2 = vpop.f32.mrb[85].mxu1  ;;  %v5393_v4 = vpop.f32.mrb[85].mxu0 }
 0x48c   :  { %v3246_v9 = vpop.f32.mrb[86].mxu1  ;;  %v5394_v27 = vpop.f32.mrb[86].mxu0 }
 0x48d   :  { %v5484_v23 = vmax.f32 %v5480_v48, %v6452_v8  ;;  %v6453_v10 = vadd.f32 %v5394_v27, %v3246_v9  ;;  %v3248_v12 = vpop.f32.mrb[87].mxu1  ;;  %v5396_v5 = vpop.f32.mrb[87].mxu0 }
 0x48f   :  { %v5485_v6 = vmax.f32 %v5481_v50, %v6453_v10  ;;  %v5540_v10 = vpop.permute.xlu0 %5539 }
 0x492   :  { %v3251_v13 = vpop.f32.mrb[88].mxu1  ;;  %v5399_v15 = vpop.f32.mrb[88].mxu0 }
 0x493   :  { %v6454_v17 = vadd.f32 %v5399_v15, %v3251_v13  ;;  %v3253_v22 = vpop.f32.mrb[89].mxu1  ;;  %v5401_v24 = vpop.f32.mrb[89].mxu0 }
 0x494   :  { %v3254_v26 = vpop.f32.mrb[90].mxu1  ;;  %v5402_v28 = vpop.f32.mrb[90].mxu0 }
 0x495   :  { %v5486_v29 = vmax.f32 %v5482_v58, %v6454_v17  ;;  %v6455_v30 = vadd.f32 %v5402_v28, %v3254_v26  ;;  %v3256_v31 = vpop.f32.mrb[91].mxu1  ;;  %v5404_v33 = vpop.f32.mrb[91].mxu0 }
 0x496   :  { %v5545_v13 = vpop.permute.xlu1 %5544 }
 0x497   :  { %v5487_v11 = vmax.f32 %v5483_v63, %v6455_v30 }
 0x49a   :  { %v3259_v40 = vpop.f32.mrb[92].mxu1  ;;  %v5407_v16 = vpop.f32.mrb[92].mxu0 }
 0x49b   :  { %v6456_v14 = vadd.f32 %v5407_v16, %v3259_v40  ;;  %v3261_v34 = vpop.f32.mrb[93].mxu1  ;;  %v5409_v35 = vpop.f32.mrb[93].mxu0 }
 0x49c   :  { %v3262_v3 = vpop.f32.mrb[94].mxu1  ;;  %v5410_v25 = vpop.f32.mrb[94].mxu0 }
 0x49d   :  { %v5488_v36 = vmax.f32 %v5484_v23, %v6456_v14  ;;  %v6457_v37 = vadd.f32 %v5410_v25, %v3262_v3  ;;  %v3264_v38 = vpop.f32.mrb[95].mxu1  ;;  %v5412_v1 = vpop.f32.mrb[95].mxu0 }
 0x49e   :  { %v5550_v14 = vpop.permute.xlu1 %5549 }
 0x49f   :  { %v5489_v39 = vmax.f32 %v5485_v6, %v6457_v37 }
 0x4a2   :  { %v3267_v41 = vpop.f32.mrb[96].mxu1  ;;  %v5415_v42 = vpop.f32.mrb[96].mxu0 }
 0x4a3   :  { %v6458_v7 = vadd.f32 %v5415_v42, %v3267_v41  ;;  %v3269_v43 = vpop.f32.mrb[97].mxu1  ;;  %v5417_v44 = vpop.f32.mrb[97].mxu0 }
 0x4a4   :  { %v3270_v45 = vpop.f32.mrb[98].mxu1  ;;  %v5418_v19 = vpop.f32.mrb[98].mxu0 }
 0x4a5   :  { %v5490_v20 = vmax.f32 %v5486_v29, %v6458_v7  ;;  %v6459_v46 = vadd.f32 %v5418_v19, %v3270_v45  ;;  %v3272_v47 = vpop.f32.mrb[99].mxu1  ;;  %v5420_v60 = vpop.f32.mrb[99].mxu0 }
 0x4a7   :  { %v5491_v48 = vmax.f32 %v5487_v11, %v6459_v46 }
 0x4aa   :  { %v3275_v49 = vpop.f32.mrb[100].mxu1  ;;  %v5423_v21 = vpop.f32.mrb[100].mxu0 }
 0x4ab   :  { %v6460_v18 = vadd.f32 %v5423_v21, %v3275_v49  ;;  %v3277_v50 = vpop.f32.mrb[101].mxu1  ;;  %v5425_v51 = vpop.f32.mrb[101].mxu0 }
 0x4ac   :  { %v3278_v52 = vpop.f32.mrb[102].mxu1  ;;  %v5426_v53 = vpop.f32.mrb[102].mxu0 }
 0x4ad   :  { %v5492_v54 = vmax.f32 %v5488_v36, %v6460_v18  ;;  %v6461_v55 = vadd.f32 %v5426_v53, %v3278_v52  ;;  %v3280_v56 = vpop.f32.mrb[103].mxu1  ;;  %v5428_v57 = vpop.f32.mrb[103].mxu0 }
 0x4af   :  { %v5493_v58 = vmax.f32 %v5489_v39, %v6461_v55 }
 0x4b2   :  { %v3283_v61 = vpop.f32.mrb[104].mxu1  ;;  %v5431_v62 = vpop.f32.mrb[104].mxu0 }
 0x4b3   :  { %v6462_v63 = vadd.f32 %v5431_v62, %v3283_v61  ;;  %v3285_v32 = vpop.f32.mrb[105].mxu1  ;;  %v5433_v0 = vpop.f32.mrb[105].mxu0 }
 0x4b4   :  { %v3286_v8 = vpop.f32.mrb[106].mxu1  ;;  %v5434_v2 = vpop.f32.mrb[106].mxu0 }
 0x4b5   :  { %v5494_v4 = vmax.f32 %v5490_v20, %v6462_v63  ;;  %v6463_v9 = vadd.f32 %v5434_v2, %v3286_v8  ;;  %v3288_v27 = vpop.f32.mrb[107].mxu1  ;;  %v5436_v23 = vpop.f32.mrb[107].mxu0 }
 0x4b7   :  { %v5552_v12 = vadd.f32 %v5535_v59, %v5494_v4  ;;  %v5495_v5 = vmax.f32 %v5491_v48, %v6463_v9 }
 0x4b9   :  { %5556 = vst [vmem:[#allocation9] sm:$0xff] %v5552_v12  ;;  %v5553_v6 = vadd.f32 %v5540_v10, %v5495_v5 }
 0x4ba   :  { %v3291_v15 = vpop.f32.mrb[108].mxu1  ;;  %v5439_v17 = vpop.f32.mrb[108].mxu0 }
 0x4bb   :  { %5557 = vst [vmem:[#allocation9 + $0x8] sm:$0xff] %v5553_v6  ;;  %v6464_v22 = vadd.f32 %v5439_v17, %v3291_v15  ;;  %v3293_v24 = vpop.f32.mrb[109].mxu1  ;;  %v5441_v26 = vpop.f32.mrb[109].mxu0 }
 0x4bc   :  { %v3294_v28 = vpop.f32.mrb[110].mxu1  ;;  %v5442_v29 = vpop.f32.mrb[110].mxu0 }
 0x4bd   :  { %v5496_v30 = vmax.f32 %v5492_v54, %v6464_v22  ;;  %v6465_v31 = vadd.f32 %v5442_v29, %v3294_v28  ;;  %v3296_v33 = vpop.f32.mrb[111].mxu1  ;;  %v5444_v11 = vpop.f32.mrb[111].mxu0 }
 0x4bf   :  { %v5554_v40 = vadd.f32 %v5545_v13, %v5496_v30  ;;  %v5497_v16 = vmax.f32 %v5493_v58, %v6465_v31 }
 0x4c1   :  { %5558 = vst [vmem:[#allocation9 + $0x10] sm:$0xff] %v5554_v40  ;;  %v5555_v34 = vadd.f32 %v5550_v14, %v5497_v16 }
 0x4c3   :  { %5559 = vst [vmem:[#allocation9 + $0x18] sm:$0xff] %v5555_v34 }
 0x4c4   :  { %7205 = shalt.err (!%p7202_p6)
}
 0x4c5   :  { %s7206_s30 = scalar_lea.hbm %s7893_s4, 512 }
 0x4c6   :  { %p7207_p7 = scmp.ne.s32.totalorder %s7893_s4, %s7206_s30  ;;  %p7210_p8 = scmp.lt.u32.totalorder %s7206_s30, %s7893_s4 }
 0x4c8   :  { %p7212_p9 = pnand %p7210_p8, %p7207_p7 }
 0x4ca   :  { %7215 = shalt.err (!%p7212_p9)
}
 0x4cb   :  { %s7229_s9 = smov 128   ;;  %s7230_s10 = smov 8  }
 0x4cc   :  { %5571 = dma.vmem_to_hbm [thread:$0]  %s5566_s26, 512, %s7893_s4, [#allocation6], %s7229_s9, %s7229_s9, %s7230_s10  }
 0x4cd   :  { %7220 = dma.done.wait [#allocation6], 512  }
 0x4ce   :  { %7221 = vsyncadd [#allocation6], 4294966784 }
 0x4cf   :  { %5575 = vsyncpa [#allocation5], 1 }
 0x4d0   :  { %5576 = vsyncpa [#allocation8], 1 }
 0x4d1   :  { %5577 = vsyncpa [#allocation6], 1 }

</bundles_post_ra>
